<compile_context>
chip_gen: v7x
topology: tpu7x:2x2x1
jax: 0.10.0
libtpu: 0.0.40
codegen_flags: <defaults>
</compile_context>

<pallas_src>
import functools
import math

import jax
import jax.numpy as jnp
from jax.experimental import pallas as pl
from jax.experimental.pallas import tpu as pltpu

BN_EPS = 1e-5
LEAKY_SLOPE = 0.1


# ----------------------------------------------------------------------------
# Fused Resblock kernel (NHWC layout inside the kernel).
# ----------------------------------------------------------------------------
def _resblock_kernel(xpad_ref, w1_ref, s1_ref, t1_ref, w2_ref, s2_ref, t2_ref,
                     out_ref, hpad_ref, *, res: bool):
    bb, H, W, chid = out_ref.shape
    cin = xpad_ref.shape[-1]
    m = bb * H * W
    cdt = w1_ref.dtype                      # MXU operand dtype (bf16 or f32)

    # Padded input was built once in the wrapper; cast it to the MXU operand
    # dtype ONCE (not once per duplicated im2col tap).
    xb = xpad_ref[...].astype(cdt)

    def conv3x3(src, w_ref, c):
        # 9 shifted taps -> 9 accumulating MXU matmuls; no lane-axis concat,
        # no (m, 9c) im2col slab materialized.
        acc = None
        for t in range(9):
            kh, kw = divmod(t, 3)
            tap = src[:, kh:kh + H, kw:kw + W, :].reshape(m, c)
            p = jnp.dot(tap, w_ref[t * c:(t + 1) * c, :],
                        preferred_element_type=jnp.float32)
            acc = p if acc is None else acc + p
        return acc                                           # (m, chid) f32

    def bn_act(a, s_ref, t_ref):
        y = a * s_ref[...] + t_ref[...]       # folded conv-bias + BN affine
        return jnp.where(y > 0, y, LEAKY_SLOPE * y)          # LeakyReLU(0.1)

    # ---- layer1 (Dropout == identity in eval mode) ---------------------------
    h = bn_act(conv3x3(xb, w1_ref, cin), s1_ref, t1_ref)     # (m, chid) f32

    # ---- layer-2 halo in a persistent bf16 scratch ---------------------------
    # Zero only the 1-pixel border (every step -> correct under megacore
    # "parallel" grid splitting); the interior is fully overwritten below.
    zrow = jnp.zeros((bb, 1, W + 2, chid), hpad_ref.dtype)
    zcol = jnp.zeros((bb, H, 1, chid), hpad_ref.dtype)
    hpad_ref[:, 0:1, :, :] = zrow
    hpad_ref[:, H + 1:H + 2, :, :] = zrow
    hpad_ref[:, 1:H + 1, 0:1, :] = zcol
    hpad_ref[:, 1:H + 1, W + 1:W + 2, :] = zcol
    hpad_ref[:, 1:H + 1, 1:W + 1, :] = (
        h.reshape(bb, H, W, chid).astype(hpad_ref.dtype))

    # ---- layer2, then post-activation residual add (as in Resblock.forward) --
    y = bn_act(conv3x3(hpad_ref[...], w2_ref, chid), s2_ref, t2_ref)
    y = y.reshape(bb, H, W, chid)
    if res:
        # Exact f32 skip path, read straight from the padded f32 input.
        y = y + xpad_ref[:, 1:H + 1, 1:W + 1, :]
    out_ref[...] = y.astype(out_ref.dtype)


# ----------------------------------------------------------------------------
# Wrapper: NCHW in / NCHW out, one pallas_call per Resblock.
# ----------------------------------------------------------------------------
def _pick_batch_block(B):
    """Largest batch fold that keeps >= 2 grid steps (v7x has 2 TensorCores)
    and <= 8 images per step (VMEM headroom on every generation)."""
    best = 1
    for d in range(1, min(B, 8) + 1):
        if B % d == 0 and B // d >= 2:
            best = d
    return best


def resblock_forward(params, x, *, res=True, param_dtype=jnp.bfloat16,
                     batch_block=None):
    """x: (B, C, H, W) float32, exactly like the PyTorch Resblock input.

    Eval-mode semantics (running-stat BatchNorm folded into scale/shift with
    the conv bias; Dropout = identity). param_dtype=jnp.bfloat16 halves weight
    DMA and doubles MXU rate at ~1e-2 relative error; pass jnp.float32 for
    bit-accurate validation runs.
    """
    B, C, H, W = x.shape
    hid = params["l1"]["w"].shape[-1]
    if res and C != hid:
        raise ValueError("res=True requires input_channels == hidden_dim")

    bb = _pick_batch_block(B) if batch_block is None else batch_block
    if B % bb:
        raise ValueError("batch must be divisible by batch_block")

    # NCHW -> NHWC (channels on the lane dimension).
    x_nhwc = jnp.transpose(x, (0, 2, 3, 1)).astype(jnp.float32)

    # Pad tiny channel counts up to a sublane-friendly multiple (zero channels
    # are exact); skipped when the residual add needs the raw channel count.
    w1 = params["l1"]["w"]
    cpad = (-C) % 8
    if cpad and not res:
        x_nhwc = jnp.pad(x_nhwc, ((0, 0), (0, 0), (0, 0), (0, cpad)))
        w1 = jnp.pad(w1, ((0, 0), (0, 0), (0, cpad), (0, 0)))
    cin = x_nhwc.shape[-1]

    # 1-pixel spatial halo built ONCE per call (fused XLA pad); the kernel
    # never memsets or rebuilds the layer-1 halo.
    x_pad = jnp.pad(x_nhwc, ((0, 0), (1, 1), (1, 1), (0, 0)))

    # Weights laid out for the per-tap (cin, hid) contraction, tap-major /
    # channel-minor; BN affine + conv bias pre-folded into scale/shift.
    w1k = w1.reshape(9 * cin, hid).astype(param_dtype)
    w2k = params["l2"]["w"].reshape(9 * hid, hid).astype(param_dtype)
    s1 = params["l1"]["scale"].reshape(1, hid).astype(jnp.float32)
    t1 = params["l1"]["shift"].reshape(1, hid).astype(jnp.float32)
    s2 = params["l2"]["scale"].reshape(1, hid).astype(jnp.float32)
    t2 = params["l2"]["shift"].reshape(1, hid).astype(jnp.float32)

    kernel = functools.partial(_resblock_kernel, res=res)

    out = pl.pallas_call(
        kernel,
        out_shape=jax.ShapeDtypeStruct((B, H, W, hid), jnp.float32),
        grid_spec=pltpu.PrefetchScalarGridSpec(
            num_scalar_prefetch=0,
            grid=(B // bb,),
            in_specs=[
                pl.BlockSpec((bb, H + 2, W + 2, cin), lambda b: (b, 0, 0, 0)),
                pl.BlockSpec((9 * cin, hid), lambda b: (0, 0)),
                pl.BlockSpec((1, hid), lambda b: (0, 0)),
                pl.BlockSpec((1, hid), lambda b: (0, 0)),
                pl.BlockSpec((9 * hid, hid), lambda b: (0, 0)),
                pl.BlockSpec((1, hid), lambda b: (0, 0)),
                pl.BlockSpec((1, hid), lambda b: (0, 0)),
            ],
            out_specs=pl.BlockSpec((bb, H, W, hid), lambda b: (b, 0, 0, 0)),
            scratch_shapes=[
                pltpu.VMEM((bb, H + 2, W + 2, hid), param_dtype),  # padded h
            ],
        ),
        compiler_params=pltpu.CompilerParams(
            dimension_semantics=("parallel",),
            vmem_limit_bytes=min(64 << 20, max(32 << 20, (16 + 3 * bb) << 20)),
        ),
    )(x_pad, w1k, s1, t1, w2k, s2, t2)

    # NHWC -> NCHW, matching the PyTorch module's output layout.
    return jnp.transpose(out, (0, 3, 1, 2))


resblock_forward_jit = jax.jit(
    resblock_forward, static_argnames=("res", "param_dtype", "batch_block"))


# ----------------------------------------------------------------------------
# Parameter construction (mimics nn.Conv2d / nn.BatchNorm2d defaults).
# ----------------------------------------------------------------------------
def _conv_bn_layer_params(key, cin, cout):
    kw, kb = jax.random.split(key)
    bound = 1.0 / math.sqrt(9 * cin)
    w = jax.random.uniform(kw, (3, 3, cin, cout), jnp.float32, -bound, bound)
    b = jax.random.uniform(kb, (cout,), jnp.float32, -bound, bound)
    gamma = jnp.ones((cout,), jnp.float32)
    beta = jnp.zeros((cout,), jnp.float32)
    mean = jnp.zeros((cout,), jnp.float32)   # running_mean
    var = jnp.ones((cout,), jnp.float32)     # running_var
    scale = gamma / jnp.sqrt(var + BN_EPS)
    shift = beta - mean * scale + b * scale  # conv bias folded into shift
    return {"w": w, "scale": scale, "shift": shift}


def make_resblock_params(key, input_channels, hidden_dim):
    k1, k2 = jax.random.split(key)
    return {"l1": _conv_bn_layer_params(k1, input_channels, hidden_dim),
            "l2": _conv_bn_layer_params(k2, hidden_dim, hidden_dim)}


# ----------------------------------------------------------------------------
# Pure-JAX f32 reference (numerical sanity check against the kernel).
# ----------------------------------------------------------------------------
def resblock_reference(params, x, *, res):
    x_nhwc = jnp.transpose(x, (0, 2, 3, 1)).astype(jnp.float32)

    def layer(z, p):
        z = jax.lax.conv_general_dilated(
            z, p["w"].astype(jnp.float32), (1, 1), "SAME",
            dimension_numbers=("NHWC", "HWIO", "NHWC"),
            precision=jax.lax.Precision.HIGHEST)
        z = z * p["scale"] + p["shift"]
        return jnp.where(z > 0, z, LEAKY_SLOPE * z)

    h = layer(x_nhwc, params["l1"])
    y = layer(h, params["l2"])
    if res:
        y = y + x_nhwc
    return jnp.transpose(y, (0, 3, 1, 2))


def _max_rel_err(a, b):
    return float(jnp.max(jnp.abs(a - b)) / (jnp.max(jnp.abs(b)) + 1e-6))


if __name__ == "__main__":
    key = jax.random.PRNGKey(0)
    kp1, kp2, kx1, kx2 = jax.random.split(key, 4)

    B, H, W = 2, 16, 16

    # --- Resblock with residual connection (input_channels == hidden_dim) ----
    C1, HID = 32, 32
    params_res = make_resblock_params(kp1, C1, HID)
    x_res = jax.random.normal(kx1, (B, C1, H, W), jnp.float32)
    y_res = jax.block_until_ready(resblock_forward_jit(params_res, x_res,
                                                       res=True))
    assert y_res.shape == (B, HID, H, W), y_res.shape
    assert bool(jnp.all(jnp.isfinite(y_res)))
    ref_res = resblock_reference(params_res, x_res, res=True)
    assert _max_rel_err(y_res, ref_res) < 3e-2, _max_rel_err(y_res, ref_res)

    # --- Resblock without residual (input_channels != hidden_dim) ------------
    C2 = 4
    params_nr = make_resblock_params(kp2, C2, HID)
    x_nr = jax.random.normal(kx2, (B, C2, H, W), jnp.float32)
    y_nr = jax.block_until_ready(resblock_forward_jit(params_nr, x_nr,
                                                      res=False))
    assert y_nr.shape == (B, HID, H, W), y_nr.shape
    assert bool(jnp.all(jnp.isfinite(y_nr)))
    ref_nr = resblock_reference(params_nr, x_nr, res=False)
    assert _max_rel_err(y_nr, ref_nr) < 3e-2, _max_rel_err(y_nr, ref_nr)

    print("KERNEL_OK")
</pallas_src>

<mosaic_0001>
module attributes {stable_mosaic.version = 11 : i64} {
  func.func @_resblock_kernel(%arg0: i32, %arg1: memref<1x18x18x32xf32, #tpu.memory_space<vmem>>, %arg2: memref<288x32xbf16, #tpu.memory_space<vmem>>, %arg3: memref<1x32xf32, #tpu.memory_space<vmem>>, %arg4: memref<1x32xf32, #tpu.memory_space<vmem>>, %arg5: memref<288x32xbf16, #tpu.memory_space<vmem>>, %arg6: memref<1x32xf32, #tpu.memory_space<vmem>>, %arg7: memref<1x32xf32, #tpu.memory_space<vmem>>, %arg8: memref<1x16x16x32xf32, #tpu.memory_space<vmem>>, %arg9: memref<1x18x18x32xbf16, #tpu.memory_space<vmem>>) attributes {dimension_semantics = [#tpu.dimension_semantics<parallel>], iteration_bounds = array<i64: 2>, scalar_prefetch = 0 : i64, scratch_operands = 1 : i64, tpu.core_type = #tpu.core_type<tc>, window_params = [{transform_indices = @transform_0, window_bounds = array<i64: 1, 18, 18, 32>}, {pipeline_mode = #tpu.pipeline_mode<synchronous>, transform_indices = @transform_1, window_bounds = array<i64: 288, 32>}, {pipeline_mode = #tpu.pipeline_mode<synchronous>, transform_indices = @transform_2, window_bounds = array<i64: 1, 32>}, {pipeline_mode = #tpu.pipeline_mode<synchronous>, transform_indices = @transform_3, window_bounds = array<i64: 1, 32>}, {pipeline_mode = #tpu.pipeline_mode<synchronous>, transform_indices = @transform_4, window_bounds = array<i64: 288, 32>}, {pipeline_mode = #tpu.pipeline_mode<synchronous>, transform_indices = @transform_5, window_bounds = array<i64: 1, 32>}, {pipeline_mode = #tpu.pipeline_mode<synchronous>, transform_indices = @transform_6, window_bounds = array<i64: 1, 32>}, {transform_indices = @transform_7, window_bounds = array<i64: 1, 16, 16, 32>}]} {
    %c0 = arith.constant 0 : index
    %c0_0 = arith.constant 0 : index
    %c0_1 = arith.constant 0 : index
    %c0_2 = arith.constant 0 : index
    %0 = vector.load %arg1[%c0, %c0_0, %c0_1, %c0_2] : memref<1x18x18x32xf32, #tpu.memory_space<vmem>>, vector<1x18x18x32xf32>
    %1 = arith.truncf %0 : vector<1x18x18x32xf32> to vector<1x18x18x32xbf16>
    %2 = vector.extract_strided_slice %1 {offsets = [0, 0, 0, 0], sizes = [1, 16, 16, 32], strides = [1, 1, 1, 1]} : vector<1x18x18x32xbf16> to vector<1x16x16x32xbf16>
    %3 = vector.shape_cast %2 : vector<1x16x16x32xbf16> to vector<256x32xbf16>
    %c0_3 = arith.constant 0 : index
    %c0_4 = arith.constant 0 : index
    %4 = vector.load %arg2[%c0_3, %c0_4] : memref<288x32xbf16, #tpu.memory_space<vmem>>, vector<32x32xbf16>
    %cst = arith.constant dense<0.000000e+00> : vector<256x32xf32>
    %5 = tpu.matmul %3, %4, %cst {dimension_numbers = #tpu.dot_dimension_numbers<[1], [0], [0], [1], [0, 0, 1, 1], [], []>} : vector<256x32xbf16>, vector<32x32xbf16>, vector<256x32xf32> -> vector<256x32xf32>
    %6 = vector.extract_strided_slice %1 {offsets = [0, 0, 1, 0], sizes = [1, 16, 16, 32], strides = [1, 1, 1, 1]} : vector<1x18x18x32xbf16> to vector<1x16x16x32xbf16>
    %7 = vector.shape_cast %6 : vector<1x16x16x32xbf16> to vector<256x32xbf16>
    %c32 = arith.constant 32 : index
    %c0_5 = arith.constant 0 : index
    %8 = vector.load %arg2[%c32, %c0_5] : memref<288x32xbf16, #tpu.memory_space<vmem>>, vector<32x32xbf16>
    %cst_6 = arith.constant dense<0.000000e+00> : vector<256x32xf32>
    %9 = tpu.matmul %7, %8, %cst_6 {dimension_numbers = #tpu.dot_dimension_numbers<[1], [0], [0], [1], [0, 0, 1, 1], [], []>} : vector<256x32xbf16>, vector<32x32xbf16>, vector<256x32xf32> -> vector<256x32xf32>
    %10 = arith.addf %5, %9 : vector<256x32xf32>
    %11 = vector.extract_strided_slice %1 {offsets = [0, 0, 2, 0], sizes = [1, 16, 16, 32], strides = [1, 1, 1, 1]} : vector<1x18x18x32xbf16> to vector<1x16x16x32xbf16>
    %12 = vector.shape_cast %11 : vector<1x16x16x32xbf16> to vector<256x32xbf16>
    %c64 = arith.constant 64 : index
    %c0_7 = arith.constant 0 : index
    %13 = vector.load %arg2[%c64, %c0_7] : memref<288x32xbf16, #tpu.memory_space<vmem>>, vector<32x32xbf16>
    %cst_8 = arith.constant dense<0.000000e+00> : vector<256x32xf32>
    %14 = tpu.matmul %12, %13, %cst_8 {dimension_numbers = #tpu.dot_dimension_numbers<[1], [0], [0], [1], [0, 0, 1, 1], [], []>} : vector<256x32xbf16>, vector<32x32xbf16>, vector<256x32xf32> -> vector<256x32xf32>
    %15 = arith.addf %10, %14 : vector<256x32xf32>
    %16 = vector.extract_strided_slice %1 {offsets = [0, 1, 0, 0], sizes = [1, 16, 16, 32], strides = [1, 1, 1, 1]} : vector<1x18x18x32xbf16> to vector<1x16x16x32xbf16>
    %17 = vector.shape_cast %16 : vector<1x16x16x32xbf16> to vector<256x32xbf16>
    %c96 = arith.constant 96 : index
    %c0_9 = arith.constant 0 : index
    %18 = vector.load %arg2[%c96, %c0_9] : memref<288x32xbf16, #tpu.memory_space<vmem>>, vector<32x32xbf16>
    %cst_10 = arith.constant dense<0.000000e+00> : vector<256x32xf32>
    %19 = tpu.matmul %17, %18, %cst_10 {dimension_numbers = #tpu.dot_dimension_numbers<[1], [0], [0], [1], [0, 0, 1, 1], [], []>} : vector<256x32xbf16>, vector<32x32xbf16>, vector<256x32xf32> -> vector<256x32xf32>
    %20 = arith.addf %15, %19 : vector<256x32xf32>
    %21 = vector.extract_strided_slice %1 {offsets = [0, 1, 1, 0], sizes = [1, 16, 16, 32], strides = [1, 1, 1, 1]} : vector<1x18x18x32xbf16> to vector<1x16x16x32xbf16>
    %22 = vector.shape_cast %21 : vector<1x16x16x32xbf16> to vector<256x32xbf16>
    %c128 = arith.constant 128 : index
    %c0_11 = arith.constant 0 : index
    %23 = vector.load %arg2[%c128, %c0_11] : memref<288x32xbf16, #tpu.memory_space<vmem>>, vector<32x32xbf16>
    %cst_12 = arith.constant dense<0.000000e+00> : vector<256x32xf32>
    %24 = tpu.matmul %22, %23, %cst_12 {dimension_numbers = #tpu.dot_dimension_numbers<[1], [0], [0], [1], [0, 0, 1, 1], [], []>} : vector<256x32xbf16>, vector<32x32xbf16>, vector<256x32xf32> -> vector<256x32xf32>
    %25 = arith.addf %20, %24 : vector<256x32xf32>
    %26 = vector.extract_strided_slice %1 {offsets = [0, 1, 2, 0], sizes = [1, 16, 16, 32], strides = [1, 1, 1, 1]} : vector<1x18x18x32xbf16> to vector<1x16x16x32xbf16>
    %27 = vector.shape_cast %26 : vector<1x16x16x32xbf16> to vector<256x32xbf16>
    %c160 = arith.constant 160 : index
    %c0_13 = arith.constant 0 : index
    %28 = vector.load %arg2[%c160, %c0_13] : memref<288x32xbf16, #tpu.memory_space<vmem>>, vector<32x32xbf16>
    %cst_14 = arith.constant dense<0.000000e+00> : vector<256x32xf32>
    %29 = tpu.matmul %27, %28, %cst_14 {dimension_numbers = #tpu.dot_dimension_numbers<[1], [0], [0], [1], [0, 0, 1, 1], [], []>} : vector<256x32xbf16>, vector<32x32xbf16>, vector<256x32xf32> -> vector<256x32xf32>
    %30 = arith.addf %25, %29 : vector<256x32xf32>
    %31 = vector.extract_strided_slice %1 {offsets = [0, 2, 0, 0], sizes = [1, 16, 16, 32], strides = [1, 1, 1, 1]} : vector<1x18x18x32xbf16> to vector<1x16x16x32xbf16>
    %32 = vector.shape_cast %31 : vector<1x16x16x32xbf16> to vector<256x32xbf16>
    %c192 = arith.constant 192 : index
    %c0_15 = arith.constant 0 : index
    %33 = vector.load %arg2[%c192, %c0_15] : memref<288x32xbf16, #tpu.memory_space<vmem>>, vector<32x32xbf16>
    %cst_16 = arith.constant dense<0.000000e+00> : vector<256x32xf32>
    %34 = tpu.matmul %32, %33, %cst_16 {dimension_numbers = #tpu.dot_dimension_numbers<[1], [0], [0], [1], [0, 0, 1, 1], [], []>} : vector<256x32xbf16>, vector<32x32xbf16>, vector<256x32xf32> -> vector<256x32xf32>
    %35 = arith.addf %30, %34 : vector<256x32xf32>
    %36 = vector.extract_strided_slice %1 {offsets = [0, 2, 1, 0], sizes = [1, 16, 16, 32], strides = [1, 1, 1, 1]} : vector<1x18x18x32xbf16> to vector<1x16x16x32xbf16>
    %37 = vector.shape_cast %36 : vector<1x16x16x32xbf16> to vector<256x32xbf16>
    %c224 = arith.constant 224 : index
    %c0_17 = arith.constant 0 : index
    %38 = vector.load %arg2[%c224, %c0_17] : memref<288x32xbf16, #tpu.memory_space<vmem>>, vector<32x32xbf16>
    %cst_18 = arith.constant dense<0.000000e+00> : vector<256x32xf32>
    %39 = tpu.matmul %37, %38, %cst_18 {dimension_numbers = #tpu.dot_dimension_numbers<[1], [0], [0], [1], [0, 0, 1, 1], [], []>} : vector<256x32xbf16>, vector<32x32xbf16>, vector<256x32xf32> -> vector<256x32xf32>
    %40 = arith.addf %35, %39 : vector<256x32xf32>
    %41 = vector.extract_strided_slice %1 {offsets = [0, 2, 2, 0], sizes = [1, 16, 16, 32], strides = [1, 1, 1, 1]} : vector<1x18x18x32xbf16> to vector<1x16x16x32xbf16>
    %42 = vector.shape_cast %41 : vector<1x16x16x32xbf16> to vector<256x32xbf16>
    %c256 = arith.constant 256 : index
    %c0_19 = arith.constant 0 : index
    %43 = vector.load %arg2[%c256, %c0_19] : memref<288x32xbf16, #tpu.memory_space<vmem>>, vector<32x32xbf16>
    %cst_20 = arith.constant dense<0.000000e+00> : vector<256x32xf32>
    %44 = tpu.matmul %42, %43, %cst_20 {dimension_numbers = #tpu.dot_dimension_numbers<[1], [0], [0], [1], [0, 0, 1, 1], [], []>} : vector<256x32xbf16>, vector<32x32xbf16>, vector<256x32xf32> -> vector<256x32xf32>
    %45 = arith.addf %40, %44 : vector<256x32xf32>
    %c0_21 = arith.constant 0 : index
    %c0_22 = arith.constant 0 : index
    %46 = vector.load %arg3[%c0_21, %c0_22] : memref<1x32xf32, #tpu.memory_space<vmem>>, vector<1x32xf32>
    %47 = vector.broadcast %46 : vector<1x32xf32> to vector<256x32xf32>
    %48 = arith.mulf %45, %47 : vector<256x32xf32>
    %c0_23 = arith.constant 0 : index
    %c0_24 = arith.constant 0 : index
    %49 = vector.load %arg4[%c0_23, %c0_24] : memref<1x32xf32, #tpu.memory_space<vmem>>, vector<1x32xf32>
    %50 = vector.broadcast %49 : vector<1x32xf32> to vector<256x32xf32>
    %51 = arith.addf %48, %50 : vector<256x32xf32>
    %cst_25 = arith.constant 0.000000e+00 : f32
    %52 = vector.broadcast %cst_25 : f32 to vector<256x32xf32>
    %53 = arith.cmpf ogt, %51, %52 : vector<256x32xf32>
    %cst_26 = arith.constant 1.000000e-01 : f32
    %54 = vector.broadcast %cst_26 : f32 to vector<256x32xf32>
    %55 = arith.mulf %54, %51 : vector<256x32xf32>
    %56 = arith.select %53, %51, %55 : vector<256x32xi1>, vector<256x32xf32>
    %cst_27 = arith.constant 0.000000e+00 : bf16
    %57 = vector.broadcast %cst_27 : bf16 to vector<1x1x18x32xbf16>
    %cst_28 = arith.constant 0.000000e+00 : bf16
    %58 = vector.broadcast %cst_28 : bf16 to vector<1x16x1x32xbf16>
    %c0_29 = arith.constant 0 : index
    %c0_30 = arith.constant 0 : index
    %c0_31 = arith.constant 0 : index
    %c0_32 = arith.constant 0 : index
    %59 = vector.load %arg9[%c0_29, %c0_30, %c0_31, %c0_32] : memref<1x18x18x32xbf16, #tpu.memory_space<vmem>>, vector<1x1x18x32xbf16>
    tpu.vector_store %arg9[%c0_29, %c0_30, %c0_31, %c0_32], %57 {strides = array<i32>} : memref<1x18x18x32xbf16, #tpu.memory_space<vmem>>, vector<1x1x18x32xbf16>,
    %c0_33 = arith.constant 0 : index
    %c17 = arith.constant 17 : index
    %c0_34 = arith.constant 0 : index
    %c0_35 = arith.constant 0 : index
    %60 = vector.load %arg9[%c0_33, %c17, %c0_34, %c0_35] : memref<1x18x18x32xbf16, #tpu.memory_space<vmem>>, vector<1x1x18x32xbf16>
    tpu.vector_store %arg9[%c0_33, %c17, %c0_34, %c0_35], %57 {strides = array<i32>} : memref<1x18x18x32xbf16, #tpu.memory_space<vmem>>, vector<1x1x18x32xbf16>,
    %c0_36 = arith.constant 0 : index
    %c1 = arith.constant 1 : index
    %c0_37 = arith.constant 0 : index
    %c0_38 = arith.constant 0 : index
    %61 = vector.load %arg9[%c0_36, %c1, %c0_37, %c0_38] : memref<1x18x18x32xbf16, #tpu.memory_space<vmem>>, vector<1x16x1x32xbf16>
    tpu.vector_store %arg9[%c0_36, %c1, %c0_37, %c0_38], %58 {strides = array<i32>} : memref<1x18x18x32xbf16, #tpu.memory_space<vmem>>, vector<1x16x1x32xbf16>,
    %c0_39 = arith.constant 0 : index
    %c1_40 = arith.constant 1 : index
    %c17_41 = arith.constant 17 : index
    %c0_42 = arith.constant 0 : index
    %62 = vector.load %arg9[%c0_39, %c1_40, %c17_41, %c0_42] : memref<1x18x18x32xbf16, #tpu.memory_space<vmem>>, vector<1x16x1x32xbf16>
    tpu.vector_store %arg9[%c0_39, %c1_40, %c17_41, %c0_42], %58 {strides = array<i32>} : memref<1x18x18x32xbf16, #tpu.memory_space<vmem>>, vector<1x16x1x32xbf16>,
    %63 = vector.shape_cast %56 : vector<256x32xf32> to vector<1x16x16x32xf32>
    %64 = arith.truncf %63 : vector<1x16x16x32xf32> to vector<1x16x16x32xbf16>
    %c0_43 = arith.constant 0 : index
    %c1_44 = arith.constant 1 : index
    %c1_45 = arith.constant 1 : index
    %c0_46 = arith.constant 0 : index
    %65 = vector.load %arg9[%c0_43, %c1_44, %c1_45, %c0_46] : memref<1x18x18x32xbf16, #tpu.memory_space<vmem>>, vector<1x16x16x32xbf16>
    tpu.vector_store %arg9[%c0_43, %c1_44, %c1_45, %c0_46], %64 {strides = array<i32>} : memref<1x18x18x32xbf16, #tpu.memory_space<vmem>>, vector<1x16x16x32xbf16>,
    %c0_47 = arith.constant 0 : index
    %c0_48 = arith.constant 0 : index
    %c0_49 = arith.constant 0 : index
    %c0_50 = arith.constant 0 : index
    %66 = vector.load %arg9[%c0_47, %c0_48, %c0_49, %c0_50] : memref<1x18x18x32xbf16, #tpu.memory_space<vmem>>, vector<1x18x18x32xbf16>
    %67 = vector.extract_strided_slice %66 {offsets = [0, 0, 0, 0], sizes = [1, 16, 16, 32], strides = [1, 1, 1, 1]} : vector<1x18x18x32xbf16> to vector<1x16x16x32xbf16>
    %68 = vector.shape_cast %67 : vector<1x16x16x32xbf16> to vector<256x32xbf16>
    %c0_51 = arith.constant 0 : index
    %c0_52 = arith.constant 0 : index
    %69 = vector.load %arg5[%c0_51, %c0_52] : memref<288x32xbf16, #tpu.memory_space<vmem>>, vector<32x32xbf16>
    %cst_53 = arith.constant dense<0.000000e+00> : vector<256x32xf32>
    %70 = tpu.matmul %68, %69, %cst_53 {dimension_numbers = #tpu.dot_dimension_numbers<[1], [0], [0], [1], [0, 0, 1, 1], [], []>} : vector<256x32xbf16>, vector<32x32xbf16>, vector<256x32xf32> -> vector<256x32xf32>
    %71 = vector.extract_strided_slice %66 {offsets = [0, 0, 1, 0], sizes = [1, 16, 16, 32], strides = [1, 1, 1, 1]} : vector<1x18x18x32xbf16> to vector<1x16x16x32xbf16>
    %72 = vector.shape_cast %71 : vector<1x16x16x32xbf16> to vector<256x32xbf16>
    %c32_54 = arith.constant 32 : index
    %c0_55 = arith.constant 0 : index
    %73 = vector.load %arg5[%c32_54, %c0_55] : memref<288x32xbf16, #tpu.memory_space<vmem>>, vector<32x32xbf16>
    %cst_56 = arith.constant dense<0.000000e+00> : vector<256x32xf32>
    %74 = tpu.matmul %72, %73, %cst_56 {dimension_numbers = #tpu.dot_dimension_numbers<[1], [0], [0], [1], [0, 0, 1, 1], [], []>} : vector<256x32xbf16>, vector<32x32xbf16>, vector<256x32xf32> -> vector<256x32xf32>
    %75 = arith.addf %70, %74 : vector<256x32xf32>
    %76 = vector.extract_strided_slice %66 {offsets = [0, 0, 2, 0], sizes = [1, 16, 16, 32], strides = [1, 1, 1, 1]} : vector<1x18x18x32xbf16> to vector<1x16x16x32xbf16>
    %77 = vector.shape_cast %76 : vector<1x16x16x32xbf16> to vector<256x32xbf16>
    %c64_57 = arith.constant 64 : index
    %c0_58 = arith.constant 0 : index
    %78 = vector.load %arg5[%c64_57, %c0_58] : memref<288x32xbf16, #tpu.memory_space<vmem>>, vector<32x32xbf16>
    %cst_59 = arith.constant dense<0.000000e+00> : vector<256x32xf32>
    %79 = tpu.matmul %77, %78, %cst_59 {dimension_numbers = #tpu.dot_dimension_numbers<[1], [0], [0], [1], [0, 0, 1, 1], [], []>} : vector<256x32xbf16>, vector<32x32xbf16>, vector<256x32xf32> -> vector<256x32xf32>
    %80 = arith.addf %75, %79 : vector<256x32xf32>
    %81 = vector.extract_strided_slice %66 {offsets = [0, 1, 0, 0], sizes = [1, 16, 16, 32], strides = [1, 1, 1, 1]} : vector<1x18x18x32xbf16> to vector<1x16x16x32xbf16>
    %82 = vector.shape_cast %81 : vector<1x16x16x32xbf16> to vector<256x32xbf16>
    %c96_60 = arith.constant 96 : index
    %c0_61 = arith.constant 0 : index
    %83 = vector.load %arg5[%c96_60, %c0_61] : memref<288x32xbf16, #tpu.memory_space<vmem>>, vector<32x32xbf16>
    %cst_62 = arith.constant dense<0.000000e+00> : vector<256x32xf32>
    %84 = tpu.matmul %82, %83, %cst_62 {dimension_numbers = #tpu.dot_dimension_numbers<[1], [0], [0], [1], [0, 0, 1, 1], [], []>} : vector<256x32xbf16>, vector<32x32xbf16>, vector<256x32xf32> -> vector<256x32xf32>
    %85 = arith.addf %80, %84 : vector<256x32xf32>
    %86 = vector.extract_strided_slice %66 {offsets = [0, 1, 1, 0], sizes = [1, 16, 16, 32], strides = [1, 1, 1, 1]} : vector<1x18x18x32xbf16> to vector<1x16x16x32xbf16>
    %87 = vector.shape_cast %86 : vector<1x16x16x32xbf16> to vector<256x32xbf16>
    %c128_63 = arith.constant 128 : index
    %c0_64 = arith.constant 0 : index
    %88 = vector.load %arg5[%c128_63, %c0_64] : memref<288x32xbf16, #tpu.memory_space<vmem>>, vector<32x32xbf16>
    %cst_65 = arith.constant dense<0.000000e+00> : vector<256x32xf32>
    %89 = tpu.matmul %87, %88, %cst_65 {dimension_numbers = #tpu.dot_dimension_numbers<[1], [0], [0], [1], [0, 0, 1, 1], [], []>} : vector<256x32xbf16>, vector<32x32xbf16>, vector<256x32xf32> -> vector<256x32xf32>
    %90 = arith.addf %85, %89 : vector<256x32xf32>
    %91 = vector.extract_strided_slice %66 {offsets = [0, 1, 2, 0], sizes = [1, 16, 16, 32], strides = [1, 1, 1, 1]} : vector<1x18x18x32xbf16> to vector<1x16x16x32xbf16>
    %92 = vector.shape_cast %91 : vector<1x16x16x32xbf16> to vector<256x32xbf16>
    %c160_66 = arith.constant 160 : index
    %c0_67 = arith.constant 0 : index
    %93 = vector.load %arg5[%c160_66, %c0_67] : memref<288x32xbf16, #tpu.memory_space<vmem>>, vector<32x32xbf16>
    %cst_68 = arith.constant dense<0.000000e+00> : vector<256x32xf32>
    %94 = tpu.matmul %92, %93, %cst_68 {dimension_numbers = #tpu.dot_dimension_numbers<[1], [0], [0], [1], [0, 0, 1, 1], [], []>} : vector<256x32xbf16>, vector<32x32xbf16>, vector<256x32xf32> -> vector<256x32xf32>
    %95 = arith.addf %90, %94 : vector<256x32xf32>
    %96 = vector.extract_strided_slice %66 {offsets = [0, 2, 0, 0], sizes = [1, 16, 16, 32], strides = [1, 1, 1, 1]} : vector<1x18x18x32xbf16> to vector<1x16x16x32xbf16>
    %97 = vector.shape_cast %96 : vector<1x16x16x32xbf16> to vector<256x32xbf16>
    %c192_69 = arith.constant 192 : index
    %c0_70 = arith.constant 0 : index
    %98 = vector.load %arg5[%c192_69, %c0_70] : memref<288x32xbf16, #tpu.memory_space<vmem>>, vector<32x32xbf16>
    %cst_71 = arith.constant dense<0.000000e+00> : vector<256x32xf32>
    %99 = tpu.matmul %97, %98, %cst_71 {dimension_numbers = #tpu.dot_dimension_numbers<[1], [0], [0], [1], [0, 0, 1, 1], [], []>} : vector<256x32xbf16>, vector<32x32xbf16>, vector<256x32xf32> -> vector<256x32xf32>
    %100 = arith.addf %95, %99 : vector<256x32xf32>
    %101 = vector.extract_strided_slice %66 {offsets = [0, 2, 1, 0], sizes = [1, 16, 16, 32], strides = [1, 1, 1, 1]} : vector<1x18x18x32xbf16> to vector<1x16x16x32xbf16>
    %102 = vector.shape_cast %101 : vector<1x16x16x32xbf16> to vector<256x32xbf16>
    %c224_72 = arith.constant 224 : index
    %c0_73 = arith.constant 0 : index
    %103 = vector.load %arg5[%c224_72, %c0_73] : memref<288x32xbf16, #tpu.memory_space<vmem>>, vector<32x32xbf16>
    %cst_74 = arith.constant dense<0.000000e+00> : vector<256x32xf32>
    %104 = tpu.matmul %102, %103, %cst_74 {dimension_numbers = #tpu.dot_dimension_numbers<[1], [0], [0], [1], [0, 0, 1, 1], [], []>} : vector<256x32xbf16>, vector<32x32xbf16>, vector<256x32xf32> -> vector<256x32xf32>
    %105 = arith.addf %100, %104 : vector<256x32xf32>
    %106 = vector.extract_strided_slice %66 {offsets = [0, 2, 2, 0], sizes = [1, 16, 16, 32], strides = [1, 1, 1, 1]} : vector<1x18x18x32xbf16> to vector<1x16x16x32xbf16>
    %107 = vector.shape_cast %106 : vector<1x16x16x32xbf16> to vector<256x32xbf16>
    %c256_75 = arith.constant 256 : index
    %c0_76 = arith.constant 0 : index
    %108 = vector.load %arg5[%c256_75, %c0_76] : memref<288x32xbf16, #tpu.memory_space<vmem>>, vector<32x32xbf16>
    %cst_77 = arith.constant dense<0.000000e+00> : vector<256x32xf32>
    %109 = tpu.matmul %107, %108, %cst_77 {dimension_numbers = #tpu.dot_dimension_numbers<[1], [0], [0], [1], [0, 0, 1, 1], [], []>} : vector<256x32xbf16>, vector<32x32xbf16>, vector<256x32xf32> -> vector<256x32xf32>
    %110 = arith.addf %105, %109 : vector<256x32xf32>
    %c0_78 = arith.constant 0 : index
    %c0_79 = arith.constant 0 : index
    %111 = vector.load %arg6[%c0_78, %c0_79] : memref<1x32xf32, #tpu.memory_space<vmem>>, vector<1x32xf32>
    %112 = vector.broadcast %111 : vector<1x32xf32> to vector<256x32xf32>
    %113 = arith.mulf %110, %112 : vector<256x32xf32>
    %c0_80 = arith.constant 0 : index
    %c0_81 = arith.constant 0 : index
    %114 = vector.load %arg7[%c0_80, %c0_81] : memref<1x32xf32, #tpu.memory_space<vmem>>, vector<1x32xf32>
    %115 = vector.broadcast %114 : vector<1x32xf32> to vector<256x32xf32>
    %116 = arith.addf %113, %115 : vector<256x32xf32>
    %cst_82 = arith.constant 0.000000e+00 : f32
    %117 = vector.broadcast %cst_82 : f32 to vector<256x32xf32>
    %118 = arith.cmpf ogt, %116, %117 : vector<256x32xf32>
    %cst_83 = arith.constant 1.000000e-01 : f32
    %119 = vector.broadcast %cst_83 : f32 to vector<256x32xf32>
    %120 = arith.mulf %119, %116 : vector<256x32xf32>
    %121 = arith.select %118, %116, %120 : vector<256x32xi1>, vector<256x32xf32>
    %122 = vector.shape_cast %121 : vector<256x32xf32> to vector<1x16x16x32xf32>
    %c0_84 = arith.constant 0 : index
    %c1_85 = arith.constant 1 : index
    %c1_86 = arith.constant 1 : index
    %c0_87 = arith.constant 0 : index
    %123 = vector.load %arg1[%c0_84, %c1_85, %c1_86, %c0_87] : memref<1x18x18x32xf32, #tpu.memory_space<vmem>>, vector<1x16x16x32xf32>
    %124 = arith.addf %122, %123 : vector<1x16x16x32xf32>
    %c0_88 = arith.constant 0 : index
    %c0_89 = arith.constant 0 : index
    %c0_90 = arith.constant 0 : index
    %c0_91 = arith.constant 0 : index
    %125 = vector.load %arg8[%c0_88, %c0_89, %c0_90, %c0_91] : memref<1x16x16x32xf32, #tpu.memory_space<vmem>>, vector<1x16x16x32xf32>
    tpu.vector_store %arg8[%c0_88, %c0_89, %c0_90, %c0_91], %124 {strides = array<i32>} : memref<1x16x16x32xf32, #tpu.memory_space<vmem>>, vector<1x16x16x32xf32>,
    return
  }
  func.func @transform_0(%arg0: i32) -> (i32, i32, i32, i32) {
    %c0_i32 = arith.constant 0 : i32
    %c0_i32_0 = arith.constant 0 : i32
    %c0_i32_1 = arith.constant 0 : i32
    %c0_i32_2 = arith.constant 0 : i32
    return %arg0, %c0_i32, %c0_i32_0, %c0_i32_1 : i32, i32, i32, i32
  }
  func.func @transform_1(%arg0: i32) -> (i32, i32) {
    %c0_i32 = arith.constant 0 : i32
    %c0_i32_0 = arith.constant 0 : i32
    %c0_i32_1 = arith.constant 0 : i32
    return %c0_i32, %c0_i32_0 : i32, i32
  }
  func.func @transform_2(%arg0: i32) -> (i32, i32) {
    %c0_i32 = arith.constant 0 : i32
    %c0_i32_0 = arith.constant 0 : i32
    %c0_i32_1 = arith.constant 0 : i32
    return %c0_i32, %c0_i32_0 : i32, i32
  }
  func.func @transform_3(%arg0: i32) -> (i32, i32) {
    %c0_i32 = arith.constant 0 : i32
    %c0_i32_0 = arith.constant 0 : i32
    %c0_i32_1 = arith.constant 0 : i32
    return %c0_i32, %c0_i32_0 : i32, i32
  }
  func.func @transform_4(%arg0: i32) -> (i32, i32) {
    %c0_i32 = arith.constant 0 : i32
    %c0_i32_0 = arith.constant 0 : i32
    %c0_i32_1 = arith.constant 0 : i32
    return %c0_i32, %c0_i32_0 : i32, i32
  }
  func.func @transform_5(%arg0: i32) -> (i32, i32) {
    %c0_i32 = arith.constant 0 : i32
    %c0_i32_0 = arith.constant 0 : i32
    %c0_i32_1 = arith.constant 0 : i32
    return %c0_i32, %c0_i32_0 : i32, i32
  }
  func.func @transform_6(%arg0: i32) -> (i32, i32) {
    %c0_i32 = arith.constant 0 : i32
    %c0_i32_0 = arith.constant 0 : i32
    %c0_i32_1 = arith.constant 0 : i32
    return %c0_i32, %c0_i32_0 : i32, i32
  }
  func.func @transform_7(%arg0: i32) -> (i32, i32, i32, i32) {
    %c0_i32 = arith.constant 0 : i32
    %c0_i32_0 = arith.constant 0 : i32
    %c0_i32_1 = arith.constant 0 : i32
    %c0_i32_2 = arith.constant 0 : i32
    return %arg0, %c0_i32, %c0_i32_0, %c0_i32_1 : i32, i32, i32, i32
  }
}

</mosaic_0001>

<bundles_post_ra>
// kernel: resblock_forward.1
= control target key start
LH: loop header
LB: loop body
LE: loop exit
PB: predicated region body
PF: predicated region fallthrough
CT: control target
= control target key end

     0   :  { %12 = vsyncpa [#allocation4], 0  ;;  %s10938_s0 = inlined_call_operand.vmem [shape: f32[2,18,18,32], index: 0, kind: input, shape index: {}]   ;;  %s10939_s1 = inlined_call_operand.vmem [shape: bf16[288,32], index: 1, kind: input, shape index: {}]   ;;  %s10940_s2 = inlined_call_operand.vmem [shape: f32[1,32], index: 2, kind: input, shape index: {}]   ;;  %s10941_s3 = inlined_call_operand.vmem [shape: f32[1,32], index: 3, kind: input, shape index: {}]   ;;  %s10942_s4 = inlined_call_operand.vmem [shape: bf16[288,32], index: 4, kind: input, shape index: {}]   ;;  %s10943_s5 = inlined_call_operand.vmem [shape: f32[1,32], index: 5, kind: input, shape index: {}]   ;;  %s10944_s6 = inlined_call_operand.vmem [shape: f32[1,32], index: 6, kind: input, shape index: {}]   ;;  %s10945_s7 = inlined_call_operand.hbm [shape: f32[2,16,16,32], index: 7, kind: output, shape index: {}]  }
   0x1   :  { %14 = vsyncpa [#allocation4 + $0x1], 0  ;;  %s8823_s24 = smov 0   ;;  %s8825_s25 = smov 0  }
   0x2   :  { %s8827_s26 = smov 0   ;;  %s8829_s27 = smov 0  }
   0x3 LB: > { %s8844_s28 = sadd.s32 4294967295, %s8777_s27   ;;  %s6615_s29 = sadd.s32 4294967294, %s8777_s27   ;;  %s8777_s27 = sphi %s8829_s27, %s11026_s27   ;;  %s8773_s26 = sphi %s8827_s26, %s11025_s26   ;;  %s8769_s25 = sphi %s8825_s25, %s11024_s25   ;;  %s8765_s24 = sphi %s8823_s24, %s11023_s24  }
   0x4   : > { %s8848_s30 = sadd.s32 1, %s8777_s27   ;;  %s179_s8 = sadd.s32 1, %s8773_s26 }
   0x5   : > { %s176_s9 = ssub.s32 %s8777_s27, %s8848_s30  ;;  %p189_p0 = scmp.ne.s32.totalorder %s8773_s26, %s8769_s25 }
   0x6   : > { %p177_p1 = scmp.eq.s32.totalorder %s176_s9, 0  ;;  %p190_p2 = scmp.eq.s32.totalorder %s8844_s28, 1 }
   0x7   : > { %p195_p3 = scmp.ne.s32.totalorder %s8769_s25, %s8765_s24  ;;  %p196_p4 = scmp.eq.s32.totalorder %s6615_s29, 1 }
   0x8   : > { %s8859_s10 = scalar_select %p177_p1, %s8773_s26, %s179_s8  }
   0x9   : > { %p8861_p5 = por %p190_p2, %p189_p0  ;;  %p8865_p6 = por %p196_p4, %p195_p3 }
   0xa   : > { %p6618_p7 = scmp.ge.s32.totalorder %s8777_s27, 1  ;;  %p240_p8 = scmp.lt.s32.totalorder %s8777_s27, 3 }
   0xc   : > { %p241_p9 = pnand %p6618_p7, %p240_p8 }
   0xe   : > { %244 = sbr.rel (%p241_p9) target bundleno = 1689 (0x699), region = 48 }
  0x15   : > { %v8650_v0 = vld [vmem:[%s10939_s1 + $0x10] sm:$0xff]   ;;  %p272_p10 = scmp.lt.s32.totalorder %s8844_s28, 1  ;;  %v8651_v1 = vld [vmem:[%s10939_s1 + $0x18] sm:$0xff]   ;;  %v8882_v2 = vld [vmem:[%s10939_s1] sm:$0xff]   ;;  %vm581_vm0 = vcmask 261120   ;;  %vm1028_vm2 = vcmask 1046528  }
  0x16   : > { %7447 = vmatprep.subr.bf16.mxu0 %v8650_v0  ;;  %vm372_vm1 = vsmask.f32 7424  ;;  %v8653_v47 = vld [vmem:[%s10939_s1 + $0x8] sm:$0xff]   ;;  %vm2815_vm3 = vcmask 253952   ;;  %vm2823_vm4 = vsmask.f32 256 }
  0x17   : > { %s273_s17 = scalar_select %p272_p10, %s8844_s28, 1  ;;  %7448 = vmatpush3.bf16.msra.mxu0 %v8650_v0  ;;  %vm9528_vm5 = vmand %vm2815_vm3, %vm2823_vm4  ;;  %vm2873_vm6 = vsmask.f32 7938  ;;  %vm2812_vm8 = vcmask 257024   ;;  %vm3513_vm9 = vsmask.f32 3328 }
  0x18   : > { %7449 = vmatprep.subr.bf16.mxu0 %v8651_v1  ;;  %vm9538_vm7 = vmand %vm2815_vm3, %vm2873_vm6  ;;  %vm3514_vm10 = vsmask.f32 7440  ;;  %s269_s29 = sand.u32 1, %s8769_s25   ;;  %s7122_s13 = sshll.u32 %s8844_s28, 12 }
  0x19   : > { %s8607_s18 = smul.u32 432, %s273_s17  ;;  %vm9584_vm11 = vmor %vm3513_vm9, %vm3514_vm10  ;;  %s6619_s8 = sshll.u32 %s269_s29, 8 }
  0x1a   : > { %s10737_s9 = scalar_lea.vmem [#allocation3], %s6619_s8  ;;  %s10885_s28 = scalar_lea.hbm %s10945_s7, %s7122_s13 }
  0x1b   : > { %s8887_s23 = scalar_lea.vmem %s10938_s0, %s8607_s18  ;;  %7450 = vmatpush3.bf16.msra.mxu0 %v8651_v1  ;;  %s6553_s14 = sshll.u32 %s10737_s9, 4  ;;  %s10887_s14 = int_to_ptr.vmem [resolvable:$true] %s6553_s14 }
  0x1c   : > { %v278_v3 = vld [vmem:[%s8887_s23] sm:$0xff]  ;;  %v279_v4 = vld [vmem:[%s8887_s23 + $0x8] sm:$0xff]  ;;  %v280_v5 = vld [vmem:[%s8887_s23 + $0x10] sm:$0x3]  ;;  %7483 = vmatprep.subr.bf16.mxu0 %v8882_v2  ;;  %s8715_s17 = scalar_lea.vmem %s10887_s14, 4096  ;;  %s8780_s18 = smov [#allocation3]  }
  0x1d   : > { %v8892_v6 = vpack.c.bf16 %v279_v4, %v278_v3  ;;  %v8894_v7 = vpack.c.bf16 %v280_v5, %v280_v5  ;;  %v281_v8 = vld [vmem:[%s8887_s23 + $0x18] sm:$0xff]  ;;  %v282_v9 = vld [vmem:[%s8887_s23 + $0x20] sm:$0xff]  ;;  %v283_v10 = vld [vmem:[%s8887_s23 + $0x28] sm:$0x3]  ;;  %p8716_p11 = scmp.ne.s32.totalorder %s10887_s14, %s8715_s17  ;;  %s8719_s19 = sshll.u32 %s8780_s18, 4  ;;  %s8720_s19 = int_to_ptr.vmem [resolvable:$false] %s8719_s19 }
  0x1e   : > { %v8900_v11 = vpack.c.bf16 %v282_v9, %v281_v8  ;;  %v8902_v12 = vpack.c.bf16 %v283_v10, %v283_v10  ;;  %v284_v13 = vld [vmem:[%s8887_s23 + $0x30] sm:$0xff]  ;;  %v285_v14 = vld [vmem:[%s8887_s23 + $0x38] sm:$0xff]  ;;  %v286_v15 = vld [vmem:[%s8887_s23 + $0x40] sm:$0x3]  ;;  %s8721_s20 = scalar_lea.vmem %s8720_s19, 8192  ;;  %p8722_p0 = scmp.lt.s32.totalorder %s10887_s14, %s8720_s19 }
  0x1f   : > { %v374_v16 = vshrl.u32 %v8892_v6, 16  ;;  %v376_v17 = vshll.u32 %v8892_v6, 16  ;;  %v381_v18 = vshll.u32 %v8894_v7, 16  ;;  %v8910_v19 = vpack.c.bf16 %v285_v14, %v284_v13  ;;  %v287_v20 = vld [vmem:[%s8887_s23 + $0x48] sm:$0xff]  ;;  %v288_v21 = vld [vmem:[%s8887_s23 + $0x50] sm:$0xff]  ;;  %v290_v26 = vld [vmem:[%s8887_s23 + $0x60] sm:$0xff]  ;;  %p8717_p12 = pnand %p8716_p11, %p8861_p5  ;;  %p8723_p1 = scmp.lt.s32.totalorder %s8721_s20, %s8715_s17 }
  0x20   : > { %v386_v22 = vshrl.u32 %v8900_v11, 16  ;;  %v388_v23 = vshll.u32 %v8900_v11, 16  ;;  %v393_v24 = vshll.u32 %v8902_v12, 16  ;;  %v289_v25 = vld [vmem:[%s8887_s23 + $0x58] sm:$0x3]  ;;  %v8919_v29 = vpack.c.bf16 %v286_v15, %v286_v15  ;;  %v291_v31 = vld [vmem:[%s8887_s23 + $0x68] sm:$0xff] }
  0x21   : > { %v378_v27 = vrot.slane %v376_v17, 1  ;;  %v383_v28 = vrot.slane %v381_v18, 1  ;;  %v398_v30 = vshrl.u32 %v8910_v19, 16  ;;  %v400_v34 = vshll.u32 %v8910_v19, 16  ;;  %v292_v36 = vld [vmem:[%s8887_s23 + $0x70] sm:$0x3]  ;;  %p8718_p13 = pneg %p8717_p12  ;;  %p8724_p2 = por %p8723_p1, %p8722_p0 }
  0x22   : > { %v390_v32 = vrot.slane %v388_v23, 1  ;;  %v395_v33 = vrot.slane %v393_v24, 1  ;;  %v8924_v35 = vpack.c.bf16 %v288_v21, %v287_v20  ;;  %v405_v38 = vshll.u32 %v8919_v29, 16  ;;  %v293_v45 = vld [vmem:[%s8887_s23 + $0x78] sm:$0xff]  ;;  %v294_v46 = vld [vmem:[%s8887_s23 + $0x80] sm:$0xff]  ;;  %v296_v53 = vld [vmem:[%s8887_s23 + $0x90] sm:$0xff] }
  0x23   : > { %v379_v37 = vor.u32 %v378_v27, %v374_v16  ;;  %v8928_v39 = vpack.c.bf16 %v289_v25, %v289_v25  ;;  %v8930_v40 = vpack.c.bf16 %v291_v31, %v290_v26  ;;  %v402_v42 = vrot.slane %v400_v34, 1  ;;  %v295_v52 = vld [vmem:[%s8887_s23 + $0x88] sm:$0x3]  ;;  %v297_v54 = vld [vmem:[%s8887_s23 + $0x98] sm:$0xff]  ;;  %v298_v63 = vld [vmem:[%s8887_s23 + $0xa0] sm:$0x3]  ;;  %p8725_p3 = pnand %p8724_p2, %p8718_p13 }
  0x24   : > { %v391_v41 = vor.u32 %v390_v32, %v386_v22  ;;  %v410_v43 = vshrl.u32 %v8924_v35, 16  ;;  %v412_v44 = vshll.u32 %v8924_v35, 16  ;;  %v407_v49 = vrot.slane %v405_v38, 1  ;;  %v299_v10 = vld [vmem:[%s8887_s23 + $0xa8] sm:$0xff]  ;;  %v300_v13 = vld [vmem:[%s8887_s23 + $0xb0] sm:$0xff]  ;;  %v302_v15 = vld [vmem:[%s8887_s23 + $0xc0] sm:$0xff] }
  0x25   : > { %v384_v48 = vsel %vm372_vm1, %v379_v37, %v383_v28  ;;  %v417_v50 = vshll.u32 %v8928_v39, 16  ;;  %v8941_v51 = vpack.c.bf16 %v292_v36, %v292_v36  ;;  %v403_v56 = vor.u32 %v402_v42, %v398_v30  ;;  %v303_v16 = vld [vmem:[%s8887_s23 + $0xc8] sm:$0xff]  ;;  %v301_v25 = vld [vmem:[%s8887_s23 + $0xb8] sm:$0x3]  ;;  %v304_v32 = vld [vmem:[%s8887_s23 + $0xd0] sm:$0x3] }
  0x26   : > { %7451 = vmatprep.mubr.msk.bf16.mxu0 %vm581_vm0, %v384_v48  ;;  %v8948_v55 = vsel %vm372_vm1, %v391_v41, %v395_v33  ;;  %v414_v57 = vrot.slane %v412_v44, 1  ;;  %v422_v58 = vshrl.u32 %v8930_v40, 16  ;;  %v424_v60 = vshll.u32 %v8930_v40, 16  ;;  %v305_v34 = vld [vmem:[%s8887_s23 + $0xd8] sm:$0xff]  ;;  %v306_v41 = vld [vmem:[%s8887_s23 + $0xe0] sm:$0xff]  ;;  %v308_v42 = vld [vmem:[%s8887_s23 + $0xf0] sm:$0xff] }
  0x27   : > { %7452 = vmatmul.mubr.msk.bf16.vlgmr.msra.gmra.mrb[0].mxu0 %vm581_vm0, %v8948_v55  ;;  %v419_v59 = vrot.slane %v417_v50, 1  ;;  %v429_v61 = vshll.u32 %v8941_v51, 16  ;;  %v8955_v62 = vpack.c.bf16 %v294_v46, %v293_v45  ;;  %v8960_v0 = vsel %vm372_vm1, %v403_v56, %v407_v49  ;;  %v309_v48 = vld [vmem:[%s8887_s23 + $0xf8] sm:$0xff] }
  0x28   : > { %7484 = vmatpush3.bf16.msra.mxu0 %v8882_v2  ;;  %v415_v1 = vor.u32 %v414_v57, %v410_v43  ;;  %v8962_v3 = vpack.c.bf16 %v295_v52, %v295_v52  ;;  %v8964_v4 = vpack.c.bf16 %v297_v54, %v296_v53  ;;  %7455 = vmatprep.mubr.msk.bf16.mxu0 %vm581_vm0, %v8960_v0  ;;  %v426_v5 = vrot.slane %v424_v60, 1  ;;  %v8974_v2 = vld [vmem:[%s10939_s1 + $0x20] sm:$0xff]  }
  0x29   : > { %v431_v8 = vrot.slane %v429_v61, 1  ;;  %v436_v9 = vshll.u32 %v8955_v62, 16  ;;  %7485 = vmatprep.subr.bf16.mxu0 %v8653_v47  ;;  %v8976_v14 = vpack.c.bf16 %v298_v63, %v298_v63  ;;  %v434_v20 = vshrl.u32 %v8955_v62, 16  ;;  %v310_v61 = vld [vmem:[%s8887_s23 + $0x100] sm:$0x3]  ;;  %v311_v63 = vld [vmem:[%s8887_s23 + $0x108] sm:$0xff] }
  0x2a   : > { %v8981_v17 = vsel %vm372_vm1, %v415_v1, %v419_v59  ;;  %v427_v18 = vor.u32 %v426_v5, %v422_v58  ;;  %v448_v21 = vshll.u32 %v8964_v4, 16  ;;  %v441_v23 = vshll.u32 %v8962_v3, 16  ;;  %v312_v5 = vld [vmem:[%s8887_s23 + $0x110] sm:$0xff] }
  0x2b   : > { %v438_v22 = vrot.slane %v436_v9, 1  ;;  %v446_v24 = vshrl.u32 %v8964_v4, 16  ;;  %v8988_v26 = vpack.c.bf16 %v300_v13, %v299_v10  ;;  %v453_v30 = vshll.u32 %v8976_v14, 16 }
  0x2c   : > { %7486 = vmatpush3.bf16.msra.mxu0 %v8653_v47  ;;  %v8991_v27 = vsel %vm372_vm1, %v427_v18, %v431_v8  ;;  %v450_v28 = vrot.slane %v448_v21, 1  ;;  %v8994_v31 = vpack.c.bf16 %v303_v16, %v302_v15  ;;  %v9000_v33 = vpack.c.bf16 %v301_v25, %v301_v25  ;;  %v307_v47 = vld [vmem:[%s8887_s23 + $0xe8] sm:$0x3]  ;;  %v313_v21 = vld [vmem:[%s8887_s23 + $0x118] sm:$0x3] }
  0x2d   : > { %7519 = vmatprep.subr.bf16.mxu0 %v8974_v2  ;;  %v439_v36 = vor.u32 %v438_v22, %v434_v20  ;;  %v443_v37 = vrot.slane %v441_v23, 1  ;;  %v460_v38 = vshll.u32 %v8988_v26, 16  ;;  %v455_v44 = vrot.slane %v453_v30, 1  ;;  %v314_v20 = vld [vmem:[%s8887_s23 + $0x120] sm:$0xff]  ;;  %v315_v22 = vld [vmem:[%s8887_s23 + $0x128] sm:$0xff] }
  0x2e   : > { %v451_v43 = vor.u32 %v450_v28, %v446_v24  ;;  %v9008_v45 = vpack.c.bf16 %v304_v32, %v304_v32  ;;  %v472_v46 = vshll.u32 %v8994_v31, 16  ;;  %v458_v49 = vshrl.u32 %v8988_v26, 16  ;;  %v316_v28 = vld [vmem:[%s8887_s23 + $0x130] sm:$0x3] }
  0x2f   : > { %7456 = vmatmul.mubr.msk.bf16.gmra.mrb[4].mxu0 %vm581_vm0, %v8981_v17  ;;  %v465_v50 = vshll.u32 %v9000_v33, 16  ;;  %v9016_v52 = vsel %vm372_vm1, %v439_v36, %v443_v37  ;;  %v462_v53 = vrot.slane %v460_v38, 1  ;;  %v470_v54 = vshrl.u32 %v8994_v31, 16 }
  0x30   : > { %7459 = vmatprep.mubr.msk.bf16.mxu0 %vm581_vm0, %v8991_v27  ;;  %v9019_v56 = vpack.c.bf16 %v306_v41, %v305_v34  ;;  %v9022_v57 = vsel %vm372_vm1, %v451_v43, %v455_v44  ;;  %v474_v58 = vrot.slane %v472_v46, 1  ;;  %v477_v59 = vshll.u32 %v9008_v45, 16  ;;  %v318_v43 = vld [vmem:[%s8887_s23 + $0x140] sm:$0xff]  ;;  %v320_v44 = vld [vmem:[%s8887_s23 + $0x150] sm:$0xff] }
  0x31   : > { %v9025_v60 = vpack.c.bf16 %v309_v48, %v308_v42  ;;  %v9031_v1 = vpack.c.bf16 %v307_v47, %v307_v47  ;;  %v463_v8 = vor.u32 %v462_v53, %v458_v49  ;;  %v467_v9 = vrot.slane %v465_v50, 1  ;;  %v317_v42 = vld [vmem:[%s8887_s23 + $0x138] sm:$0xff] }
  0x32   : > { %v484_v10 = vshll.u32 %v9019_v56, 16  ;;  %v475_v13 = vor.u32 %v474_v58, %v470_v54  ;;  %v479_v15 = vrot.slane %v477_v59, 1  ;;  %v9037_v16 = vpack.c.bf16 %v310_v61, %v310_v61  ;;  %v321_v48 = vld [vmem:[%s8887_s23 + $0x158] sm:$0xff]  ;;  %v319_v54 = vld [vmem:[%s8887_s23 + $0x148] sm:$0x3] }
  0x33   : > { %v496_v18 = vshll.u32 %v9025_v60, 16  ;;  %v482_v23 = vshrl.u32 %v9019_v56, 16  ;;  %v489_v24 = vshll.u32 %v9031_v1, 16  ;;  %v9045_v25 = vpack.c.bf16 %v312_v5, %v311_v63 }
  0x34   : > { %v9049_v30 = vsel %vm372_vm1, %v463_v8, %v467_v9  ;;  %v486_v32 = vrot.slane %v484_v10, 1  ;;  %v494_v34 = vshrl.u32 %v9025_v60, 16  ;;  %v9053_v36 = vsel %vm372_vm1, %v475_v13, %v479_v15  ;;  %v322_v8 = vld [vmem:[%s8887_s23 + $0x160] sm:$0x3] }
  0x35   : > { %v498_v37 = vrot.slane %v496_v18, 1  ;;  %v501_v38 = vshll.u32 %v9037_v16, 16  ;;  %v9056_v41 = vpack.c.bf16 %v315_v22, %v314_v20  ;;  %v9063_v46 = vpack.c.bf16 %v313_v21, %v313_v21 }
  0x36   : > { %v508_v47 = vshll.u32 %v9045_v25, 16  ;;  %v487_v49 = vor.u32 %v486_v32, %v482_v23  ;;  %v491_v50 = vrot.slane %v489_v24, 1  ;;  %v9069_v53 = vpack.c.bf16 %v316_v28, %v316_v28 }
  0x37   : > { %7460 = vmatmul.mubr.msk.bf16.gmra.mrb[8].mxu0 %vm581_vm0, %v9016_v52  ;;  %v499_v58 = vor.u32 %v498_v37, %v494_v34  ;;  %v503_v59 = vrot.slane %v501_v38, 1  ;;  %v520_v61 = vshll.u32 %v9056_v41, 16  ;;  %v9073_v63 = vpack.c.bf16 %v318_v43, %v317_v42  ;;  %v323_v43 = vld [vmem:[%s8887_s23 + $0x168] sm:$0xff] }
  0x38   : > { %7463 = vmatprep.mubr.msk.bf16.mxu0 %vm581_vm0, %v9022_v57  ;;  %v506_v5 = vshrl.u32 %v9045_v25, 16  ;;  %v9077_v9 = vpack.c.bf16 %v321_v48, %v320_v44  ;;  %v510_v10 = vrot.slane %v508_v47, 1  ;;  %v513_v13 = vshll.u32 %v9063_v46, 16 }
  0x39   : > { %v9081_v15 = vsel %vm372_vm1, %v487_v49, %v491_v50  ;;  %v518_v18 = vshrl.u32 %v9056_v41, 16  ;;  %v525_v20 = vshll.u32 %v9069_v53, 16  ;;  %v9086_v21 = vsel %vm372_vm1, %v499_v58, %v503_v59  ;;  %v324_v50 = vld [vmem:[%s8887_s23 + $0x170] sm:$0xff]  ;;  %v325_v59 = vld [vmem:[%s8887_s23 + $0x178] sm:$0x3] }
  0x3a   : > { %v522_v22 = vrot.slane %v520_v61, 1  ;;  %v9088_v23 = vpack.c.bf16 %v319_v54, %v319_v54  ;;  %v532_v24 = vshll.u32 %v9073_v63, 16  ;;  %v9091_v28 = vpack.c.bf16 %v322_v8, %v322_v8 }
  0x3b   : > { %v544_v32 = vshll.u32 %v9077_v9, 16  ;;  %v511_v34 = vor.u32 %v510_v10, %v506_v5  ;;  %v515_v37 = vrot.slane %v513_v13, 1  ;;  %v527_v38 = vrot.slane %v525_v20, 1 }
  0x3c   : > { %v530_v42 = vshrl.u32 %v9073_v63, 16  ;;  %v523_v44 = vor.u32 %v522_v22, %v518_v18  ;;  %v534_v47 = vrot.slane %v532_v24, 1  ;;  %v537_v48 = vshll.u32 %v9088_v23, 16 }
  0x3d   : > { %v542_v49 = vshrl.u32 %v9077_v9, 16  ;;  %v546_v54 = vrot.slane %v544_v32, 1  ;;  %v549_v58 = vshll.u32 %v9091_v28, 16  ;;  %v9106_v61 = vsel %vm372_vm1, %v511_v34, %v515_v37 }
  0x3e   : > { %v9108_v5 = vpack.c.bf16 %v324_v50, %v323_v43  ;;  %v9111_v8 = vsel %vm372_vm1, %v523_v44, %v527_v38  ;;  %v535_v10 = vor.u32 %v534_v47, %v530_v42  ;;  %v539_v13 = vrot.slane %v537_v48, 1  ;;  %v8655_v48 = vld [vmem:[%s10939_s1 + $0x28] sm:$0xff]  }
  0x3f   : > { %7464 = vmatmul.mubr.msk.bf16.gmra.mrb[12].mxu0 %vm581_vm0, %v9049_v30  ;;  %v9117_v18 = vpack.c.bf16 %v325_v59, %v325_v59  ;;  %v547_v22 = vor.u32 %v546_v54, %v542_v49  ;;  %v551_v24 = vrot.slane %v549_v58, 1  ;;  %v8656_v49 = vld [vmem:[%s10939_s1 + $0x30] sm:$0xff]   ;;  %v1030_v50 = vrot.slane %v8894_v7, 1 }
  0x40   : > { %7467 = vmatprep.mubr.msk.bf16.mxu0 %vm581_vm0, %v9053_v36  ;;  %v556_v20 = vshll.u32 %v9108_v5, 16  ;;  %v9121_v32 = vsel %vm372_vm1, %v535_v10, %v539_v13  ;;  %v554_v34 = vshrl.u32 %v9108_v5, 16  ;;  %v1033_v58 = vrot.slane %v8902_v12, 1 }
  0x41   : > { %v561_v38 = vshll.u32 %v9117_v18, 16  ;;  %v9126_v43 = vsel %vm372_vm1, %v547_v22, %v551_v24  ;;  %v1032_v59 = vrot.slane %v8900_v11, 1  ;;  %v1035_v10 = vrot.slane %v8910_v19, 1 }
  0x42   : > { %v558_v37 = vrot.slane %v556_v20, 1  ;;  %v1036_v13 = vrot.slane %v8919_v29, 1  ;;  %v8657_v20 = vld [vmem:[%s10939_s1 + $0x38] sm:$0xff]   ;;  %v1038_v12 = vrot.slane %v8924_v35, 1  ;;  %v1039_v29 = vrot.slane %v8928_v39, 1 }
  0x43   : > { %v563_v44 = vrot.slane %v561_v38, 1  ;;  %v1041_v22 = vrot.slane %v8930_v40, 1  ;;  %v1042_v24 = vrot.slane %v8941_v51, 1  ;;  %v1044_v39 = vrot.slane %v8955_v62, 1 }
  0x44   : > { %v559_v42 = vor.u32 %v558_v37, %v554_v34  ;;  %v9188_v7 = vsel %vm1028_vm2, %v1035_v10, %v1036_v13  ;;  %v8658_v34 = vld [vmem:[%s10939_s1 + $0x40] sm:$0xff]   ;;  %v9205_v37 = vsel %vm1028_vm2, %v1038_v12, %v1039_v29  ;;  %v1045_v51 = vrot.slane %v8962_v3, 1 }
  0x45   : > { %v9208_v38 = vsel %vm1028_vm2, %v1041_v22, %v1042_v24  ;;  %v1051_v3 = vrot.slane %v9000_v33, 1  ;;  %v1057_v33 = vrot.slane %v9031_v1, 1  ;;  %v1059_v10 = vrot.slane %v9025_v60, 1 }
  0x46   : > { %v9133_v47 = vsel %vm372_vm1, %v559_v42, %v563_v44  ;;  %v1047_v42 = vrot.slane %v8964_v4, 1  ;;  %v1048_v44 = vrot.slane %v8976_v14, 1  ;;  %v1054_v14 = vrot.slane %v9008_v45, 1 }
  0x47   : > { %7468 = vmatmul.mubr.msk.bf16.gmra.mrb[16].mxu0 %vm581_vm0, %v9081_v15  ;;  %v1060_v45 = vrot.slane %v9037_v16, 1  ;;  %v1062_v12 = vrot.slane %v9045_v25, 1  ;;  %v1063_v1 = vrot.slane %v9063_v46, 1  ;;  %v1065_v29 = vrot.slane %v9056_v41, 1 }
  0x48   : > { %7471 = vmatprep.mubr.msk.bf16.mxu0 %vm581_vm0, %v9086_v21  ;;  %v1066_v16 = vrot.slane %v9069_v53, 1  ;;  %v1069_v46 = vrot.slane %v9088_v23, 1  ;;  %v1072_v53 = vrot.slane %v9091_v28, 1  ;;  %v1075_v23 = vrot.slane %v9117_v18, 1  ;;  %v8659_v28 = vld [vmem:[%s10939_s1 + $0x48] sm:$0xff]   ;;  %v8660_v18 = vld [vmem:[%s10939_s1 + $0x50] sm:$0xff]  }
  0x49   : > { %v9261_v22 = vsel %vm1028_vm2, %v1062_v12, %v1063_v1 }
  0x4a   : > { %v9264_v24 = vsel %vm1028_vm2, %v1065_v29, %v1066_v16 }
  0x4f   : > { %7472 = vmatmul.mubr.msk.bf16.gmra.mrb[20].mxu0 %vm581_vm0, %v9106_v61 }
  0x50   : > { %7475 = vmatprep.mubr.msk.bf16.mxu0 %vm581_vm0, %v9111_v8 }
  0x57   : > { %7476 = vmatmul.mubr.msk.bf16.gmra.mrb[24].mxu0 %vm581_vm0, %v9121_v32 }
  0x58   : > { %7479 = vmatprep.mubr.msk.bf16.mxu0 %vm581_vm0, %v9126_v43 }
  0x5f   : > { %7480 = vmatmul.mubr.msk.bf16.gmra.mrb[28].mxu0 %vm581_vm0, %v9133_v47 }
  0x60   : > { %7487 = vmatprep.mubr.msk.bf16.mxu0 %vm581_vm0, %v8892_v6 }
  0x67   : > { %7488 = vmatmul.mubr.msk.bf16.vlgmr.msra.gmra.mrb[0].mxu0 %vm581_vm0, %v8900_v11 }
  0x68   : > { %7520 = vmatpush3.bf16.msra.mxu0 %v8974_v2  ;;  %7491 = vmatprep.mubr.msk.bf16.mxu0 %vm581_vm0, %v8910_v19  ;;  %v1029_v2 = vrot.slane %v8892_v6, 1  ;;  %v9185_v6 = vsel %vm1028_vm2, %v1032_v59, %v1033_v58  ;;  %v1056_v59 = vrot.slane %v9019_v56, 1 }
  0x69   : > { %7521 = vmatprep.subr.bf16.mxu0 %v8655_v48 }
  0x6a   : > { %v1031_v54 = vsel %vm1028_vm2, %v1029_v2, %v1030_v50  ;;  %v1050_v2 = vrot.slane %v8988_v26, 1  ;;  %v1053_v50 = vrot.slane %v8994_v31, 1  ;;  %v9247_v13 = vsel %vm1028_vm2, %v1056_v59, %v1057_v33  ;;  %v8662_v59 = vld [vmem:[%s10939_s1 + $0x60] sm:$0xff]  }
  0x6c   : > { %7522 = vmatpush3.bf16.msra.mxu0 %v8655_v48  ;;  %v9219_v48 = vsel %vm1028_vm2, %v1044_v39, %v1045_v51  ;;  %v9236_v58 = vsel %vm1028_vm2, %v1053_v50, %v1054_v14  ;;  %v1068_v39 = vrot.slane %v9073_v63, 1  ;;  %v1071_v51 = vrot.slane %v9077_v9, 1  ;;  %v8661_v14 = vld [vmem:[%s10939_s1 + $0x58] sm:$0xff]  }
  0x6d   : > { %7555 = vmatprep.subr.bf16.mxu0 %v8656_v49 }
  0x6f   : > { %7492 = vmatmul.mubr.msk.bf16.gmra.mrb[4].mxu0 %vm581_vm0, %v8924_v35 }
  0x70   : > { %7495 = vmatprep.mubr.msk.bf16.mxu0 %vm581_vm0, %v8930_v40 }
  0x77   : > { %7496 = vmatmul.mubr.msk.bf16.gmra.mrb[8].mxu0 %vm581_vm0, %v8955_v62 }
  0x78   : > { %7499 = vmatprep.mubr.msk.bf16.mxu0 %vm581_vm0, %v8964_v4 }
  0x7f   : > { %7500 = vmatmul.mubr.msk.bf16.gmra.mrb[12].mxu0 %vm581_vm0, %v8988_v26 }
  0x80   : > { %7503 = vmatprep.mubr.msk.bf16.mxu0 %vm581_vm0, %v8994_v31 }
  0x87   : > { %7504 = vmatmul.mubr.msk.bf16.gmra.mrb[16].mxu0 %vm581_vm0, %v9019_v56 }
  0x88   : > { %7507 = vmatprep.mubr.msk.bf16.mxu0 %vm581_vm0, %v9025_v60 }
  0x8f   : > { %7508 = vmatmul.mubr.msk.bf16.gmra.mrb[20].mxu0 %vm581_vm0, %v9045_v25 }
  0x90   : > { %7511 = vmatprep.mubr.msk.bf16.mxu0 %vm581_vm0, %v9056_v41 }
  0x97   : > { %7512 = vmatmul.mubr.msk.bf16.gmra.mrb[24].mxu0 %vm581_vm0, %v9073_v63 }
  0x98   : > { %7515 = vmatprep.mubr.msk.bf16.mxu0 %vm581_vm0, %v9077_v9 }
  0x9f   : > { %7516 = vmatmul.mubr.msk.bf16.gmra.mrb[28].mxu0 %vm581_vm0, %v9108_v5 }
  0xa0   : > { %7523 = vmatprep.mubr.msk.bf16.mxu0 %vm581_vm0, %v1031_v54  ;;  %v9233_v54 = vsel %vm1028_vm2, %v1050_v2, %v1051_v3  ;;  %v1074_v2 = vrot.slane %v9108_v5, 1 }
  0xa2   : > { %v9287_v3 = vsel %vm1028_vm2, %v1074_v2, %v1075_v23  ;;  %v8665_v23 = vld [vmem:[%s10939_s1 + $0x78] sm:$0xff]  }
  0xa7   : > { %7524 = vmatmul.mubr.msk.bf16.vlgmr.msra.gmra.mrb[0].mxu0 %vm581_vm0, %v9185_v6 }
  0xa8   : > { %7556 = vmatpush3.bf16.msra.mxu0 %v8656_v49  ;;  %7527 = vmatprep.mubr.msk.bf16.mxu0 %vm581_vm0, %v9188_v7  ;;  %v9222_v49 = vsel %vm1028_vm2, %v1047_v42, %v1048_v44  ;;  %v9275_v42 = vsel %vm1028_vm2, %v1068_v39, %v1069_v46  ;;  %v9278_v44 = vsel %vm1028_vm2, %v1071_v51, %v1072_v53  ;;  %v8663_v46 = vld [vmem:[%s10939_s1 + $0x68] sm:$0xff]   ;;  %v8664_v51 = vld [vmem:[%s10939_s1 + $0x70] sm:$0xff]  }
  0xa9   : > { %7557 = vmatprep.subr.bf16.mxu0 %v8657_v20 }
  0xac   : > { %7558 = vmatpush3.bf16.msra.mxu0 %v8657_v20  ;;  %v9250_v20 = vsel %vm1028_vm2, %v1059_v10, %v1060_v45 }
  0xad   : > { %7591 = vmatprep.subr.bf16.mxu0 %v8658_v34 }
  0xaf   : > { %7528 = vmatmul.mubr.msk.bf16.gmra.mrb[4].mxu0 %vm581_vm0, %v9205_v37 }
  0xb0   : > { %7531 = vmatprep.mubr.msk.bf16.mxu0 %vm581_vm0, %v9208_v38 }
  0xb7   : > { %7532 = vmatmul.mubr.msk.bf16.gmra.mrb[8].mxu0 %vm581_vm0, %v9219_v48 }
  0xb8   : > { %7535 = vmatprep.mubr.msk.bf16.mxu0 %vm581_vm0, %v9222_v49 }
  0xbf   : > { %7536 = vmatmul.mubr.msk.bf16.gmra.mrb[12].mxu0 %vm581_vm0, %v9233_v54 }
  0xc0   : > { %7539 = vmatprep.mubr.msk.bf16.mxu0 %vm581_vm0, %v9236_v58 }
  0xc7   : > { %7540 = vmatmul.mubr.msk.bf16.gmra.mrb[16].mxu0 %vm581_vm0, %v9247_v13 }
  0xc8   : > { %7543 = vmatprep.mubr.msk.bf16.mxu0 %vm581_vm0, %v9250_v20 }
  0xcf   : > { %7544 = vmatmul.mubr.msk.bf16.gmra.mrb[20].mxu0 %vm581_vm0, %v9261_v22 }
  0xd0   : > { %7547 = vmatprep.mubr.msk.bf16.mxu0 %vm581_vm0, %v9264_v24 }
  0xd7   : > { %7548 = vmatmul.mubr.msk.bf16.gmra.mrb[24].mxu0 %vm581_vm0, %v9275_v42 }
  0xd8   : > { %7551 = vmatprep.mubr.msk.bf16.mxu0 %vm581_vm0, %v9278_v44 }
  0xdf   : > { %7552 = vmatmul.mubr.msk.bf16.gmra.mrb[28].mxu0 %vm581_vm0, %v9287_v3 }
  0xe0   : > { %7559 = vmatprep.mubr.msk.bf16.mxu0 %vm581_vm0, %v8900_v11  ;;  %v326_v11 = vld [vmem:[%s8887_s23 + $0x180] sm:$0xff] }
  0xe7   : > { %7560 = vmatmul.mubr.msk.bf16.vlgmr.msra.gmra.mrb[0].mxu0 %vm581_vm0, %v8910_v19 }
  0xe8   : > { %7592 = vmatpush3.bf16.msra.mxu0 %v8658_v34  ;;  %7563 = vmatprep.mubr.msk.bf16.mxu0 %vm581_vm0, %v8924_v35  ;;  %v327_v34 = vld [vmem:[%s8887_s23 + $0x188] sm:$0xff] }
  0xe9   : > { %7593 = vmatprep.subr.bf16.mxu0 %v8659_v28  ;;  %v9329_v50 = vpack.c.bf16 %v327_v34, %v326_v11  ;;  %v2846_v11 = vld [vmem:[#allocation2 + $0x60] sm:$0x1] }
  0xea   : > { %v2847_v34 = vsel %vm9528_vm5, 0, %v2846_v11 }
  0xeb   : > { %v1548_v10 = vshll.u32 %v9329_v50, 16  ;;  %v1546_v45 = vshrl.u32 %v9329_v50, 16  ;;  %2848 = vst [vmem:[#allocation2 + $0x60] sm:$0x1] %v2847_v34 }
  0xec   : > { %7594 = vmatpush3.bf16.msra.mxu0 %v8659_v28  ;;  %v8666_v28 = vld [vmem:[%s10939_s1 + $0x80] sm:$0xff]  }
  0xed   : > { %7627 = vmatprep.subr.bf16.mxu0 %v8660_v18  ;;  %v1550_v12 = vrot.slane %v1548_v10, 1 }
  0xef   : > { %7564 = vmatmul.mubr.msk.bf16.gmra.mrb[4].mxu0 %vm581_vm0, %v8930_v40  ;;  %v1551_v29 = vor.u32 %v1550_v12, %v1546_v45  ;;  %v2893_v12 = vld [vmem:[#allocation2 + $0x5c] sm:$0x1] }
  0xf0   : > { %7567 = vmatprep.mubr.msk.bf16.mxu0 %vm581_vm0, %v8955_v62 }
  0xf7   : > { %7568 = vmatmul.mubr.msk.bf16.gmra.mrb[8].mxu0 %vm581_vm0, %v8964_v4 }
  0xf8   : > { %7571 = vmatprep.mubr.msk.bf16.mxu0 %vm581_vm0, %v8988_v26 }
  0xff   : > { %7572 = vmatmul.mubr.msk.bf16.gmra.mrb[12].mxu0 %vm581_vm0, %v8994_v31 }
 0x100   : > { %7575 = vmatprep.mubr.msk.bf16.mxu0 %vm581_vm0, %v9019_v56 }
 0x107   : > { %7576 = vmatmul.mubr.msk.bf16.gmra.mrb[16].mxu0 %vm581_vm0, %v9025_v60 }
 0x108   : > { %7579 = vmatprep.mubr.msk.bf16.mxu0 %vm581_vm0, %v9045_v25 }
 0x10f   : > { %7580 = vmatmul.mubr.msk.bf16.gmra.mrb[20].mxu0 %vm581_vm0, %v9056_v41 }
 0x110   : > { %7583 = vmatprep.mubr.msk.bf16.mxu0 %vm581_vm0, %v9073_v63 }
 0x117   : > { %7584 = vmatmul.mubr.msk.bf16.gmra.mrb[24].mxu0 %vm581_vm0, %v9077_v9 }
 0x118   : > { %7587 = vmatprep.mubr.msk.bf16.mxu0 %vm581_vm0, %v9108_v5 }
 0x11f   : > { %7588 = vmatmul.mubr.msk.bf16.gmra.mrb[28].mxu0 %vm581_vm0, %v9329_v50 }
 0x120   : > { %7595 = vmatprep.mubr.msk.bf16.mxu0 %vm581_vm0, %v8948_v55  ;;  %v328_v55 = vld [vmem:[%s8887_s23 + $0x190] sm:$0x3] }
 0x121   : > { %v365_v33 = vpack.c.bf16 %v328_v55, %v328_v55  ;;  %v2896_v55 = vld [vmem:[#allocation2 + $0x68] sm:$0x1] }
 0x122   : > { %v2897_v45 = vsel %vm9538_vm7, 0, %v2896_v55 }
 0x123   : > { %v1553_v1 = vshll.u32 %v365_v33, 16  ;;  %v1772_v53 = vrot.slane %v365_v33, 1  ;;  %2898 = vst [vmem:[#allocation2 + $0x68] sm:$0x1] %v2897_v45 }
 0x125   : > { %v1555_v16 = vrot.slane %v1553_v1, 1 }
 0x127   : > { %7596 = vmatmul.mubr.msk.bf16.vlgmr.msra.gmra.mrb[0].mxu0 %vm581_vm0, %v8960_v0  ;;  %v9373_v39 = vsel %vm372_vm1, %v1551_v29, %v1555_v16 }
 0x128   : > { %7628 = vmatpush3.bf16.msra.mxu0 %v8660_v18  ;;  %7599 = vmatprep.mubr.msk.bf16.mxu0 %vm581_vm0, %v8981_v17  ;;  %v8779_v18 = vmov 0  }
 0x129   : > { %7629 = vmatprep.subr.bf16.mxu0 %v8661_v14  ;;  %2813 = vst.msk [vmem:[#allocation2] sm:$0xf] %vm2812_vm8, %v8779_v18  ;;  %2814 = vst.msk [vmem:[#allocation2 + $0x4] sm:$0xf] %vm2812_vm8, %v8779_v18 }
 0x12a   : > { %2816 = vst.msk [vmem:[#allocation2 + $0x8] sm:$0x1] %vm2815_vm3, %v8779_v18  ;;  %2820 = vst.msk [vmem:[#allocation2 + $0xd4] sm:$0x1] %vm2815_vm3, %v8779_v18 }
 0x12b   : > { %2818 = vst.msk [vmem:[#allocation2 + $0xcc] sm:$0xf] %vm2812_vm8, %v8779_v18  ;;  %2819 = vst.msk [vmem:[#allocation2 + $0xd0] sm:$0xf] %vm2812_vm8, %v8779_v18  ;;  %v9631_v18 = vld [vmem:[%s10941_s3] ss:$0 sm:$0xff] }
 0x12c   : > { %7630 = vmatpush3.bf16.msra.mxu0 %v8661_v14 }
 0x12d   : > { %7663 = vmatprep.subr.bf16.mxu0 %v8662_v59 }
 0x12f   : > { %7600 = vmatmul.mubr.msk.bf16.gmra.mrb[4].mxu0 %vm581_vm0, %v8991_v27 }
 0x130   : > { %7603 = vmatprep.mubr.msk.bf16.mxu0 %vm581_vm0, %v9016_v52  ;;  %v3455_v33 = vld [vmem:[#allocation2] sm:$0xf]  ;;  %v3456_v10 = vld [vmem:[#allocation2 + $0x4] sm:$0xf] }
 0x131   : > { %v3517_v1 = vshrl.u32 %v3455_v33, 16  ;;  %v3520_v29 = vshll.u32 %v3455_v33, 16  ;;  %v3526_v16 = vshll.u32 %v3456_v10, 16 }
 0x137   : > { %7604 = vmatmul.mubr.msk.bf16.gmra.mrb[8].mxu0 %vm581_vm0, %v9022_v57 }
 0x138   : > { %7607 = vmatprep.mubr.msk.bf16.mxu0 %vm581_vm0, %v9049_v30 }
 0x13f   : > { %7608 = vmatmul.mubr.msk.bf16.gmra.mrb[12].mxu0 %vm581_vm0, %v9053_v36 }
 0x140   : > { %7611 = vmatprep.mubr.msk.bf16.mxu0 %vm581_vm0, %v9081_v15 }
 0x147   : > { %7612 = vmatmul.mubr.msk.bf16.gmra.mrb[16].mxu0 %vm581_vm0, %v9086_v21 }
 0x148   : > { %7615 = vmatprep.mubr.msk.bf16.mxu0 %vm581_vm0, %v9106_v61 }
 0x14f   : > { %7616 = vmatmul.mubr.msk.bf16.gmra.mrb[20].mxu0 %vm581_vm0, %v9111_v8 }
 0x150   : > { %7619 = vmatprep.mubr.msk.bf16.mxu0 %vm581_vm0, %v9121_v32 }
 0x157   : > { %7620 = vmatmul.mubr.msk.bf16.gmra.mrb[24].mxu0 %vm581_vm0, %v9126_v43 }
 0x158   : > { %7623 = vmatprep.mubr.msk.bf16.mxu0 %vm581_vm0, %v9133_v47 }
 0x15f   : > { %7624 = vmatmul.mubr.msk.bf16.gmra.mrb[28].mxu0 %vm581_vm0, %v9373_v39 }
 0x160   : > { %7631 = vmatprep.mubr.msk.bf16.mxu0 %vm581_vm0, %v9185_v6  ;;  %v1771_v6 = vrot.slane %v9329_v50, 1 }
 0x162   : > { %v9415_v2 = vsel %vm1028_vm2, %v1771_v6, %v1772_v53  ;;  %v3522_v6 = vrot.slane %v3520_v29, 5  ;;  %v3528_v53 = vrot.slane %v3526_v16, 5  ;;  %v2920_v16 = vld [vmem:[#allocation2 + $0xc8] sm:$0x1] }
 0x167   : > { %7632 = vmatmul.mubr.msk.bf16.vlgmr.msra.gmra.mrb[0].mxu0 %vm581_vm0, %v9188_v7 }
 0x168   : > { %7664 = vmatpush3.bf16.msra.mxu0 %v8662_v59  ;;  %7635 = vmatprep.mubr.msk.bf16.mxu0 %vm581_vm0, %v9205_v37  ;;  %v8668_v59 = vld [vmem:[%s10942_s4 + $0x10] sm:$0xff]  }
 0x169   : > { %7665 = vmatprep.subr.bf16.mxu0 %v8663_v46  ;;  %7771 = vmatprep.subr.bf16.mxu1 %v8668_v59 }
 0x16a   : > { %7772 = vmatpush3.bf16.msra.mxu1 %v8668_v59 }
 0x16c   : > { %7666 = vmatpush3.bf16.msra.mxu0 %v8663_v46  ;;  %v3530_v46 = vshrl.u32 %v3456_v10, 16 }
 0x16d   : > { %7699 = vmatprep.subr.bf16.mxu0 %v8664_v51 }
 0x16f   : > { %7636 = vmatmul.mubr.msk.bf16.gmra.mrb[4].mxu0 %vm581_vm0, %v9208_v38 }
 0x170   : > { %7639 = vmatprep.mubr.msk.bf16.mxu0 %vm581_vm0, %v9219_v48 }
 0x177   : > { %7640 = vmatmul.mubr.msk.bf16.gmra.mrb[8].mxu0 %vm581_vm0, %v9222_v49 }
 0x178   : > { %7643 = vmatprep.mubr.msk.bf16.mxu0 %vm581_vm0, %v9233_v54 }
 0x17f   : > { %7644 = vmatmul.mubr.msk.bf16.gmra.mrb[12].mxu0 %vm581_vm0, %v9236_v58 }
 0x180   : > { %7647 = vmatprep.mubr.msk.bf16.mxu0 %vm581_vm0, %v9247_v13 }
 0x187   : > { %7648 = vmatmul.mubr.msk.bf16.gmra.mrb[16].mxu0 %vm581_vm0, %v9250_v20 }
 0x188   : > { %7651 = vmatprep.mubr.msk.bf16.mxu0 %vm581_vm0, %v9261_v22 }
 0x18f   : > { %7652 = vmatmul.mubr.msk.bf16.gmra.mrb[20].mxu0 %vm581_vm0, %v9264_v24 }
 0x190   : > { %7655 = vmatprep.mubr.msk.bf16.mxu0 %vm581_vm0, %v9275_v42 }
 0x197   : > { %7656 = vmatmul.mubr.msk.bf16.gmra.mrb[24].mxu0 %vm581_vm0, %v9278_v44 }
 0x198   : > { %7659 = vmatprep.mubr.msk.bf16.mxu0 %vm581_vm0, %v9287_v3 }
 0x19f   : > { %7660 = vmatmul.mubr.msk.bf16.gmra.mrb[28].mxu0 %vm581_vm0, %v9415_v2 }
 0x1a0   : > { %7667 = vmatprep.mubr.msk.bf16.mxu0 %vm581_vm0, %v8910_v19  ;;  %v329_v19 = vld [vmem:[%s8887_s23 + $0x198] sm:$0xff] }
 0x1a7   : > { %7668 = vmatmul.mubr.msk.bf16.vlgmr.msra.gmra.mrb[0].mxu0 %vm581_vm0, %v8924_v35  ;;  %v330_v35 = vld [vmem:[%s8887_s23 + $0x1a0] sm:$0xff] }
 0x1a8   : > { %7700 = vmatpush3.bf16.msra.mxu0 %v8664_v51  ;;  %7671 = vmatprep.mubr.msk.bf16.mxu0 %vm581_vm0, %v8930_v40  ;;  %v366_v40 = vpack.c.bf16 %v330_v35, %v329_v19  ;;  %v3519_v51 = vrot.slane %v3517_v1, 4 }
 0x1a9   : > { %7701 = vmatprep.subr.bf16.mxu0 %v8665_v23 }
 0x1aa   : > { %v3523_v19 = vor.u32 %v3522_v6, %v3519_v51  ;;  %v2921_v51 = vsel %vm9538_vm7, 0, %v2920_v16  ;;  %v2917_v6 = vld [vmem:[#allocation2 + $0xbc] sm:$0x1] }
 0x1ab   : > { %2922 = vst [vmem:[#allocation2 + $0xc8] sm:$0x1] %v2921_v51 }
 0x1ac   : > { %7702 = vmatpush3.bf16.msra.mxu0 %v8665_v23  ;;  %v3532_v23 = vrot.slane %v3530_v46, 4 }
 0x1ad   : > { %7735 = vmatprep.subr.bf16.mxu0 %v8666_v28 }
 0x1af   : > { %7672 = vmatmul.mubr.msk.bf16.gmra.mrb[4].mxu0 %vm581_vm0, %v8955_v62  ;;  %v8667_v62 = vld [vmem:[%s10939_s1 + $0x88] sm:$0xff]  }
 0x1b0   : > { %7675 = vmatprep.mubr.msk.bf16.mxu0 %vm581_vm0, %v8964_v4 }
 0x1b7   : > { %7676 = vmatmul.mubr.msk.bf16.gmra.mrb[8].mxu0 %vm581_vm0, %v8988_v26  ;;  %v2198_v26 = vshrl.u32 %v366_v40, 16 }
 0x1b8   : > { %7679 = vmatprep.mubr.msk.bf16.mxu0 %vm581_vm0, %v8994_v31 }
 0x1bf   : > { %7680 = vmatmul.mubr.msk.bf16.gmra.mrb[12].mxu0 %vm581_vm0, %v9019_v56 }
 0x1c0   : > { %7683 = vmatprep.mubr.msk.bf16.mxu0 %vm581_vm0, %v9025_v60  ;;  %v2423_v60 = vrot.slane %v366_v40, 1 }
 0x1c7   : > { %7684 = vmatmul.mubr.msk.bf16.gmra.mrb[16].mxu0 %vm581_vm0, %v9045_v25 }
 0x1c8   : > { %7687 = vmatprep.mubr.msk.bf16.mxu0 %vm581_vm0, %v9056_v41  ;;  %v2828_v41 = vld [vmem:[#allocation2 + $0x18] sm:$0x1] }
 0x1cf   : > { %7688 = vmatmul.mubr.msk.bf16.gmra.mrb[20].mxu0 %vm581_vm0, %v9073_v63  ;;  %v2829_v63 = vsel %vm9528_vm5, 0, %v2828_v41  ;;  %v2899_v41 = vld [vmem:[#allocation2 + $0x74] sm:$0x1] }
 0x1d0   : > { %7691 = vmatprep.mubr.msk.bf16.mxu0 %vm581_vm0, %v9077_v9  ;;  %v2825_v9 = vld [vmem:[#allocation2 + $0xc] sm:$0x1]  ;;  %2830 = vst [vmem:[#allocation2 + $0x18] sm:$0x1] %v2829_v63  ;;  %v2900_v63 = vsel %vm9538_vm7, 0, %v2899_v41 }
 0x1d1   : > { %2901 = vst [vmem:[#allocation2 + $0x74] sm:$0x1] %v2900_v63 }
 0x1d7   : > { %7692 = vmatmul.mubr.msk.bf16.gmra.mrb[24].mxu0 %vm581_vm0, %v9108_v5 }
 0x1d8   : > { %7695 = vmatprep.mubr.msk.bf16.mxu0 %vm581_vm0, %v9329_v50  ;;  %v2843_v50 = vld [vmem:[#allocation2 + $0x54] sm:$0x1] }
 0x1d9   : > { %v2844_v14 = vsel %vm9528_vm5, 0, %v2843_v50 }
 0x1da   : > { %2845 = vst [vmem:[#allocation2 + $0x54] sm:$0x1] %v2844_v14 }
 0x1df   : > { %7696 = vmatmul.mubr.msk.bf16.gmra.mrb[28].mxu0 %vm581_vm0, %v366_v40 }
 0x1e0   : > { %7703 = vmatprep.mubr.msk.bf16.mxu0 %vm581_vm0, %v8960_v0  ;;  %v331_v0 = vld [vmem:[%s8887_s23 + $0x1a8] sm:$0x3] }
 0x1e1   : > { %v367_v4 = vpack.c.bf16 %v331_v0, %v331_v0 }
 0x1e3   : > { %v2205_v31 = vshll.u32 %v367_v4, 16  ;;  %v2424_v25 = vrot.slane %v367_v4, 1  ;;  %v3524_v4 = vrot.slane %v3523_v19, 4 }
 0x1e5   : > { %v2207_v56 = vrot.slane %v2205_v31, 1 }
 0x1e7   : > { %7704 = vmatmul.mubr.msk.bf16.vlgmr.msra.gmra.mrb[0].mxu0 %vm581_vm0, %v8981_v17  ;;  %v2200_v17 = vshll.u32 %v366_v40, 16  ;;  %v2852_v40 = vld [vmem:[#allocation2 + $0x78] sm:$0x1] }
 0x1e8   : > { %7736 = vmatpush3.bf16.msra.mxu0 %v8666_v28  ;;  %7707 = vmatprep.mubr.msk.bf16.mxu0 %vm581_vm0, %v8991_v27  ;;  %v8669_v28 = vld [vmem:[%s10942_s4 + $0x18] sm:$0xff]   ;;  %v2853_v0 = vsel %vm9528_vm5, 0, %v2852_v40 }
 0x1e9   : > { %7737 = vmatprep.subr.bf16.mxu0 %v8667_v62  ;;  %v2202_v27 = vrot.slane %v2200_v17, 1  ;;  %7773 = vmatprep.subr.bf16.mxu1 %v8669_v28  ;;  %2854 = vst [vmem:[#allocation2 + $0x78] sm:$0x1] %v2853_v0 }
 0x1ea   : > { %7774 = vmatpush3.bf16.msra.mxu1 %v8669_v28 }
 0x1ec   : > { %7738 = vmatpush3.bf16.msra.mxu0 %v8667_v62  ;;  %v3533_v62 = vor.u32 %v3532_v23, %v3528_v53  ;;  %v2918_v23 = vsel %vm9538_vm7, 0, %v2917_v6 }
 0x1ed   : > { %2919 = vst [vmem:[#allocation2 + $0xbc] sm:$0x1] %v2918_v23 }
 0x1ee   : > { %v3534_v31 = vrot.slane %v3533_v62, 4 }
 0x1ef   : > { %7708 = vmatmul.mubr.msk.bf16.gmra.mrb[4].mxu0 %vm581_vm0, %v9016_v52  ;;  %v2203_v52 = vor.u32 %v2202_v27, %v2198_v26  ;;  %v2849_v26 = vld [vmem:[#allocation2 + $0x6c] sm:$0x1]  ;;  %v10983_v27 = vmov 0 }
 0x1f0   : > { %7711 = vmatprep.mubr.msk.bf16.mxu0 %vm581_vm0, %v9022_v57  ;;  %v10984_v27 = vsel %vm9584_vm11, 4294967295, %v10983_v27 }
 0x1f1   : > { %v2208_v57 = vsel %vm372_vm1, %v2203_v52, %v2207_v56  ;;  %10985 = vst [vmem:[#allocation6_spill] sm:$0xff] %v10984_v27  ;;  %v2850_v52 = vsel %vm9528_vm5, 0, %v2849_v26  ;;  %v3529_v56 = vsel %vm9584_vm11, %v3524_v4, %v3528_v53  ;;  %vm3019_vm1 = vsmask.f32 4368 }
 0x1f2   : > { %2851 = vst [vmem:[#allocation2 + $0x6c] sm:$0x1] %v2850_v52 }
 0x1f7   : > { %7712 = vmatmul.mubr.msk.bf16.gmra.mrb[8].mxu0 %vm581_vm0, %v9049_v30  ;;  %v2425_v30 = vsel %vm1028_vm2, %v2423_v60, %v2424_v25  ;;  %v2902_v25 = vld [vmem:[#allocation2 + $0x80] sm:$0x1]  ;;  %vm9652_vm2 = vmand %vm2812_vm8, %vm2873_vm6 }
 0x1f8   : > { %7715 = vmatprep.mubr.msk.bf16.mxu0 %vm581_vm0, %v9053_v36 }
 0x1ff   : > { %7716 = vmatmul.mubr.msk.bf16.gmra.mrb[12].mxu0 %vm581_vm0, %v9081_v15  ;;  %v2826_v15 = vsel %vm9528_vm5, 0, %v2825_v9  ;;  %v9602_v9 = vld [vmem:[%s10942_s4] sm:$0xff]  }
 0x200   : > { %7719 = vmatprep.mubr.msk.bf16.mxu0 %vm581_vm0, %v9086_v21  ;;  %2827 = vst [vmem:[#allocation2 + $0xc] sm:$0x1] %v2826_v15  ;;  %v2858_v15 = vld [vmem:[#allocation2 + $0x90] sm:$0x1]  ;;  %7807 = vmatprep.subr.bf16.mxu1 %v9602_v9 }
 0x207   : > { %7720 = vmatmul.mubr.msk.bf16.gmra.mrb[16].mxu0 %vm581_vm0, %v9106_v61  ;;  %v2878_v61 = vld [vmem:[#allocation2 + $0x20] sm:$0x1] }
 0x208   : > { %7723 = vmatprep.mubr.msk.bf16.mxu0 %vm581_vm0, %v9111_v8  ;;  %v2879_v5 = vsel %vm9538_vm7, 0, %v2878_v61  ;;  %v2875_v8 = vld [vmem:[#allocation2 + $0x14] sm:$0x1]  ;;  %v2859_v61 = vsel %vm9528_vm5, 0, %v2858_v15 }
 0x209   : > { %2880 = vst [vmem:[#allocation2 + $0x20] sm:$0x1] %v2879_v5  ;;  %2860 = vst [vmem:[#allocation2 + $0x90] sm:$0x1] %v2859_v61  ;;  %v2855_v5 = vld [vmem:[#allocation2 + $0x84] sm:$0x1] }
 0x20f   : > { %7724 = vmatmul.mubr.msk.bf16.gmra.mrb[20].mxu0 %vm581_vm0, %v9121_v32  ;;  %v2876_v32 = vsel %vm9538_vm7, 0, %v2875_v8  ;;  %v2856_v8 = vsel %vm9528_vm5, 0, %v2855_v5 }
 0x210   : > { %7727 = vmatprep.mubr.msk.bf16.mxu0 %vm581_vm0, %v9126_v43  ;;  %2877 = vst [vmem:[#allocation2 + $0x14] sm:$0x1] %v2876_v32  ;;  %v2834_v43 = vld [vmem:[#allocation2 + $0x30] sm:$0x1]  ;;  %2857 = vst [vmem:[#allocation2 + $0x84] sm:$0x1] %v2856_v8 }
 0x211   : > { %v2908_v32 = vld [vmem:[#allocation2 + $0x98] sm:$0x1] }
 0x217   : > { %7728 = vmatmul.mubr.msk.bf16.gmra.mrb[24].mxu0 %vm581_vm0, %v9133_v47  ;;  %v2835_v47 = vsel %vm9528_vm5, 0, %v2834_v43  ;;  %v2909_v43 = vsel %vm9538_vm7, 0, %v2908_v32  ;;  %v3350_v32 = vld [vmem:[#allocation2 + $0x18] sm:$0xf] }
 0x218   : > { %7731 = vmatprep.mubr.msk.bf16.mxu0 %vm581_vm0, %v9373_v39  ;;  %2836 = vst [vmem:[#allocation2 + $0x30] sm:$0x1] %v2835_v47  ;;  %v2894_v39 = vsel %vm9538_vm7, 0, %v2893_v12  ;;  %v2905_v47 = vld [vmem:[#allocation2 + $0x8c] sm:$0x1] }
 0x219   : > { %2895 = vst [vmem:[#allocation2 + $0x5c] sm:$0x1] %v2894_v39  ;;  %2910 = vst [vmem:[#allocation2 + $0x98] sm:$0x1] %v2909_v43 }
 0x21f   : > { %7732 = vmatmul.mubr.msk.bf16.gmra.mrb[28].mxu0 %vm581_vm0, %v2208_v57 }
 0x220   : > { %7739 = vmatprep.mubr.msk.bf16.mxu0 %vm581_vm0, %v9188_v7  ;;  %v2831_v7 = vld [vmem:[#allocation2 + $0x24] sm:$0x1] }
 0x227   : > { %7740 = vmatmul.mubr.msk.bf16.vlgmr.msra.gmra.mrb[0].mxu0 %vm581_vm0, %v9205_v37  ;;  %v2832_v37 = vsel %vm9528_vm5, 0, %v2831_v7  ;;  %v2906_v7 = vsel %vm9538_vm7, 0, %v2905_v47 }
 0x228   : > { %7743 = vmatprep.mubr.msk.bf16.mxu0 %vm581_vm0, %v9208_v38  ;;  %2833 = vst [vmem:[#allocation2 + $0x24] sm:$0x1] %v2832_v37  ;;  %v2884_v38 = vld [vmem:[#allocation2 + $0x38] sm:$0x1]  ;;  %2907 = vst [vmem:[#allocation2 + $0x8c] sm:$0x1] %v2906_v7 }
 0x229   : > { %v2864_v37 = vld [vmem:[#allocation2 + $0xa8] sm:$0x1] }
 0x22f   : > { %7744 = vmatmul.mubr.msk.bf16.gmra.mrb[4].mxu0 %vm581_vm0, %v9219_v48  ;;  %v2885_v48 = vsel %vm9538_vm7, 0, %v2884_v38  ;;  %v2865_v38 = vsel %vm9528_vm5, 0, %v2864_v37 }
 0x230   : > { %7747 = vmatprep.mubr.msk.bf16.mxu0 %vm581_vm0, %v9222_v49  ;;  %v2881_v49 = vld [vmem:[#allocation2 + $0x2c] sm:$0x1]  ;;  %2886 = vst [vmem:[#allocation2 + $0x38] sm:$0x1] %v2885_v48  ;;  %2866 = vst [vmem:[#allocation2 + $0xa8] sm:$0x1] %v2865_v38 }
 0x231   : > { %v2861_v48 = vld [vmem:[#allocation2 + $0x9c] sm:$0x1] }
 0x237   : > { %7748 = vmatmul.mubr.msk.bf16.gmra.mrb[8].mxu0 %vm581_vm0, %v9233_v54  ;;  %v2882_v54 = vsel %vm9538_vm7, 0, %v2881_v49  ;;  %v2862_v49 = vsel %vm9528_vm5, 0, %v2861_v48  ;;  %v3343_v48 = vld [vmem:[#allocation2 + $0xc] sm:$0xf] }
 0x238   : > { %7751 = vmatprep.mubr.msk.bf16.mxu0 %vm581_vm0, %v9236_v58  ;;  %2883 = vst [vmem:[#allocation2 + $0x2c] sm:$0x1] %v2882_v54  ;;  %v2840_v58 = vld [vmem:[#allocation2 + $0x48] sm:$0x1]  ;;  %2863 = vst [vmem:[#allocation2 + $0x9c] sm:$0x1] %v2862_v49 }
 0x239   : > { %v2914_v54 = vld [vmem:[#allocation2 + $0xb0] sm:$0x1] }
 0x23f   : > { %7752 = vmatmul.mubr.msk.bf16.gmra.mrb[12].mxu0 %vm581_vm0, %v9247_v13  ;;  %v2841_v13 = vsel %vm9528_vm5, 0, %v2840_v58  ;;  %v2915_v58 = vsel %vm9538_vm7, 0, %v2914_v54 }
 0x240   : > { %7755 = vmatprep.mubr.msk.bf16.mxu0 %vm581_vm0, %v9250_v20  ;;  %v2837_v20 = vld [vmem:[#allocation2 + $0x3c] sm:$0x1]  ;;  %2842 = vst [vmem:[#allocation2 + $0x48] sm:$0x1] %v2841_v13  ;;  %2916 = vst [vmem:[#allocation2 + $0xb0] sm:$0x1] %v2915_v58 }
 0x241   : > { %v2911_v13 = vld [vmem:[#allocation2 + $0xa4] sm:$0x1] }
 0x247   : > { %7756 = vmatmul.mubr.msk.bf16.gmra.mrb[16].mxu0 %vm581_vm0, %v9261_v22  ;;  %v2838_v22 = vsel %vm9528_vm5, 0, %v2837_v20  ;;  %v2912_v20 = vsel %vm9538_vm7, 0, %v2911_v13 }
 0x248   : > { %7759 = vmatprep.mubr.msk.bf16.mxu0 %vm581_vm0, %v9264_v24  ;;  %v2890_v24 = vld [vmem:[#allocation2 + $0x50] sm:$0x1]  ;;  %2839 = vst [vmem:[#allocation2 + $0x3c] sm:$0x1] %v2838_v22  ;;  %2913 = vst [vmem:[#allocation2 + $0xa4] sm:$0x1] %v2912_v20 }
 0x249   : > { %v2870_v22 = vld [vmem:[#allocation2 + $0xc0] sm:$0x1] }
 0x24f   : > { %7760 = vmatmul.mubr.msk.bf16.gmra.mrb[20].mxu0 %vm581_vm0, %v9275_v42  ;;  %v2891_v42 = vsel %vm9538_vm7, 0, %v2890_v24  ;;  %v2871_v24 = vsel %vm9528_vm5, 0, %v2870_v22  ;;  %v3354_v22 = vld [vmem:[#allocation2 + $0x20] sm:$0x1] }
 0x250   : > { %7763 = vmatprep.mubr.msk.bf16.mxu0 %vm581_vm0, %v9278_v44  ;;  %2892 = vst [vmem:[#allocation2 + $0x50] sm:$0x1] %v2891_v42  ;;  %v2887_v44 = vld [vmem:[#allocation2 + $0x44] sm:$0x1]  ;;  %2872 = vst [vmem:[#allocation2 + $0xc0] sm:$0x1] %v2871_v24 }
 0x251   : > { %v9626_v42 = vld [vmem:[%s10940_s2] ss:$0 sm:$0xff] }
 0x257   : > { %7764 = vmatmul.mubr.msk.bf16.gmra.mrb[24].mxu0 %vm581_vm0, %v9287_v3  ;;  %v2888_v3 = vsel %vm9538_vm7, 0, %v2887_v44  ;;  %v2867_v44 = vld [vmem:[#allocation2 + $0xb4] sm:$0x1] }
 0x258   : > { %7767 = vmatprep.mubr.msk.bf16.mxu0 %vm581_vm0, %v9415_v2  ;;  %2889 = vst [vmem:[#allocation2 + $0x44] sm:$0x1] %v2888_v3  ;;  %v3457_v2 = vld [vmem:[#allocation2 + $0x8] sm:$0x1]  ;;  %v2868_v11 = vsel %vm9528_vm5, 0, %v2867_v44 }
 0x259   : > { %v3536_v35 = vshll.u32 %v3457_v2, 16  ;;  %2869 = vst [vmem:[#allocation2 + $0xb4] sm:$0x1] %v2868_v11 }
 0x25b   : > { %v3538_v17 = vrot.slane %v3536_v35, 5 }
 0x25d   : > { %v3539_v57 = vsel %vm9584_vm11, %v3534_v31, %v3538_v17 }
 0x25e   : > { %v6817_v60 = vcombine.low %v3529_v56, %v3539_v57 }
 0x25f   : > { %7768 = vmatmul.mubr.msk.bf16.gmra.mrb[28].mxu0 %vm581_vm0, %v2425_v30  ;;  %v2903_v30 = vsel %vm9538_vm7, 0, %v2902_v25  ;;  %vm9658_vm7 = vmor %vm2823_vm4, %vm3019_vm1 }
 0x260   : > { %7775 = vmatprep.mubr.msk.bf16.mxu1 %vm581_vm0, %v6817_v60  ;;  %2904 = vst [vmem:[#allocation2 + $0x80] sm:$0x1] %v2903_v30 }
 0x2fa   : > { %v7741_v3 = vpop.f32.mrb[0].mxu0 }
 0x2fb   : > { %v2647_v34 = vmul.f32 %v7741_v3, %v9626_v42  ;;  %v2479_v50 = vpop.f32.mrb[1].mxu0 }
 0x2fc   : > { %v2645_v14 = vmul.f32 %v9626_v42, %v2479_v50  ;;  %v7742_v59 = vpop.f32.mrb[2].mxu0  ;;  %v3347_v50 = vld [vmem:[#allocation2 + $0x14] sm:$0x1] }
 0x2fd   : > { %v2686_v55 = vadd.f32 %v9631_v18, %v2647_v34  ;;  %v2648_v33 = vmul.f32 %v7742_v59, %v9626_v42  ;;  %v2482_v10 = vpop.f32.mrb[3].mxu0 }
 0x2fe   : > { %v2684_v45 = vadd.f32 %v9631_v18, %v2645_v14  ;;  %v2646_v12 = vmul.f32 %v9626_v42, %v2482_v10 }
 0x2ff   : > { %vm2718_vm12 = vcmp.gt.f32.partialorder %v2686_v55, 0.0  ;;  %v2750_v1 = vmul.f32 0.1, %v2686_v55  ;;  %v2687_v29 = vadd.f32 %v9631_v18, %v2648_v33 }
 0x300   : > { %vm2716_vm13 = vcmp.gt.f32.partialorder %v2684_v45, 0.0  ;;  %v2748_v39 = vmul.f32 0.1, %v2684_v45  ;;  %v2685_v46 = vadd.f32 %v9631_v18, %v2646_v12 }
 0x301   : > { %v2782_v53 = vsel %vm2718_vm12, %v2686_v55, %v2750_v1  ;;  %vm2719_vm14 = vcmp.gt.f32.partialorder %v2687_v29, 0.0  ;;  %v2751_v2 = vmul.f32 0.1, %v2687_v29 }
 0x302   : > { %v7092_v28 = vpack.c.bf16 %v2782_v53, %v2782_v53  ;;  %v2780_v19 = vsel %vm2716_vm13, %v2684_v45, %v2748_v39  ;;  %vm2717_vm15 = vcmp.gt.f32.partialorder %v2685_v46, 0.0  ;;  %v2749_v35 = vmul.f32 0.1, %v2685_v46  ;;  %v7745_v40 = vpop.f32.mrb[4].mxu0 }
 0x303   : > { %v7090_v62 = vpack.c.bf16 %v2780_v19, %v2780_v19  ;;  %v2783_v0 = vsel %vm2719_vm14, %v2687_v29, %v2751_v2  ;;  %v2651_v4 = vmul.f32 %v7745_v40, %v9626_v42  ;;  %v2495_v17 = vpop.f32.mrb[5].mxu0 }
 0x304   : > { %v3039_v26 = vshrl.u32 %v7092_v28, 16  ;;  %v3042_v31 = vshll.u32 %v7092_v28, 16  ;;  %v7093_v52 = vpack.c.bf16 %v2783_v0, %v2783_v0  ;;  %v2781_v56 = vsel %vm2717_vm15, %v2685_v46, %v2749_v35  ;;  %v7746_v57 = vpop.f32.mrb[6].mxu0 }
 0x305   : > { %v3022_v60 = vshrl.u32 %v7090_v62, 16  ;;  %v3025_v21 = vshll.u32 %v7090_v62, 16  ;;  %v7091_v25 = vpack.c.bf16 %v2781_v56, %v2781_v56  ;;  %v2690_v30 = vadd.f32 %v9631_v18, %v2651_v4  ;;  %v2498_v41 = vpop.f32.mrb[7].mxu0 }
 0x306   : > { %v3041_v63 = vrot.slane %v3039_v26, 7  ;;  %v3047_v15 = vshrl.u32 %v7093_v52, 16  ;;  %v3050_v61 = vshll.u32 %v7093_v52, 16  ;;  %v2649_v5 = vmul.f32 %v9626_v42, %v2495_v17  ;;  %v3364_v17 = vld [vmem:[#allocation2 + $0x30] sm:$0xf] }
 0x307   : > { %v3024_v43 = vrot.slane %v3022_v60, 7  ;;  %v3030_v47 = vshrl.u32 %v7091_v25, 16  ;;  %v3033_v7 = vshll.u32 %v7091_v25, 16  ;;  %vm2722_vm3 = vcmp.gt.f32.partialorder %v2690_v30, 0.0 }
 0x308   : > { %v3044_v37 = vor.u32 %v3042_v31, %v3041_v63  ;;  %v3045_v38 = vrot.slane %v3041_v63, 4  ;;  %v3049_v49 = vrot.slane %v3047_v15, 7  ;;  %v2754_v54 = vmul.f32 0.1, %v2690_v30 }
 0x309   : > { %v3027_v58 = vor.u32 %v3025_v21, %v3024_v43  ;;  %v3028_v13 = vrot.slane %v3024_v43, 4  ;;  %v3032_v24 = vrot.slane %v3030_v47, 7  ;;  %v2688_v44 = vadd.f32 %v9631_v18, %v2649_v5 }
 0x30a   : > { %v3351_v3 = vsel %vm9652_vm2, %v3044_v37, %v3350_v32  ;;  %v3052_v11 = vor.u32 %v3050_v61, %v3049_v49  ;;  %v3054_v34 = vrot.slane %v3049_v49, 4  ;;  %v2786_v14 = vsel %vm2722_vm3, %v2690_v30, %v2754_v54  ;;  %v7749_v59 = vpop.f32.mrb[8].mxu0  ;;  %v3357_v32 = vld [vmem:[#allocation2 + $0x24] sm:$0xf] }
 0x30b   : > { %3352 = vst [vmem:[#allocation2 + $0x18] sm:$0xf] %v3351_v3  ;;  %v3344_v55 = vsel %vm9652_vm2, %v3027_v58, %v3343_v48  ;;  %v3035_v33 = vor.u32 %v3033_v7, %v3032_v24  ;;  %v3037_v10 = vrot.slane %v3032_v24, 4  ;;  %v7096_v45 = vpack.c.bf16 %v2786_v14, %v2786_v14  ;;  %v2511_v12 = vpop.f32.mrb[9].mxu0 }
 0x30c   : > { %3345 = vst [vmem:[#allocation2 + $0xc] sm:$0xf] %v3344_v55  ;;  %v3053_v1 = vsel %vm9658_vm7, %v3045_v38, %v3052_v11  ;;  %v3355_v29 = vsel %vm9528_vm5, %v3054_v34, %v3354_v22  ;;  %vm2720_vm4 = vcmp.gt.f32.partialorder %v2688_v44, 0.0  ;;  %v2752_v16 = vmul.f32 0.1, %v2688_v44  ;;  %v7750_v39 = vpop.f32.mrb[10].mxu0 }
 0x30d   : > { %3353 = vst.msk [vmem:[#allocation2 + $0x1c] sm:$0xf] %vm2812_vm8, %v3053_v1  ;;  %3356 = vst [vmem:[#allocation2 + $0x20] sm:$0x1] %v3355_v29  ;;  %v3036_v46 = vsel %vm9658_vm7, %v3028_v13, %v3035_v33  ;;  %v3348_v51 = vsel %vm9528_vm5, %v3037_v10, %v3347_v50  ;;  %v3073_v6 = vshrl.u32 %v7096_v45, 16  ;;  %v3076_v53 = vshll.u32 %v7096_v45, 16 }
 0x30e   : > { %v2514_v2 = vpop.f32.mrb[11].mxu0  ;;  %3346 = vst.msk [vmem:[#allocation2 + $0x10] sm:$0xf] %vm2812_vm8, %v3036_v46  ;;  %3349 = vst [vmem:[#allocation2 + $0x14] sm:$0x1] %v3348_v51  ;;  %v2784_v23 = vsel %vm2720_vm4, %v2688_v44, %v2752_v16  ;;  %v2652_v28 = vmul.f32 %v7746_v57, %v9626_v42  ;;  %v2650_v19 = vmul.f32 %v9626_v42, %v2498_v41 }
 0x30f   : > { %v2655_v35 = vmul.f32 %v7749_v59, %v9626_v42  ;;  %v9681_v40 = vrot.slane %v3073_v6, 7  ;;  %v7094_v62 = vpack.c.bf16 %v2784_v23, %v2784_v23  ;;  %v2653_v0 = vmul.f32 %v9626_v42, %v2511_v12  ;;  %v3368_v45 = vld [vmem:[#allocation2 + $0x38] sm:$0x1]  ;;  %v3361_v16 = vld [vmem:[#allocation2 + $0x2c] sm:$0x1] }
 0x310   : > { %v2656_v4 = vmul.f32 %v7750_v39, %v9626_v42  ;;  %v2691_v26 = vadd.f32 %v9631_v18, %v2652_v28  ;;  %v2689_v31 = vadd.f32 %v9631_v18, %v2650_v19  ;;  %v2654_v56 = vmul.f32 %v9626_v42, %v2514_v2 }
 0x311   : > { %v2694_v52 = vadd.f32 %v9631_v18, %v2655_v35  ;;  %v3078_v57 = vor.u32 %v3076_v53, %v9681_v40  ;;  %v3079_v60 = vrot.slane %v9681_v40, 4  ;;  %v3056_v21 = vshrl.u32 %v7094_v62, 16 }
 0x312   : > { %v3059_v25 = vshll.u32 %v7094_v62, 16  ;;  %vm2723_vm6 = vcmp.gt.f32.partialorder %v2691_v26, 0.0  ;;  %v2755_v30 = vmul.f32 0.1, %v2691_v26  ;;  %vm2721_vm9 = vcmp.gt.f32.partialorder %v2689_v31, 0.0  ;;  %v7753_v5 = vpop.f32.mrb[12].mxu0 }
 0x313   : > { %v2753_v41 = vmul.f32 0.1, %v2689_v31  ;;  %v3365_v63 = vsel %vm9652_vm2, %v3078_v57, %v3364_v17  ;;  %v3058_v15 = vrot.slane %v3056_v21, 7  ;;  %vm2726_vm10 = vcmp.gt.f32.partialorder %v2694_v52, 0.0  ;;  %v9695_v38 = vpop.f32.mrb[13].mxu0 }
 0x314   : > { %v2758_v61 = vmul.f32 0.1, %v2694_v52  ;;  %3366 = vst [vmem:[#allocation2 + $0x30] sm:$0xf] %v3365_v63  ;;  %v2787_v43 = vsel %vm2723_vm6, %v2691_v26, %v2755_v30  ;;  %v2692_v7 = vadd.f32 %v9631_v18, %v2653_v0  ;;  %v2695_v37 = vadd.f32 %v9631_v18, %v2656_v4  ;;  %v9697_v13 = vpop.f32.mrb[14].mxu0 }
 0x315   : > { %v2785_v47 = vsel %vm2721_vm9, %v2689_v31, %v2753_v41  ;;  %v3061_v48 = vor.u32 %v3059_v25, %v3058_v15  ;;  %v3062_v49 = vrot.slane %v3058_v15, 4  ;;  %v7097_v54 = vpack.c.bf16 %v2787_v43, %v2787_v43  ;;  %v9699_v44 = vpop.f32.mrb[15].mxu0  ;;  %v3378_v57 = vld [vmem:[#allocation2 + $0x48] sm:$0xf]  ;;  %v3371_v63 = vld [vmem:[#allocation2 + $0x3c] sm:$0xf] }
 0x316   : > { %v7095_v58 = vpack.c.bf16 %v2785_v47, %v2785_v47  ;;  %v2790_v22 = vsel %vm2726_vm10, %v2694_v52, %v2758_v61  ;;  %vm2724_vm12 = vcmp.gt.f32.partialorder %v2692_v7, 0.0  ;;  %v2756_v24 = vmul.f32 0.1, %v2692_v7 }
 0x317   : > { %vm2727_vm13 = vcmp.gt.f32.partialorder %v2695_v37, 0.0  ;;  %v3358_v3 = vsel %vm9652_vm2, %v3061_v48, %v3357_v32  ;;  %v3081_v11 = vshrl.u32 %v7097_v54, 16  ;;  %v3084_v34 = vshll.u32 %v7097_v54, 16 }
 0x318   : > { %v3064_v50 = vshrl.u32 %v7095_v58, 16  ;;  %3359 = vst [vmem:[#allocation2 + $0x24] sm:$0xf] %v3358_v3  ;;  %v3067_v14 = vshll.u32 %v7095_v58, 16  ;;  %v7100_v59 = vpack.c.bf16 %v2790_v22, %v2790_v22  ;;  %v2788_v55 = vsel %vm2724_vm12, %v2692_v7, %v2756_v24 }
 0x319   : > { %v2759_v33 = vmul.f32 0.1, %v2695_v37  ;;  %v3083_v10 = vrot.slane %v3081_v11, 7  ;;  %v7098_v1 = vpack.c.bf16 %v2788_v55, %v2788_v55  ;;  %v2693_v29 = vadd.f32 %v9631_v18, %v2654_v56 }
 0x31a   : > { %v3066_v12 = vrot.slane %v3064_v50, 7  ;;  %v3107_v39 = vshrl.u32 %v7100_v59, 16  ;;  %v3110_v46 = vshll.u32 %v7100_v59, 16  ;;  %v2659_v6 = vmul.f32 %v7753_v5, %v9626_v42  ;;  %v9706_v53 = vpop.f32.mrb[16].mxu0 }
 0x31b   : > { %v2791_v51 = vsel %vm2727_vm13, %v2695_v37, %v2759_v33  ;;  %v3086_v2 = vor.u32 %v3084_v34, %v3083_v10  ;;  %v3088_v23 = vrot.slane %v3083_v10, 4  ;;  %v2543_v35 = vpop.f32.mrb[17].mxu0  ;;  %v3090_v62 = vshrl.u32 %v7098_v1, 16  ;;  %v3382_v37 = vld [vmem:[#allocation2 + $0x50] sm:$0x1] }
 0x31c   : > { %v3069_v28 = vor.u32 %v3067_v14, %v3066_v12  ;;  %v3071_v19 = vrot.slane %v3066_v12, 4  ;;  %v3109_v40 = vrot.slane %v3107_v39, 7  ;;  %v3093_v0 = vshll.u32 %v7098_v1, 16  ;;  %v9708_v17 = vpop.f32.mrb[18].mxu0 }
 0x31d   : > { %v7101_v4 = vpack.c.bf16 %v2791_v51, %v2791_v51  ;;  %v3087_v26 = vsel %vm9658_vm7, %v3079_v60, %v3086_v2  ;;  %v3369_v31 = vsel %vm9528_vm5, %v3088_v23, %v3368_v45  ;;  %v9718_v21 = vpop.f32.mrb[19].mxu0  ;;  %v3092_v30 = vrot.slane %v3090_v62, 7 }
 0x31e   : > { %v3070_v52 = vsel %vm9658_vm7, %v3062_v49, %v3069_v28  ;;  %v3362_v56 = vsel %vm9528_vm5, %v3071_v19, %v3361_v16  ;;  %3367 = vst.msk [vmem:[#allocation2 + $0x34] sm:$0xf] %vm2812_vm8, %v3087_v26  ;;  %3370 = vst [vmem:[#allocation2 + $0x38] sm:$0x1] %v3369_v31  ;;  %v3112_v25 = vor.u32 %v3110_v46, %v3109_v40  ;;  %v3113_v60 = vrot.slane %v3109_v40, 4 }
 0x31f   : > { %3360 = vst.msk [vmem:[#allocation2 + $0x28] sm:$0xf] %vm2812_vm8, %v3070_v52  ;;  %3363 = vst [vmem:[#allocation2 + $0x2c] sm:$0x1] %v3362_v56  ;;  %v3115_v41 = vshrl.u32 %v7101_v4, 16  ;;  %v3118_v15 = vshll.u32 %v7101_v4, 16  ;;  %v2698_v5 = vadd.f32 %v9631_v18, %v2659_v6  ;;  %v3095_v43 = vor.u32 %v3093_v0, %v3092_v30 }
 0x320   : > { %vm2725_vm14 = vcmp.gt.f32.partialorder %v2693_v29, 0.0  ;;  %v2757_v61 = vmul.f32 0.1, %v2693_v29  ;;  %v3379_v32 = vsel %vm9652_vm2, %v3112_v25, %v3378_v57  ;;  %v3096_v47 = vrot.slane %v3092_v30, 4  ;;  %v3375_v6 = vld [vmem:[#allocation2 + $0x44] sm:$0x1] }
 0x321   : > { %v3117_v7 = vrot.slane %v3115_v41, 7  ;;  %3380 = vst [vmem:[#allocation2 + $0x48] sm:$0xf] %v3379_v32  ;;  %vm2730_vm15 = vcmp.gt.f32.partialorder %v2698_v5, 0.0  ;;  %v2762_v49 = vmul.f32 0.1, %v2698_v5  ;;  %v2657_v54 = vmul.f32 %v9626_v42, %v9695_v38 }
 0x322   : > { %v2789_v48 = vsel %vm2725_vm14, %v2693_v29, %v2757_v61  ;;  %v3372_v58 = vsel %vm9652_vm2, %v3095_v43, %v3371_v63  ;;  %v9729_v11 = vpop.f32.mrb[20].mxu0  ;;  %v2660_v14 = vmul.f32 %v9697_v13, %v9626_v42  ;;  %v2658_v59 = vmul.f32 %v9626_v42, %v9699_v44 }
 0x323   : > { %v3120_v22 = vor.u32 %v3118_v15, %v3117_v7  ;;  %v3122_v24 = vrot.slane %v3117_v7, 4  ;;  %v7099_v3 = vpack.c.bf16 %v2789_v48, %v2789_v48  ;;  %3373 = vst [vmem:[#allocation2 + $0x3c] sm:$0xf] %v3372_v58  ;;  %v2794_v34 = vsel %vm2730_vm15, %v2698_v5, %v2762_v49  ;;  %v9736_v55 = vpop.f32.mrb[21].mxu0  ;;  %v3385_v7 = vld [vmem:[#allocation2 + $0x54] sm:$0xf] }
 0x324   : > { %v2696_v50 = vadd.f32 %v9631_v18, %v2657_v54  ;;  %v9742_v12 = vpop.f32.mrb[22].mxu0  ;;  %v7104_v1 = vpack.c.bf16 %v2794_v34, %v2794_v34  ;;  %v2699_v44 = vadd.f32 %v9631_v18, %v2660_v14  ;;  %v2697_v39 = vadd.f32 %v9631_v18, %v2658_v59  ;;  %v9772_v34 = vld [vmem:[#allocation2 + $0xc] sm:$0xf] }
 0x325   : > { %v3121_v38 = vsel %vm9658_vm7, %v3113_v60, %v3120_v22  ;;  %v3383_v33 = vsel %vm9528_vm5, %v3122_v24, %v3382_v37  ;;  %v3098_v10 = vshrl.u32 %v7099_v3, 16  ;;  %v3101_v45 = vshll.u32 %v7099_v3, 16  ;;  %v9746_v29 = vpop.f32.mrb[23].mxu0 }
 0x326   : > { %3381 = vst.msk [vmem:[#allocation2 + $0x4c] sm:$0xf] %vm2812_vm8, %v3121_v38  ;;  %3384 = vst [vmem:[#allocation2 + $0x50] sm:$0x1] %v3383_v33  ;;  %vm2728_vm1 = vcmp.gt.f32.partialorder %v2696_v50, 0.0  ;;  %v2663_v46 = vmul.f32 %v9706_v53, %v9626_v42  ;;  %v2661_v51 = vmul.f32 %v9626_v42, %v2543_v35  ;;  %v3141_v2 = vshrl.u32 %v7104_v1, 16 }
 0x327   : > { %v2760_v13 = vmul.f32 0.1, %v2696_v50  ;;  %v3100_v16 = vrot.slane %v3098_v10, 7  ;;  %v3144_v23 = vshll.u32 %v7104_v1, 16  ;;  %vm2731_vm3 = vcmp.gt.f32.partialorder %v2699_v44, 0.0 }
 0x328   : > { %v2763_v0 = vmul.f32 0.1, %v2699_v44  ;;  %v3143_v4 = vrot.slane %v3141_v2, 7  ;;  %vm2729_vm4 = vcmp.gt.f32.partialorder %v2697_v39, 0.0  ;;  %v2761_v26 = vmul.f32 0.1, %v2697_v39 }
 0x329   : > { %v2792_v28 = vsel %vm2728_vm1, %v2696_v50, %v2760_v13  ;;  %v3103_v19 = vor.u32 %v3101_v45, %v3100_v16  ;;  %v3105_v40 = vrot.slane %v3100_v16, 4  ;;  %v2702_v31 = vadd.f32 %v9631_v18, %v2663_v46  ;;  %v3392_v35 = vld [vmem:[#allocation2 + $0x60] sm:$0xf]  ;;  %v3396_v45 = vld [vmem:[#allocation2 + $0x68] sm:$0x1] }
 0x32a   : > { %v7102_v62 = vpack.c.bf16 %v2792_v28, %v2792_v28  ;;  %v9757_v25 = vpop.f32.mrb[24].mxu0  ;;  %v3146_v60 = vor.u32 %v3144_v23, %v3143_v4  ;;  %v3147_v30 = vrot.slane %v3143_v4, 4  ;;  %v2795_v41 = vsel %vm2731_vm3, %v2699_v44, %v2763_v0 }
 0x32b   : > { %v3104_v52 = vsel %vm9658_vm7, %v3096_v47, %v3103_v19  ;;  %v3376_v53 = vsel %vm9528_vm5, %v3105_v40, %v3375_v6  ;;  %v2793_v63 = vsel %vm2729_vm4, %v2697_v39, %v2761_v26  ;;  %v9761_v15 = vpop.f32.mrb[25].mxu0  ;;  %v7105_v5 = vpack.c.bf16 %v2795_v41, %v2795_v41 }
 0x32c   : > { %v3124_v56 = vshrl.u32 %v7102_v62, 16  ;;  %v3127_v57 = vshll.u32 %v7102_v62, 16  ;;  %3374 = vst.msk [vmem:[#allocation2 + $0x40] sm:$0xf] %vm2812_vm8, %v3104_v52  ;;  %3377 = vst [vmem:[#allocation2 + $0x44] sm:$0x1] %v3376_v53  ;;  %v7103_v32 = vpack.c.bf16 %v2793_v63, %v2793_v63  ;;  %v3393_v47 = vsel %vm9652_vm2, %v3146_v60, %v3392_v35 }
 0x32d   : > { %vm2734_vm6 = vcmp.gt.f32.partialorder %v2702_v31, 0.0  ;;  %v9763_v43 = vpop.f32.mrb[26].mxu0  ;;  %v2766_v37 = vmul.f32 0.1, %v2702_v31  ;;  %v2700_v48 = vadd.f32 %v9631_v18, %v2661_v51  ;;  %v2664_v49 = vmul.f32 %v9708_v17, %v9626_v42  ;;  %3394 = vst [vmem:[#allocation2 + $0x60] sm:$0xf] %v3393_v47 }
 0x32e   : > { %v3126_v61 = vrot.slane %v3124_v56, 7  ;;  %v9770_v54 = vpop.f32.mrb[27].mxu0  ;;  %v3149_v24 = vshrl.u32 %v7105_v5, 16  ;;  %v3152_v3 = vshll.u32 %v7105_v5, 16  ;;  %v3132_v50 = vshrl.u32 %v7103_v32, 16 }
 0x32f   : > { %v3135_v14 = vshll.u32 %v7103_v32, 16  ;;  %v2798_v59 = vsel %vm2734_vm6, %v2702_v31, %v2766_v37  ;;  %vm2732_vm9 = vcmp.gt.f32.partialorder %v2700_v48, 0.0  ;;  %v2764_v17 = vmul.f32 0.1, %v2700_v48  ;;  %v3389_v51 = vld [vmem:[#allocation2 + $0x5c] sm:$0x1] }
 0x330   : > { %v3129_v58 = vor.u32 %v3127_v57, %v3126_v61  ;;  %v3130_v22 = vrot.slane %v3126_v61, 4  ;;  %v3151_v33 = vrot.slane %v3149_v24, 7  ;;  %v7108_v10 = vpack.c.bf16 %v2798_v59, %v2798_v59  ;;  %v3406_v35 = vld [vmem:[#allocation2 + $0x78] sm:$0xf]  ;;  %v3459_v61 = vld [vmem:[#allocation2 + $0x10] sm:$0xf] }
 0x331   : > { %v3134_v1 = vrot.slane %v3132_v50, 7  ;;  %v2703_v13 = vadd.f32 %v9631_v18, %v2664_v49  ;;  %v2662_v44 = vmul.f32 %v9626_v42, %v9718_v21  ;;  %v3541_v16 = vshrl.u32 %v9772_v34, 16  ;;  %v3460_v5 = vld [vmem:[#allocation2 + $0x14] sm:$0x1] }
 0x332   : > { %v3386_v38 = vsel %vm9652_vm2, %v3129_v58, %v3385_v7  ;;  %v3154_v39 = vor.u32 %v3152_v3, %v3151_v33  ;;  %v3156_v46 = vrot.slane %v3151_v33, 4  ;;  %v3175_v6 = vshrl.u32 %v7108_v10, 16  ;;  %v9781_v23 = vpop.f32.mrb[28].mxu0 }
 0x333   : > { %3387 = vst [vmem:[#allocation2 + $0x54] sm:$0xf] %v3386_v38  ;;  %v3178_v2 = vshll.u32 %v7108_v10, 16  ;;  %v3137_v28 = vor.u32 %v3135_v14, %v3134_v1  ;;  %v3139_v19 = vrot.slane %v3134_v1, 4  ;;  %v2796_v40 = vsel %vm2732_vm9, %v2700_v48, %v2764_v17  ;;  %v9784_v62 = vpop.f32.mrb[29].mxu0 }
 0x334   : > { %vm2735_vm10 = vcmp.gt.f32.partialorder %v2703_v13, 0.0  ;;  %v3155_v0 = vsel %vm9658_vm7, %v3147_v30, %v3154_v39  ;;  %v3397_v21 = vsel %vm9528_vm5, %v3156_v46, %v3396_v45  ;;  %v3177_v4 = vrot.slane %v3175_v6, 7  ;;  %v9790_v31 = vpop.f32.mrb[30].mxu0  ;;  %v3410_v46 = vld [vmem:[#allocation2 + $0x80] sm:$0x1] }
 0x335   : > { %v7106_v26 = vpack.c.bf16 %v2796_v40, %v2796_v40  ;;  %3395 = vst.msk [vmem:[#allocation2 + $0x64] sm:$0xf] %vm2812_vm8, %v3155_v0  ;;  %3398 = vst [vmem:[#allocation2 + $0x68] sm:$0x1] %v3397_v21  ;;  %v3138_v52 = vsel %vm9658_vm7, %v3130_v22, %v3137_v28  ;;  %v3390_v53 = vsel %vm9528_vm5, %v3139_v19, %v3389_v51  ;;  %v2767_v56 = vmul.f32 0.1, %v2703_v13 }
 0x336   : > { %v2701_v57 = vadd.f32 %v9631_v18, %v2662_v44  ;;  %v9798_v60 = vpop.f32.mrb[31].mxu0  ;;  %3388 = vst.msk [vmem:[#allocation2 + $0x58] sm:$0xf] %vm2812_vm8, %v3138_v52  ;;  %3391 = vst [vmem:[#allocation2 + $0x5c] sm:$0x1] %v3390_v53  ;;  %v3180_v30 = vor.u32 %v3178_v2, %v3177_v4  ;;  %v3543_v7 = vrot.slane %v3541_v16, 4  ;;  %v2667_v21 = vmul.f32 %v9729_v11, %v9626_v42 }
 0x337   : > { %v3158_v41 = vshrl.u32 %v7106_v26, 16  ;;  %v3161_v63 = vshll.u32 %v7106_v26, 16  ;;  %v2799_v32 = vsel %vm2735_vm10, %v2703_v13, %v2767_v56  ;;  %v3544_v58 = vshll.u32 %v9772_v34, 16  ;;  %v3399_v22 = vld [vmem:[#allocation2 + $0x6c] sm:$0xf] }
 0x338   : > { %vm2733_vm12 = vcmp.gt.f32.partialorder %v2701_v57, 0.0  ;;  %v2765_v47 = vmul.f32 0.1, %v2701_v57  ;;  %v3407_v37 = vsel %vm9652_vm2, %v3180_v30, %v3406_v35  ;;  %v7109_v49 = vpack.c.bf16 %v2799_v32, %v2799_v32  ;;  %v3461_v34 = vld [vmem:[#allocation2 + $0x18] sm:$0xf] }
 0x339   : > { %v3160_v48 = vrot.slane %v3158_v41, 7  ;;  %3408 = vst [vmem:[#allocation2 + $0x78] sm:$0xf] %v3407_v37  ;;  %v3550_v3 = vshll.u32 %v3459_v61, 16  ;;  %v3554_v50 = vshrl.u32 %v3459_v61, 16  ;;  %v3560_v14 = vshll.u32 %v3460_v5, 16 }
 0x33a   : > { %v2797_v24 = vsel %vm2733_vm12, %v2701_v57, %v2765_v47  ;;  %v3181_v59 = vrot.slane %v3177_v4, 4  ;;  %v3183_v33 = vshrl.u32 %v7109_v49, 16  ;;  %v3546_v17 = vrot.slane %v3544_v58, 5  ;;  %v3403_v57 = vld [vmem:[#allocation2 + $0x74] sm:$0x1] }
 0x33b   : > { %v3163_v38 = vor.u32 %v3161_v63, %v3160_v48  ;;  %v7107_v10 = vpack.c.bf16 %v2797_v24, %v2797_v24  ;;  %v3552_v45 = vrot.slane %v3550_v3, 5  ;;  %v3556_v1 = vrot.slane %v3554_v50, 4  ;;  %v9814_v41 = vld [vmem:[#allocation2 + $0x1c] sm:$0xf]  ;;  %v3463_v47 = vld [vmem:[#allocation2 + $0x20] sm:$0x1] }
 0x33c   : > { %v3164_v13 = vrot.slane %v3160_v48, 4  ;;  %v3185_v16 = vrot.slane %v3183_v33, 7  ;;  %v3186_v39 = vshll.u32 %v7109_v49, 16  ;;  %v3547_v6 = vor.u32 %v3546_v17, %v3543_v7  ;;  %v8671_v49 = vld [vmem:[%s10942_s4 + $0x8] sm:$0xff]  }
 0x33d   : > { %v3400_v44 = vsel %vm9652_vm2, %v3163_v38, %v3399_v22  ;;  %v3166_v51 = vshrl.u32 %v7107_v10, 16  ;;  %v3557_v2 = vor.u32 %v3556_v1, %v3552_v45  ;;  %v3562_v28 = vrot.slane %v3560_v14, 5 }
 0x33e   : > { %3401 = vst [vmem:[#allocation2 + $0x6c] sm:$0xf] %v3400_v44  ;;  %v3188_v19 = vor.u32 %v3186_v39, %v3185_v16  ;;  %v3190_v40 = vrot.slane %v3185_v16, 4  ;;  %v3169_v0 = vshll.u32 %v7107_v10, 16  ;;  %v3548_v26 = vrot.slane %v3547_v6, 4 }
 0x33f   : > { %v3168_v4 = vrot.slane %v3166_v51, 7  ;;  %v3558_v52 = vrot.slane %v3557_v2, 4  ;;  %v3565_v53 = vshrl.u32 %v3461_v34, 16  ;;  %v2706_v30 = vadd.f32 %v9631_v18, %v2667_v21 }
 0x340   : > { %v3189_v35 = vsel %vm9658_vm7, %v3181_v59, %v3188_v19  ;;  %v3411_v56 = vsel %vm9528_vm5, %v3190_v40, %v3410_v46  ;;  %v3568_v63 = vshll.u32 %v3461_v34, 16  ;;  %v3553_v5 = vsel %vm9584_vm11, %v3548_v26, %v3552_v45  ;;  %v9852_v19 = vld [vmem:[#allocation2 + $0x24] sm:$0xf]  ;;  %v3420_v40 = vld [vmem:[#allocation2 + $0x90] sm:$0xf] }
 0x341   : > { %3409 = vst.msk [vmem:[#allocation2 + $0x7c] sm:$0xf] %vm2812_vm8, %v3189_v35  ;;  %3412 = vst [vmem:[#allocation2 + $0x80] sm:$0x1] %v3411_v56  ;;  %v3171_v11 = vor.u32 %v3169_v0, %v3168_v4  ;;  %v3173_v61 = vrot.slane %v3168_v4, 4  ;;  %v3563_v32 = vsel %vm9584_vm11, %v3558_v52, %v3562_v28  ;;  %vm2738_vm13 = vcmp.gt.f32.partialorder %v2706_v30, 0.0 }
 0x342   : > { %v9821_v7 = vcombine.low %v3553_v5, %v3563_v32  ;;  %v2770_v37 = vmul.f32 0.1, %v2706_v30  ;;  %v3567_v48 = vrot.slane %v3565_v53, 4  ;;  %v3570_v24 = vrot.slane %v3568_v63, 5  ;;  %v9857_v63 = vld [vmem:[#allocation2 + $0x28] sm:$0xf] }
 0x343   : > { %v3172_v58 = vsel %vm9658_vm7, %v3164_v13, %v3171_v11  ;;  %v3404_v22 = vsel %vm9528_vm5, %v3173_v61, %v3403_v57  ;;  %v3574_v3 = vshll.u32 %v9814_v41, 16  ;;  %v3578_v14 = vshrl.u32 %v9814_v41, 16 }
 0x344   : > { %10990 = vst [vmem:[#allocation7_spill] sm:$0xff] %v9821_v7  ;;  %3402 = vst.msk [vmem:[#allocation2 + $0x70] sm:$0xf] %vm2812_vm8, %v3172_v58  ;;  %7776 = vmatmul.mubr.msk.bf16.vlgmr.msra.gmra.mrb[0].mxu1 %vm581_vm0, %v9821_v7  ;;  %v2802_v50 = vsel %vm2738_vm13, %v2706_v30, %v2770_v37  ;;  %v3584_v59 = vshll.u32 %v3463_v47, 16  ;;  %v2665_v38 = vmul.f32 %v9626_v42, %v9736_v55  ;;  %v9846_v55 = vld [vmem:[%s10942_s4 + $0x20] sm:$0xff]   ;;  %v3589_v11 = vshrl.u32 %v9852_v19, 16 }
 0x345   : > { %3405 = vst [vmem:[#allocation2 + $0x74] sm:$0x1] %v3404_v22  ;;  %7808 = vmatpush3.bf16.msra.mxu1 %v9602_v9  ;;  %v7112_v33 = vpack.c.bf16 %v2802_v50, %v2802_v50  ;;  %v3571_v10 = vor.u32 %v3570_v24, %v3567_v48  ;;  %v3576_v17 = vrot.slane %v3574_v3, 5  ;;  %v2668_v45 = vmul.f32 %v9742_v12, %v9626_v42  ;;  %v3466_v37 = vld [vmem:[#allocation2 + $0x2c] sm:$0x1] }
 0x346   : > { %v3580_v1 = vrot.slane %v3578_v14, 4  ;;  %v3586_v13 = vrot.slane %v3584_v59, 5  ;;  %v2704_v44 = vadd.f32 %v9631_v18, %v2665_v38  ;;  %v2666_v16 = vmul.f32 %v9626_v42, %v9746_v29  ;;  %7809 = vmatprep.subr.bf16.mxu1 %v8671_v49  ;;  %v3413_v59 = vld [vmem:[#allocation2 + $0x84] sm:$0xf] }
 0x347   : > { %v3209_v9 = vshrl.u32 %v7112_v33, 16  ;;  %v3212_v39 = vshll.u32 %v7112_v33, 16  ;;  %v3572_v34 = vrot.slane %v3571_v10, 4  ;;  %v2707_v46 = vadd.f32 %v9631_v18, %v2668_v45 }
 0x348   : > { %v3581_v51 = vor.u32 %v3580_v1, %v3576_v17  ;;  %vm2736_vm14 = vcmp.gt.f32.partialorder %v2704_v44, 0.0  ;;  %v2768_v12 = vmul.f32 0.1, %v2704_v44  ;;  %v2705_v6 = vadd.f32 %v9631_v18, %v2666_v16 }
 0x349   : > { %v3211_v2 = vrot.slane %v3209_v9, 7  ;;  %v3577_v29 = vsel %vm9584_vm11, %v3572_v34, %v3576_v17  ;;  %vm2739_vm15 = vcmp.gt.f32.partialorder %v2707_v46, 0.0  ;;  %v2771_v28 = vmul.f32 0.1, %v2707_v46  ;;  %7810 = vmatpush3.bf16.msra.mxu1 %v8671_v49 }
 0x34a   : > { %v3582_v0 = vrot.slane %v3581_v51, 4  ;;  %v2800_v21 = vsel %vm2736_vm14, %v2704_v44, %v2768_v12  ;;  %vm2737_vm1 = vcmp.gt.f32.partialorder %v2705_v6, 0.0  ;;  %v2769_v4 = vmul.f32 0.1, %v2705_v6  ;;  %7843 = vmatprep.subr.bf16.mxu1 %v9846_v55  ;;  %v9869_v51 = vld [vmem:[#allocation2 + $0x30] sm:$0xf] }
 0x34b   : > { %v3214_v26 = vor.u32 %v3212_v39, %v3211_v2  ;;  %v3215_v52 = vrot.slane %v3211_v2, 4  ;;  %v7110_v53 = vpack.c.bf16 %v2800_v21, %v2800_v21  ;;  %v2803_v35 = vsel %vm2739_vm15, %v2707_v46, %v2771_v28  ;;  %v10010_v8 = vld [vmem:[#allocation2 + $0x70] sm:$0xf] }
 0x34c   : > { %v3587_v56 = vsel %vm9584_vm11, %v3582_v0, %v3586_v13  ;;  %v7113_v57 = vpack.c.bf16 %v2803_v35, %v2803_v35  ;;  %v2801_v30 = vsel %vm2737_vm1, %v2705_v6, %v2769_v4  ;;  %v3591_v22 = vrot.slane %v3589_v11, 4  ;;  %v3424_v13 = vld [vmem:[#allocation2 + $0x98] sm:$0x1]  ;;  %v3417_v6 = vld [vmem:[#allocation2 + $0x8c] sm:$0x1] }
 0x34d   : > { %v3421_v61 = vsel %vm9652_vm2, %v3214_v26, %v3420_v40  ;;  %v9862_v5 = vcombine.low %v3577_v29, %v3587_v56  ;;  %v3192_v32 = vshrl.u32 %v7110_v53, 16  ;;  %v3195_v47 = vshll.u32 %v7110_v53, 16  ;;  %v9875_v40 = vld [vmem:[#allocation2 + $0x34] sm:$0xf] }
 0x34e   : > { %3422 = vst [vmem:[#allocation2 + $0x90] sm:$0xf] %v3421_v61  ;;  %v3217_v48 = vshrl.u32 %v7113_v57, 16  ;;  %v3220_v49 = vshll.u32 %v7113_v57, 16  ;;  %v7111_v58 = vpack.c.bf16 %v2801_v30, %v2801_v30  ;;  %v3592_v3 = vshll.u32 %v9852_v19, 16 }
 0x34f   : > { %10991 = vst [vmem:[#allocation8_spill] sm:$0xff] %v9862_v5  ;;  %7779 = vmatprep.mubr.msk.bf16.mxu1 %vm581_vm0, %v9862_v5  ;;  %v3194_v24 = vrot.slane %v3192_v32, 7  ;;  %v3598_v50 = vshll.u32 %v9857_v63, 16  ;;  %v3602_v14 = vshrl.u32 %v9857_v63, 16  ;;  %v3608_v17 = vshll.u32 %v3466_v37, 16 }
 0x350   : > { %v3219_v38 = vrot.slane %v3217_v48, 7  ;;  %v3200_v33 = vshrl.u32 %v7111_v58, 16  ;;  %v3203_v10 = vshll.u32 %v7111_v58, 16  ;;  %v3594_v44 = vrot.slane %v3592_v3, 5  ;;  %v3469_v30 = vld [vmem:[#allocation2 + $0x38] sm:$0x1] }
 0x351   : > { %v3197_v45 = vor.u32 %v3195_v47, %v3194_v24  ;;  %v3198_v1 = vrot.slane %v3194_v24, 4  ;;  %v3600_v16 = vrot.slane %v3598_v50, 5  ;;  %v3604_v46 = vrot.slane %v3602_v14, 4 }
 0x352   : > { %v3222_v9 = vor.u32 %v3220_v49, %v3219_v38  ;;  %v3224_v39 = vrot.slane %v3219_v38, 4  ;;  %v3202_v34 = vrot.slane %v3200_v33, 7  ;;  %v3595_v2 = vor.u32 %v3594_v44, %v3591_v22  ;;  %v9905_v44 = vld [vmem:[#allocation2 + $0x3c] sm:$0xf] }
 0x353   : > { %v3414_v12 = vsel %vm9652_vm2, %v3197_v45, %v3413_v59  ;;  %v3610_v29 = vrot.slane %v3608_v17, 5  ;;  %v2671_v28 = vmul.f32 %v9757_v25, %v9626_v42  ;;  %v3605_v35 = vor.u32 %v3604_v46, %v3600_v16 }
 0x354   : > { %3415 = vst [vmem:[#allocation2 + $0x84] sm:$0xf] %v3414_v12  ;;  %v3223_v0 = vsel %vm9658_vm7, %v3215_v52, %v3222_v9  ;;  %v3425_v21 = vsel %vm9528_vm5, %v3224_v39, %v3424_v13  ;;  %v3205_v4 = vor.u32 %v3203_v10, %v3202_v34  ;;  %v3207_v26 = vrot.slane %v3202_v34, 4 }
 0x355   : > { %3423 = vst.msk [vmem:[#allocation2 + $0x94] sm:$0xf] %vm2812_vm8, %v3223_v0  ;;  %3426 = vst [vmem:[#allocation2 + $0x98] sm:$0x1] %v3425_v21  ;;  %v3596_v53 = vrot.slane %v3595_v2, 4  ;;  %v2710_v56 = vadd.f32 %v9631_v18, %v2671_v28  ;;  %v3613_v25 = vshrl.u32 %v9869_v51, 16  ;;  %v2669_v14 = vmul.f32 %v9626_v42, %v9761_v15 }
 0x356   : > { %v3206_v57 = vsel %vm9658_vm7, %v3198_v1, %v3205_v4  ;;  %v3418_v52 = vsel %vm9528_vm5, %v3207_v26, %v3417_v6  ;;  %v3616_v11 = vshll.u32 %v9869_v51, 16  ;;  %v3622_v61 = vshll.u32 %v9875_v40, 16  ;;  %v3434_v2 = vld [vmem:[#allocation2 + $0xa8] sm:$0xf] }
 0x357   : > { %3416 = vst.msk [vmem:[#allocation2 + $0x88] sm:$0xf] %vm2812_vm8, %v3206_v57  ;;  %3419 = vst [vmem:[#allocation2 + $0x8c] sm:$0x1] %v3418_v52  ;;  %v3601_v32 = vsel %vm9584_vm11, %v3596_v53, %v3600_v16  ;;  %v3606_v47 = vrot.slane %v3605_v35, 4  ;;  %vm2742_vm3 = vcmp.gt.f32.partialorder %v2710_v56, 0.0  ;;  %v2708_v45 = vadd.f32 %v9631_v18, %v2669_v14 }
 0x358   : > { %v2774_v37 = vmul.f32 0.1, %v2710_v56  ;;  %v3615_v48 = vrot.slane %v3613_v25, 4  ;;  %v3618_v49 = vrot.slane %v3616_v11, 5  ;;  %v3624_v58 = vrot.slane %v3622_v61, 5 }
 0x359   : > { %v3626_v22 = vshrl.u32 %v9875_v40, 16  ;;  %v3611_v24 = vsel %vm9584_vm11, %v3606_v47, %v3610_v29  ;;  %v3632_v50 = vshll.u32 %v3469_v30, 16  ;;  %v2672_v1 = vmul.f32 %v9763_v43, %v9626_v42  ;;  %v9916_v53 = vld [vmem:[#allocation2 + $0x40] sm:$0xf]  ;;  %v9922_v61 = vld [vmem:[#allocation2 + $0x44] sm:$0x1] }
 0x35a   : > { %v2806_v3 = vsel %vm2742_vm3, %v2710_v56, %v2774_v37  ;;  %v9898_v59 = vcombine.low %v3601_v32, %v3611_v24  ;;  %v3619_v33 = vor.u32 %v3618_v49, %v3615_v48  ;;  %v2670_v13 = vmul.f32 %v9626_v42, %v9770_v54 }
 0x35b   : > { %v7116_v38 = vpack.c.bf16 %v2806_v3, %v2806_v3  ;;  %v3628_v10 = vrot.slane %v3626_v22, 4  ;;  %v3634_v17 = vrot.slane %v3632_v50, 5  ;;  %vm2740_vm4 = vcmp.gt.f32.partialorder %v2708_v45, 0.0  ;;  %v3427_v3 = vld [vmem:[#allocation2 + $0x9c] sm:$0xf] }
 0x35c   : > { %10992 = vst [vmem:[#allocation9_spill] sm:$0xff] %v9898_v59  ;;  %7780 = vmatmul.mubr.msk.bf16.gmra.mrb[4].mxu1 %vm581_vm0, %v9898_v59  ;;  %v3620_v9 = vrot.slane %v3619_v33, 4  ;;  %v2772_v34 = vmul.f32 0.1, %v2708_v45  ;;  %v2711_v46 = vadd.f32 %v9631_v18, %v2672_v1  ;;  %v2709_v12 = vadd.f32 %v9631_v18, %v2670_v13  ;;  %v9931_v13 = vld [vmem:[#allocation2 + $0x48] sm:$0xf] }
 0x35d   : > { %v3243_v15 = vshrl.u32 %v7116_v38, 16  ;;  %v3246_v16 = vshll.u32 %v7116_v38, 16  ;;  %v3629_v39 = vor.u32 %v3628_v10, %v3624_v58  ;;  %v3637_v54 = vshrl.u32 %v9905_v44, 16 }
 0x35e   : > { %v3625_v43 = vsel %vm9584_vm11, %v3620_v9, %v3624_v58  ;;  %v2804_v29 = vsel %vm2740_vm4, %v2708_v45, %v2772_v34  ;;  %vm2743_vm6 = vcmp.gt.f32.partialorder %v2711_v46, 0.0  ;;  %v2775_v28 = vmul.f32 0.1, %v2711_v46 }
 0x35f   : > { %v3245_v6 = vrot.slane %v3243_v15, 7  ;;  %v3630_v42 = vrot.slane %v3629_v39, 4  ;;  %vm2741_vm9 = vcmp.gt.f32.partialorder %v2709_v12, 0.0  ;;  %v7114_v26 = vpack.c.bf16 %v2804_v29, %v2804_v29  ;;  %v3438_v15 = vld [vmem:[#allocation2 + $0xb0] sm:$0x1] }
 0x360   : > { %v2807_v35 = vsel %vm2743_vm6, %v2711_v46, %v2775_v28  ;;  %v2773_v56 = vmul.f32 0.1, %v2709_v12  ;;  %v3639_v25 = vrot.slane %v3637_v54, 4  ;;  %v3640_v47 = vshll.u32 %v9905_v44, 16  ;;  %v8697_v29 = vld [vmem:[%s10940_s2] ss:$0 sm:$0xff] }
 0x361   : > { %v3248_v0 = vor.u32 %v3246_v16, %v3245_v6  ;;  %v3249_v21 = vrot.slane %v3245_v6, 4  ;;  %v3635_v4 = vsel %vm9584_vm11, %v3630_v42, %v3634_v17  ;;  %v3226_v52 = vshrl.u32 %v7114_v26, 16  ;;  %v3431_v42 = vld [vmem:[#allocation2 + $0xa4] sm:$0x1] }
 0x362   : > { %v9918_v18 = vcombine.low %v3625_v43, %v3635_v4  ;;  %v3229_v30 = vshll.u32 %v7114_v26, 16  ;;  %v7117_v11 = vpack.c.bf16 %v2807_v35, %v2807_v35  ;;  %v2805_v32 = vsel %vm2741_vm9, %v2709_v12, %v2773_v56 }
 0x363   : > { %v3435_v57 = vsel %vm9652_vm2, %v3248_v0, %v3434_v2  ;;  %v3646_v37 = vshll.u32 %v9916_v53, 16  ;;  %v3650_v48 = vshrl.u32 %v9916_v53, 16  ;;  %v3228_v49 = vrot.slane %v3226_v52, 7 }
 0x364   : > { %10993 = vst [vmem:[#allocation10_spill] sm:$0xff] %v9918_v18  ;;  %3436 = vst [vmem:[#allocation2 + $0xa8] sm:$0xf] %v3435_v57  ;;  %7783 = vmatprep.mubr.msk.bf16.mxu1 %vm581_vm0, %v9918_v18  ;;  %v3251_v58 = vshrl.u32 %v7117_v11, 16  ;;  %v3254_v22 = vshll.u32 %v7117_v11, 16  ;;  %v7115_v24 = vpack.c.bf16 %v2805_v32, %v2805_v32  ;;  %v3642_v50 = vrot.slane %v3640_v47, 5 }
 0x365   : > { %v3648_v14 = vrot.slane %v3646_v37, 5  ;;  %v3652_v38 = vrot.slane %v3650_v48, 4  ;;  %v3656_v33 = vshll.u32 %v9922_v61, 16  ;;  %v3231_v10 = vor.u32 %v3229_v30, %v3228_v49  ;;  %v9954_v30 = vld [vmem:[#allocation2 + $0x50] sm:$0x1] }
 0x366   : > { %v3232_v17 = vrot.slane %v3228_v49, 4  ;;  %v3253_v45 = vrot.slane %v3251_v58, 7  ;;  %v3234_v1 = vshrl.u32 %v7115_v24, 16  ;;  %v3237_v16 = vshll.u32 %v7115_v24, 16 }
 0x367   : > { %v3643_v9 = vor.u32 %v3642_v50, %v3639_v25  ;;  %v3653_v39 = vor.u32 %v3652_v38, %v3648_v14  ;;  %v3658_v34 = vrot.slane %v3656_v33, 5  ;;  %v3428_v46 = vsel %vm9652_vm2, %v3231_v10, %v3427_v3  ;;  %v9944_v25 = vld [vmem:[#allocation2 + $0x4c] sm:$0xf]  ;;  %v9971_v38 = vld [vmem:[#allocation2 + $0x54] sm:$0xf] }
 0x368   : > { %v3256_v12 = vor.u32 %v3254_v22, %v3253_v45  ;;  %v3258_v6 = vrot.slane %v3253_v45, 4  ;;  %v3236_v43 = vrot.slane %v3234_v1, 7  ;;  %3429 = vst [vmem:[#allocation2 + $0x9c] sm:$0xf] %v3428_v46  ;;  %v2675_v28 = vmul.f32 %v8697_v29, %v9781_v23 }
 0x369   : > { %v3644_v54 = vrot.slane %v3643_v9, 4  ;;  %v3654_v2 = vrot.slane %v3653_v39, 4  ;;  %v3661_v0 = vshrl.u32 %v9931_v13, 16  ;;  %v3664_v48 = vshll.u32 %v9931_v13, 16 }
 0x36a   : > { %v3257_v4 = vsel %vm9658_vm7, %v3249_v21, %v3256_v12  ;;  %v3439_v26 = vsel %vm9528_vm5, %v3258_v6, %v3438_v15  ;;  %v3239_v35 = vor.u32 %v3237_v16, %v3236_v43  ;;  %v3241_v56 = vrot.slane %v3236_v43, 4  ;;  %v8698_v21 = vld [vmem:[%s10941_s3] ss:$0 sm:$0xff] }
 0x36b   : > { %3437 = vst.msk [vmem:[#allocation2 + $0xac] sm:$0xf] %vm2812_vm8, %v3257_v4  ;;  %3440 = vst [vmem:[#allocation2 + $0xb0] sm:$0x1] %v3439_v26  ;;  %v3649_v57 = vsel %vm9584_vm11, %v3644_v54, %v3648_v14  ;;  %v3659_v23 = vsel %vm9584_vm11, %v3654_v2, %v3658_v34  ;;  %v2714_v52 = vadd.f32 %v8698_v21, %v2675_v28  ;;  %v3663_v11 = vrot.slane %v3661_v0, 4 }
 0x36c   : > { %v3240_v32 = vsel %vm9658_vm7, %v3232_v17, %v3239_v35  ;;  %v3432_v47 = vsel %vm9528_vm5, %v3241_v56, %v3431_v42  ;;  %v9960_v37 = vcombine.low %v3649_v57, %v3659_v23  ;;  %v3670_v58 = vshll.u32 %v9944_v25, 16  ;;  %v9977_v28 = vld [vmem:[#allocation2 + $0x58] sm:$0xf]  ;;  %v3448_v0 = vld [vmem:[#allocation2 + $0xc0] sm:$0xf] }
 0x36d   : > { %3430 = vst.msk [vmem:[#allocation2 + $0xa0] sm:$0xf] %vm2812_vm8, %v3240_v32  ;;  %3433 = vst [vmem:[#allocation2 + $0xa4] sm:$0x1] %v3432_v47  ;;  %vm2746_vm10 = vcmp.gt.f32.partialorder %v2714_v52, 0.0  ;;  %v3674_v22 = vshrl.u32 %v9944_v25, 16  ;;  %v2673_v50 = vmul.f32 %v8697_v29, %v9784_v62  ;;  %v2676_v14 = vmul.f32 %v8697_v29, %v9790_v31 }
 0x36e   : > { %10994 = vst [vmem:[#allocation11_spill] sm:$0xff] %v9960_v37  ;;  %v2778_v49 = vmul.f32 0.1, %v2714_v52  ;;  %7784 = vmatmul.mubr.msk.bf16.gmra.mrb[8].mxu1 %vm581_vm0, %v9960_v37  ;;  %v3666_v24 = vrot.slane %v3664_v48, 5  ;;  %v3680_v3 = vshll.u32 %v9954_v30, 16  ;;  %v3672_v10 = vrot.slane %v3670_v58, 5 }
 0x36f   : > { %v3676_v17 = vrot.slane %v3674_v22, 4  ;;  %v2674_v45 = vmul.f32 %v8697_v29, %v9798_v60  ;;  %v2712_v9 = vadd.f32 %v8698_v21, %v2673_v50  ;;  %v2715_v34 = vadd.f32 %v8698_v21, %v2676_v14  ;;  %v9991_v50 = vld [vmem:[#allocation2 + $0x60] sm:$0xf] }
 0x370   : > { %v2810_v33 = vsel %vm2746_vm10, %v2714_v52, %v2778_v49  ;;  %v3667_v15 = vor.u32 %v3666_v24, %v3663_v11  ;;  %v3682_v16 = vrot.slane %v3680_v3, 5  ;;  %v3685_v12 = vshrl.u32 %v9971_v38, 16  ;;  %v9989_v3 = vld [vmem:[#allocation2 + $0x5c] sm:$0x1] }
 0x371   : > { %v7120_v1 = vpack.c.bf16 %v2810_v33, %v2810_v33  ;;  %v3677_v39 = vor.u32 %v3676_v17, %v3672_v10  ;;  %v2713_v46 = vadd.f32 %v8698_v21, %v2674_v45  ;;  %vm2744_vm12 = vcmp.gt.f32.partialorder %v2712_v9, 0.0 }
 0x372   : > { %v3668_v43 = vrot.slane %v3667_v15, 4  ;;  %v2776_v42 = vmul.f32 0.1, %v2712_v9  ;;  %vm2747_vm13 = vcmp.gt.f32.partialorder %v2715_v34, 0.0  ;;  %v2779_v54 = vmul.f32 0.1, %v2715_v34 }
 0x373   : > { %v3277_v6 = vshrl.u32 %v7120_v1, 16  ;;  %v3280_v62 = vshll.u32 %v7120_v1, 16  ;;  %v3678_v31 = vrot.slane %v3677_v39, 4  ;;  %vm2745_vm14 = vcmp.gt.f32.partialorder %v2713_v46, 0.0  ;;  %v3441_v1 = vld [vmem:[#allocation2 + $0xb4] sm:$0xf] }
 0x374   : > { %v3673_v60 = vsel %vm9584_vm11, %v3668_v43, %v3672_v10  ;;  %v2777_v29 = vmul.f32 0.1, %v2713_v46  ;;  %v2808_v26 = vsel %vm2744_vm12, %v2712_v9, %v2776_v42  ;;  %v2811_v35 = vsel %vm2747_vm13, %v2715_v34, %v2779_v54  ;;  %v3452_v34 = vld [vmem:[#allocation2 + $0xc8] sm:$0x1]  ;;  %v3445_v42 = vld [vmem:[#allocation2 + $0xbc] sm:$0x1] }
 0x375   : > { %v3279_v2 = vrot.slane %v3277_v6, 7  ;;  %v3683_v4 = vsel %vm9584_vm11, %v3678_v31, %v3682_v16  ;;  %v3687_v56 = vrot.slane %v3685_v12, 4  ;;  %v7118_v52 = vpack.c.bf16 %v2808_v26, %v2808_v26 }
 0x376   : > { %v9981_v21 = vcombine.low %v3673_v60, %v3683_v4  ;;  %v7121_v11 = vpack.c.bf16 %v2811_v35, %v2811_v35  ;;  %v2809_v32 = vsel %vm2745_vm14, %v2713_v46, %v2777_v29  ;;  %v3688_v47 = vshll.u32 %v9971_v38, 16  ;;  %v9996_v4 = vld [vmem:[#allocation2 + $0x64] sm:$0xf] }
 0x377   : > { %v3282_v57 = vor.u32 %v3280_v62, %v3279_v2  ;;  %v3283_v23 = vrot.slane %v3279_v2, 4  ;;  %v3694_v48 = vshll.u32 %v9977_v28, 16  ;;  %v3260_v58 = vshrl.u32 %v7118_v52, 16 }
 0x378   : > { %10995 = vst [vmem:[#allocation12_spill] sm:$0xff] %v9981_v21  ;;  %7787 = vmatprep.mubr.msk.bf16.mxu1 %vm581_vm0, %v9981_v21  ;;  %v3263_v22 = vshll.u32 %v7118_v52, 16  ;;  %v7119_v24 = vpack.c.bf16 %v2809_v32, %v2809_v32  ;;  %v3285_v14 = vshrl.u32 %v7121_v11, 16  ;;  %v3288_v33 = vshll.u32 %v7121_v11, 16  ;;  %v10000_v52 = vld [vmem:[#allocation2 + $0x68] sm:$0x1] }
 0x379   : > { %v3449_v49 = vsel %vm9652_vm2, %v3282_v57, %v3448_v0  ;;  %v3690_v10 = vrot.slane %v3688_v47, 5  ;;  %v3696_v17 = vrot.slane %v3694_v48, 5  ;;  %v3262_v45 = vrot.slane %v3260_v58, 7  ;;  %v10002_v11 = vld [vmem:[#allocation2 + $0x6c] sm:$0xf] }
 0x37a   : > { %3450 = vst [vmem:[#allocation2 + $0xc0] sm:$0xf] %v3449_v49  ;;  %v3268_v15 = vshrl.u32 %v7119_v24, 16  ;;  %v3271_v16 = vshll.u32 %v7119_v24, 16  ;;  %v3698_v9 = vshrl.u32 %v9977_v28, 16  ;;  %v3287_v39 = vrot.slane %v3285_v14, 7 }
 0x37b   : > { %v3691_v46 = vor.u32 %v3690_v10, %v3687_v56  ;;  %v3704_v12 = vshll.u32 %v9989_v3, 16  ;;  %v3709_v6 = vshrl.u32 %v9991_v50, 16  ;;  %v3265_v62 = vor.u32 %v3263_v22, %v3262_v45 }
 0x37c   : > { %v3266_v43 = vrot.slane %v3262_v45, 4  ;;  %v3270_v31 = vrot.slane %v3268_v15, 7  ;;  %v3700_v54 = vrot.slane %v3698_v9, 4  ;;  %v3290_v2 = vor.u32 %v3288_v33, %v3287_v39  ;;  %v10023_v45 = vld [vmem:[#allocation2 + $0x78] sm:$0xf] }
 0x37d   : > { %v3292_v60 = vrot.slane %v3287_v39, 4  ;;  %v3692_v29 = vrot.slane %v3691_v46, 4  ;;  %v3706_v0 = vrot.slane %v3704_v12, 5  ;;  %v3442_v26 = vsel %vm9652_vm2, %v3265_v62, %v3441_v1  ;;  %v10027_v1 = vld [vmem:[#allocation2 + $0x74] sm:$0x1] }
 0x37e   : > { %v3273_v35 = vor.u32 %v3271_v16, %v3270_v31  ;;  %v3275_v56 = vrot.slane %v3270_v31, 4  ;;  %v3701_v57 = vor.u32 %v3700_v54, %v3696_v17  ;;  %3443 = vst [vmem:[#allocation2 + $0xb4] sm:$0xf] %v3442_v26  ;;  %v3291_v32 = vsel %vm9658_vm7, %v3283_v23, %v3290_v2  ;;  %v10033_v12 = vld [vmem:[#allocation2 + $0x7c] sm:$0xf] }
 0x37f   : > { %v3453_v47 = vsel %vm9528_vm5, %v3292_v60, %v3452_v34  ;;  %v3697_v48 = vsel %vm9584_vm11, %v3692_v29, %v3696_v17  ;;  %v3711_v49 = vrot.slane %v3709_v6, 4  ;;  %3451 = vst.msk [vmem:[#allocation2 + $0xc4] sm:$0xf] %vm2812_vm8, %v3291_v32  ;;  %v3712_v23 = vshll.u32 %v9991_v50, 16  ;;  %v10040_v26 = vld [vmem:[#allocation2 + $0x80] sm:$0x1] }
 0x380   : > { %3454 = vst [vmem:[#allocation2 + $0xc8] sm:$0x1] %v3453_v47  ;;  %v3274_v58 = vsel %vm9658_vm7, %v3266_v43, %v3273_v35  ;;  %v3446_v22 = vsel %vm9528_vm5, %v3275_v56, %v3445_v42  ;;  %v3702_v24 = vrot.slane %v3701_v57, 4  ;;  %v3718_v14 = vshll.u32 %v9996_v4, 16 }
 0x381   : > { %3444 = vst.msk [vmem:[#allocation2 + $0xb8] sm:$0xf] %vm2812_vm8, %v3274_v58  ;;  %3447 = vst [vmem:[#allocation2 + $0xbc] sm:$0x1] %v3446_v22  ;;  %v3722_v33 = vshrl.u32 %v9996_v4, 16  ;;  %v3728_v10 = vshll.u32 %v10000_v52, 16  ;;  %v10234_v27 = vcombine.low %v9852_v19, %v9857_v63 }
 0x382   : > { %v3733_v17 = vshrl.u32 %v10002_v11, 16  ;;  %v3707_v36 = vsel %vm9584_vm11, %v3702_v24, %v3706_v0  ;;  %v3714_v20 = vrot.slane %v3712_v23, 5  ;;  %v3736_v15 = vshll.u32 %v10002_v11, 16 }
 0x383   : > { %v3742_v16 = vshll.u32 %v10010_v8, 16  ;;  %v10031_v9 = vcombine.low %v3697_v48, %v3707_v36  ;;  %v3720_v39 = vrot.slane %v3718_v14, 5  ;;  %v3724_v34 = vrot.slane %v3722_v33, 4  ;;  %v10052_v36 = vld [vmem:[#allocation2 + $0x88] sm:$0xf] }
 0x384   : > { %v3730_v46 = vrot.slane %v3728_v10, 5  ;;  %v3715_v6 = vor.u32 %v3714_v20, %v3711_v49  ;;  %v3735_v62 = vrot.slane %v3733_v17, 4  ;;  %v3738_v43 = vrot.slane %v3736_v15, 5  ;;  %v10044_v49 = vld [vmem:[#allocation2 + $0x84] sm:$0xf] }
 0x385   : > { %10996 = vst [vmem:[#allocation13_spill] sm:$0xff] %v10031_v9  ;;  %v3744_v31 = vrot.slane %v3742_v16, 5  ;;  %7788 = vmatmul.mubr.msk.bf16.gmra.mrb[12].mxu1 %vm581_vm0, %v10031_v9  ;;  %v3725_v42 = vor.u32 %v3724_v34, %v3720_v39  ;;  %v3746_v54 = vshrl.u32 %v10010_v8, 16  ;;  %v3752_v2 = vshll.u32 %v10027_v1, 16 }
 0x386   : > { %v3757_v60 = vshrl.u32 %v10023_v45, 16  ;;  %v3716_v29 = vrot.slane %v3715_v6, 4  ;;  %v3739_v0 = vor.u32 %v3738_v43, %v3735_v62  ;;  %v3760_v35 = vshll.u32 %v10023_v45, 16 }
 0x387   : > { %v3766_v56 = vshll.u32 %v10033_v12, 16  ;;  %v3726_v57 = vrot.slane %v3725_v42, 4  ;;  %v3748_v32 = vrot.slane %v3746_v54, 4  ;;  %v3754_v47 = vrot.slane %v3752_v2, 5 }
 0x388   : > { %v3759_v48 = vrot.slane %v3757_v60, 4  ;;  %v3721_v58 = vsel %vm9584_vm11, %v3716_v29, %v3720_v39  ;;  %v3740_v22 = vrot.slane %v3739_v0, 4  ;;  %v3762_v24 = vrot.slane %v3760_v35, 5  ;;  %v10058_v39 = vld [vmem:[#allocation2 + $0x8c] sm:$0x1] }
 0x389   : > { %v3768_v23 = vrot.slane %v3766_v56, 5  ;;  %v3731_v14 = vsel %vm9584_vm11, %v3726_v57, %v3730_v46  ;;  %v3749_v33 = vor.u32 %v3748_v32, %v3744_v31  ;;  %v3770_v10 = vshrl.u32 %v10033_v12, 16  ;;  %v10071_v57 = vld [vmem:[#allocation2 + $0x94] sm:$0xf]  ;;  %v10126_v9 = vld [vmem:[#allocation2 + $0xb8] sm:$0xf] }
 0x38a   : > { %v3776_v17 = vshll.u32 %v10040_v26, 16  ;;  %v10054_v20 = vcombine.low %v3721_v58, %v3731_v14  ;;  %v3745_v15 = vsel %vm9584_vm11, %v3740_v22, %v3744_v31  ;;  %v3763_v16 = vor.u32 %v3762_v24, %v3759_v48  ;;  %v10066_v31 = vld [vmem:[#allocation2 + $0x90] sm:$0xf]  ;;  %v10077_v24 = vld [vmem:[#allocation2 + $0x98] sm:$0x1] }
 0x38b   : > { %v3781_v34 = vshrl.u32 %v10044_v49, 16  ;;  %v3750_v6 = vrot.slane %v3749_v33, 4  ;;  %v3772_v62 = vrot.slane %v3770_v10, 4  ;;  %v3784_v43 = vshll.u32 %v10044_v49, 16 }
 0x38c   : > { %10997 = vst [vmem:[#allocation14_spill] sm:$0xff] %v10054_v20  ;;  %v3778_v46 = vrot.slane %v3776_v17, 5  ;;  %7791 = vmatprep.mubr.msk.bf16.mxu1 %vm581_vm0, %v10054_v20  ;;  %v3764_v42 = vrot.slane %v3763_v16, 4  ;;  %v3790_v2 = vshll.u32 %v10052_v36, 16  ;;  %v3794_v60 = vshrl.u32 %v10052_v36, 16 }
 0x38d   : > { %v3783_v54 = vrot.slane %v3781_v34, 4  ;;  %v3755_v29 = vsel %vm9584_vm11, %v3750_v6, %v3754_v47  ;;  %v3773_v0 = vor.u32 %v3772_v62, %v3768_v23  ;;  %v3786_v35 = vrot.slane %v3784_v43, 5 }
 0x38e   : > { %v3800_v56 = vshll.u32 %v10058_v39, 16  ;;  %v10073_v32 = vcombine.low %v3745_v15, %v3755_v29  ;;  %v3769_v48 = vsel %vm9584_vm11, %v3764_v42, %v3768_v23  ;;  %v3792_v58 = vrot.slane %v3790_v2, 5  ;;  %v10085_v23 = vld [vmem:[#allocation2 + $0x9c] sm:$0xf] }
 0x38f   : > { %v3796_v22 = vrot.slane %v3794_v60, 4  ;;  %v3774_v14 = vrot.slane %v3773_v0, 4  ;;  %v3787_v33 = vor.u32 %v3786_v35, %v3783_v54  ;;  %v3805_v47 = vshrl.u32 %v10066_v31, 16  ;;  %v10090_v54 = vld [vmem:[#allocation2 + $0xa0] sm:$0xf] }
 0x390   : > { %10998 = vst [vmem:[#allocation15_spill] sm:$0xff] %v10073_v32  ;;  %v3802_v10 = vrot.slane %v3800_v56, 5  ;;  %7792 = vmatmul.mubr.msk.bf16.gmra.mrb[16].mxu1 %vm581_vm0, %v10073_v32  ;;  %v3808_v16 = vshll.u32 %v10066_v31, 16  ;;  %v3814_v15 = vshll.u32 %v10071_v57, 16  ;;  %v3818_v34 = vshrl.u32 %v10071_v57, 16 }
 0x391   : > { %v3797_v17 = vor.u32 %v3796_v22, %v3792_v58  ;;  %v3779_v6 = vsel %vm9584_vm11, %v3774_v14, %v3778_v46  ;;  %v3788_v62 = vrot.slane %v3787_v33, 4  ;;  %v3807_v43 = vrot.slane %v3805_v47, 4  ;;  %v10096_v32 = vld [vmem:[#allocation2 + $0xa4] sm:$0x1] }
 0x392   : > { %v3824_v42 = vshll.u32 %v10077_v24, 16  ;;  %v10092_v2 = vcombine.low %v3769_v48, %v3779_v6  ;;  %v3810_v29 = vrot.slane %v3808_v16, 5  ;;  %v3816_v0 = vrot.slane %v3814_v15, 5  ;;  %v10110_v6 = vld [vmem:[#allocation2 + $0xac] sm:$0xf] }
 0x393   : > { %v3798_v60 = vrot.slane %v3797_v17, 4  ;;  %v3793_v35 = vsel %vm9584_vm11, %v3788_v62, %v3792_v58  ;;  %v3820_v56 = vrot.slane %v3818_v34, 4  ;;  %v3829_v46 = vshrl.u32 %v10085_v23, 16  ;;  %v10105_v17 = vld [vmem:[#allocation2 + $0xa8] sm:$0xf] }
 0x394   : > { %10999 = vst [vmem:[#allocation16_spill] sm:$0xff] %v10092_v2  ;;  %v3826_v22 = vrot.slane %v3824_v42, 5  ;;  %7795 = vmatprep.mubr.msk.bf16.mxu1 %vm581_vm0, %v10092_v2  ;;  %v3811_v48 = vor.u32 %v3810_v29, %v3807_v43  ;;  %v3832_v33 = vshll.u32 %v10085_v23, 16  ;;  %v3838_v47 = vshll.u32 %v10090_v54, 16 }
 0x395   : > { %v3803_v14 = vsel %vm9584_vm11, %v3798_v60, %v3802_v10  ;;  %v3821_v16 = vor.u32 %v3820_v56, %v3816_v0  ;;  %v3831_v15 = vrot.slane %v3829_v46, 4  ;;  %v3842_v34 = vshrl.u32 %v10090_v54, 16 }
 0x396   : > { %v10107_v58 = vcombine.low %v3793_v35, %v3803_v14  ;;  %v3812_v62 = vrot.slane %v3811_v48, 4  ;;  %v3834_v42 = vrot.slane %v3832_v33, 5  ;;  %v3840_v2 = vrot.slane %v3838_v47, 5  ;;  %v10120_v14 = vld [vmem:[#allocation2 + $0xb4] sm:$0xf] }
 0x397   : > { %v3848_v10 = vshll.u32 %v10096_v32, 16  ;;  %v3822_v43 = vrot.slane %v3821_v16, 4  ;;  %v3844_v60 = vrot.slane %v3842_v34, 4  ;;  %v3853_v29 = vshrl.u32 %v10105_v17, 16  ;;  %v10124_v47 = vld [vmem:[#allocation2 + $0xb0] sm:$0x1] }
 0x398   : > { %11000 = vst [vmem:[#allocation17_spill] sm:$0xff] %v10107_v58  ;;  %v3856_v20 = vshll.u32 %v10105_v17, 16  ;;  %7796 = vmatmul.mubr.msk.bf16.gmra.mrb[20].mxu1 %vm581_vm0, %v10107_v58  ;;  %v3817_v35 = vsel %vm9584_vm11, %v3812_v62, %v3816_v0  ;;  %v3835_v56 = vor.u32 %v3834_v42, %v3831_v15  ;;  %v3862_v46 = vshll.u32 %v10110_v6, 16 }
 0x399   : > { %v3827_v48 = vsel %vm9584_vm11, %v3822_v43, %v3826_v22  ;;  %v3845_v33 = vor.u32 %v3844_v60, %v3840_v2  ;;  %v3855_v16 = vrot.slane %v3853_v29, 4  ;;  %v3866_v0 = vshrl.u32 %v10110_v6, 16 }
 0x39a   : > { %v3858_v34 = vrot.slane %v3856_v20, 5  ;;  %v10128_v21 = vcombine.low %v3817_v35, %v3827_v48  ;;  %v3836_v58 = vrot.slane %v3835_v56, 4  ;;  %v3864_v37 = vrot.slane %v3862_v46, 5 }
 0x39b   : > { %v3846_v15 = vrot.slane %v3845_v33, 4  ;;  %v3850_v62 = vrot.slane %v3848_v10, 5  ;;  %v3877_v18 = vshrl.u32 %v10120_v14, 16  ;;  %v3868_v22 = vrot.slane %v3866_v0, 4  ;;  %v10141_v10 = vld [vmem:[#allocation2 + $0xbc] sm:$0x1] }
 0x39c   : > { %11001 = vst [vmem:[#allocation18_spill] sm:$0xff] %v10128_v21  ;;  %v3859_v42 = vor.u32 %v3858_v34, %v3855_v16  ;;  %7799 = vmatprep.mubr.msk.bf16.mxu1 %vm581_vm0, %v10128_v21  ;;  %v3872_v43 = vshll.u32 %v10124_v47, 16  ;;  %v3880_v20 = vshll.u32 %v10120_v14, 16  ;;  %v3886_v60 = vshll.u32 %v10126_v9, 16 }
 0x39d   : > { %v3841_v29 = vsel %vm9584_vm11, %v3836_v58, %v3840_v2  ;;  %v3851_v35 = vsel %vm9584_vm11, %v3846_v15, %v3850_v62  ;;  %v3879_v56 = vrot.slane %v3877_v18, 4  ;;  %v3869_v33 = vor.u32 %v3868_v22, %v3864_v37 }
 0x39e   : > { %v10143_v46 = vcombine.low %v3841_v29, %v3851_v35  ;;  %v3860_v48 = vrot.slane %v3859_v42, 4  ;;  %v3882_v16 = vrot.slane %v3880_v20, 5  ;;  %v3888_v34 = vrot.slane %v3886_v60, 5 }
 0x39f   : > { %v3890_v0 = vshrl.u32 %v10126_v9, 16  ;;  %v3870_v21 = vrot.slane %v3869_v33, 4  ;;  %v3874_v59 = vrot.slane %v3872_v43, 5  ;;  %v3896_v58 = vshll.u32 %v10141_v10, 16 }
 0x3a0   : > { %11002 = vst [vmem:[#allocation19_spill] sm:$0xff] %v10143_v46  ;;  %7800 = vmatmul.mubr.msk.bf16.gmra.mrb[24].mxu1 %vm581_vm0, %v10143_v46  ;;  %v3883_v2 = vor.u32 %v3882_v16, %v3879_v56  ;;  %v3865_v18 = vsel %vm9584_vm11, %v3860_v48, %v3864_v37  ;;  %v10157_v60 = vcombine.low %v9971_v38, %v9977_v28  ;;  %vm4490_vm5 = vcmask 1042432  }
 0x3a1   : > { %v3892_v15 = vrot.slane %v3890_v0, 4  ;;  %v3875_v62 = vsel %vm9584_vm11, %v3870_v21, %v3874_v59  ;;  %v10161_v43 = vcombine.low %v9991_v50, %v9996_v4  ;;  %v3898_v29 = vrot.slane %v3896_v58, 5  ;;  %v10197_v58 = vld [vmem:[#allocation2] sm:$0xf] }
 0x3a2   : > { %v3884_v42 = vrot.slane %v3883_v2, 4  ;;  %v10153_v22 = vcombine.low %v3865_v18, %v3875_v62  ;;  %v10165_v35 = vcombine.low %v10002_v11, %v10010_v8  ;;  %v10169_v59 = vcombine.low %v10023_v45, %v10033_v12 }
 0x3a3   : > { %v3893_v20 = vor.u32 %v3892_v15, %v3888_v34  ;;  %v10173_v37 = vcombine.low %v10044_v49, %v10052_v36  ;;  %v10179_v56 = vcombine.low %v10066_v31, %v10071_v57  ;;  %v10183_v48 = vcombine.low %v10085_v23, %v10090_v54  ;;  %v10199_v15 = vld [vmem:[#allocation2 + $0x4] sm:$0xf] }
 0x3a4   : > { %11003 = vst [vmem:[#allocation20_spill] sm:$0xff] %v10153_v22  ;;  %7803 = vmatprep.mubr.msk.bf16.mxu1 %vm581_vm0, %v10153_v22  ;;  %v10187_v33 = vcombine.low %v10105_v17, %v10110_v6  ;;  %v10191_v16 = vcombine.low %v10120_v14, %v10126_v9  ;;  %v3889_v0 = vsel %vm9584_vm11, %v3884_v42, %v3888_v34  ;;  %v10210_v34 = vld [vmem:[#allocation2 + $0x10] sm:$0xf]  ;;  %vm4491_vm8 = vcmask 1046532  }
 0x3a5   : > { %v3894_v21 = vrot.slane %v3893_v20, 4  ;;  %v6851_v18 = vcombine.low %v10197_v58, %v10199_v15  ;;  %v10208_v20 = vld [vmem:[#allocation2 + $0xc] sm:$0xf]  ;;  %vm10240_vm2 = vmor %vm4490_vm5, %vm4491_vm8  ;;  %v4558_v46 = vrot.slane %v10010_v8, 5  ;;  %v4561_v7 = vrot.slane %v10027_v1, 5 }
 0x3a6   : > { %v10214_v42 = vcombine.low %v10208_v20, %v10210_v34 }
 0x3a7   : > { %v3899_v2 = vsel %vm9584_vm11, %v3894_v21, %v3898_v29  ;;  %v8675_v29 = vld [vmem:[%s10942_s4 + $0x28] sm:$0xff]   ;;  %v10219_v21 = vld [vmem:[#allocation2 + $0x18] sm:$0xf] }
 0x3a8   : > { %v10203_v62 = vcombine.low %v3889_v0, %v3899_v2  ;;  %v10223_v0 = vcombine.low %v10219_v21, %v9814_v41  ;;  %v6892_v2 = vrot.slane %v9971_v38, 9  ;;  %v10238_v41 = vcombine.low %v9869_v51, %v9875_v40 }
 0x3a9   : > { %v6893_v38 = vrot.slane %v9991_v50, 9  ;;  %v4547_v51 = vrot.slane %v9989_v3, 5  ;;  %v4554_v40 = vrot.slane %v10000_v52, 5 }
 0x3aa   : > { %11004 = vst [vmem:[#allocation21_spill] sm:$0xff] %v10203_v62  ;;  %7804 = vmatmul.mubr.msk.bf16.gmra.mrb[28].mxu1 %vm581_vm0, %v10203_v62 }
 0x3ab   : > { %7811 = vmatprep.mubr.msk.bf16.mxu1 %vm581_vm0, %v6851_v18  ;;  %v4544_v18 = vrot.slane %v9977_v28, 5  ;;  %v4551_v28 = vrot.slane %v9996_v4, 5  ;;  %v6894_v4 = vrot.slane %v10002_v11, 9 }
 0x3ad   : > { %v4545_v19 = vsel %vm10240_vm2, %v6892_v2, %v4544_v18  ;;  %v4546_v63 = vrot.slane %v4544_v18, 4  ;;  %v4552_v22 = vsel %vm10240_vm2, %v6893_v38, %v4551_v28  ;;  %v4553_v50 = vrot.slane %v4551_v28, 4 }
 0x3ae   : > { %v6895_v2 = vrot.slane %v10023_v45, 9  ;;  %v4565_v18 = vrot.slane %v10033_v12, 5  ;;  %v4559_v11 = vsel %vm10240_vm2, %v6894_v4, %v4558_v46  ;;  %v4560_v38 = vrot.slane %v4558_v46, 4 }
 0x3af   : > { %v4548_v5 = vsel %vm10240_vm2, %v4546_v63, %v4547_v51  ;;  %v4555_v52 = vsel %vm10240_vm2, %v4553_v50, %v4554_v40  ;;  %v4568_v12 = vrot.slane %v10040_v26, 5  ;;  %v4572_v28 = vrot.slane %v10052_v36, 5 }
 0x3b0   : > { %v10264_v3 = vcombine.low %v4545_v19, %v4548_v5  ;;  %v10271_v8 = vcombine.low %v4552_v22, %v4555_v52  ;;  %v4566_v1 = vsel %vm10240_vm2, %v6895_v2, %v4565_v18  ;;  %v4567_v45 = vrot.slane %v4565_v18, 4 }
 0x3b1   : > { %v4562_v5 = vsel %vm10240_vm2, %v4560_v38, %v4561_v7  ;;  %v4575_v19 = vrot.slane %v10058_v39, 5  ;;  %v6897_v63 = vrot.slane %v10066_v31, 9  ;;  %v4579_v26 = vrot.slane %v10071_v57, 5 }
 0x3b2   : > { %7812 = vmatmul.mubr.msk.bf16.vlgmr.msra.gmra.mrb[0].mxu1 %vm581_vm0, %v10214_v42  ;;  %v10283_v46 = vcombine.low %v4559_v11, %v4562_v5  ;;  %v4569_v22 = vsel %vm10240_vm2, %v4567_v45, %v4568_v12  ;;  %v4574_v36 = vrot.slane %v4572_v28, 4  ;;  %v4582_v39 = vrot.slane %v10077_v24, 5 }
 0x3b3   : > { %7844 = vmatpush3.bf16.msra.mxu1 %v9846_v55  ;;  %7815 = vmatprep.mubr.msk.bf16.mxu1 %vm581_vm0, %v10223_v0  ;;  %v10249_v55 = vld [vmem:[%s10942_s4 + $0x30] sm:$0xff]   ;;  %v10291_v7 = vcombine.low %v4566_v1, %v4569_v22  ;;  %v4580_v51 = vsel %vm10240_vm2, %v6897_v63, %v4579_v26  ;;  %v4581_v40 = vrot.slane %v4579_v26, 4  ;;  %v6898_v50 = vrot.slane %v10085_v23, 9  ;;  %v10345_v63 = vld [vmem:[#allocation2 + $0xc8] sm:$0x1] }
 0x3b4   : > { %7845 = vmatprep.subr.bf16.mxu1 %v8675_v29  ;;  %v4586_v31 = vrot.slane %v10090_v54, 5  ;;  %v4576_v57 = vsel %vm10240_vm2, %v4574_v36, %v4575_v19  ;;  %v4589_v4 = vrot.slane %v10096_v32, 5  ;;  %v6899_v2 = vrot.slane %v10105_v17, 9 }
 0x3b5   : > { %v4593_v18 = vrot.slane %v10110_v6, 5  ;;  %v4583_v24 = vsel %vm10240_vm2, %v4581_v40, %v4582_v39  ;;  %v4596_v32 = vrot.slane %v10124_v47, 5  ;;  %v10318_v17 = vcombine.low %v9905_v44, %v9916_v53  ;;  %v10334_v44 = vld [vmem:[#allocation2 + $0xc4] sm:$0xf] }
 0x3b6   : > { %v4587_v11 = vsel %vm10240_vm2, %v6898_v50, %v4586_v31  ;;  %v4588_v23 = vrot.slane %v4586_v31, 4  ;;  %v10311_v38 = vcombine.low %v4580_v51, %v4583_v24  ;;  %v6900_v45 = vrot.slane %v10120_v14, 9 }
 0x3b7   : > { %7846 = vmatpush3.bf16.msra.mxu1 %v8675_v29  ;;  %v6896_v29 = vrot.slane %v10044_v49, 9  ;;  %v4594_v54 = vsel %vm10240_vm2, %v6899_v2, %v4593_v18  ;;  %v4595_v1 = vrot.slane %v4593_v18, 4  ;;  %v4600_v12 = vrot.slane %v10126_v9, 5 }
 0x3b8   : > { %7879 = vmatprep.subr.bf16.mxu1 %v10249_v55  ;;  %v4590_v6 = vsel %vm10240_vm2, %v4588_v23, %v4589_v4  ;;  %v10326_v5 = vcombine.low %v9931_v13, %v9944_v25  ;;  %v4603_v22 = vrot.slane %v10141_v10, 5  ;;  %v5369_v36 = vrot.slane %v10334_v44, 5  ;;  %v8704_v4 = vld [vmem:[#allocation2 + $0x8] sm:$0x1] }
 0x3b9   : > { %v4573_v49 = vsel %vm10240_vm2, %v6896_v29, %v4572_v28  ;;  %v10328_v29 = vcombine.low %v4587_v11, %v4590_v6  ;;  %v4597_v47 = vsel %vm10240_vm2, %v4595_v1, %v4596_v32  ;;  %v10332_v28 = vld [vmem:[#allocation2 + $0xc0] sm:$0xf]  ;;  %v4601_v9 = vsel %vm10240_vm2, %v6900_v45, %v4600_v12  ;;  %v8706_v45 = vld [vmem:[#allocation2 + $0x14] sm:$0x1] }
 0x3ba   : > { %7816 = vmatmul.mubr.msk.bf16.gmra.mrb[4].mxu1 %vm581_vm0, %v10234_v27  ;;  %v10305_v52 = vcombine.low %v4573_v49, %v4576_v57  ;;  %v10338_v19 = vcombine.low %v4594_v54, %v4597_v47  ;;  %v4602_v14 = vrot.slane %v4600_v12, 4  ;;  %v6973_v49 = vrot.slane %v10332_v28, 9  ;;  %v8707_v47 = vld [vmem:[#allocation2 + $0x20] sm:$0x1] }
 0x3bb   : > { %7819 = vmatprep.mubr.msk.bf16.mxu1 %vm581_vm0, %v10238_v41  ;;  %v5371_v40 = vrot.slane %v5369_v36, 4  ;;  %v5372_v10 = vrot.slane %v10345_v63, 5  ;;  %v4495_v57 = vrot.slane %v10199_v15, 5  ;;  %v4498_v2 = vrot.slane %v8704_v4, 5  ;;  %v8705_v15 = vld [vmem:[#allocation2 + $0x1c] sm:$0xf] }
 0x3bc   : > { %v4604_v26 = vsel %vm10240_vm2, %v4602_v14, %v4603_v22  ;;  %v5370_v51 = vsel %vm10240_vm2, %v6973_v49, %v5369_v36  ;;  %v6885_v18 = vrot.slane %v10197_v58, 9  ;;  %v4502_v54 = vrot.slane %v10210_v34, 5  ;;  %v8708_v34 = vld [vmem:[#allocation2 + $0x28] sm:$0xf] }
 0x3bd   : > { %v10351_v39 = vcombine.low %v4601_v9, %v4604_v26  ;;  %v5373_v50 = vsel %vm10240_vm2, %v5371_v40, %v5372_v10  ;;  %v4497_v24 = vrot.slane %v4495_v57, 4  ;;  %v4509_v1 = vrot.slane %v8705_v15, 5  ;;  %v8712_v15 = vld [vmem:[#allocation2 + $0x24] sm:$0xf] }
 0x3be   : > { %v10358_v31 = vcombine.low %v5370_v51, %v5373_v50  ;;  %v4496_v11 = vsel %vm10240_vm2, %v6885_v18, %v4495_v57  ;;  %v4504_v6 = vrot.slane %v4502_v54, 4  ;;  %v4505_v12 = vrot.slane %v8706_v45, 5  ;;  %v8709_v51 = vld [vmem:[#allocation2 + $0x34] sm:$0xf]  ;;  %v8684_v57 = vld [vmem:[%s10942_s4 + $0x38] sm:$0xff]  }
 0x3bf   : > { %v4499_v23 = vsel %vm10240_vm2, %v4497_v24, %v4498_v2  ;;  %v4511_v58 = vrot.slane %v4509_v1, 4  ;;  %v4512_v9 = vrot.slane %v8707_v47, 5  ;;  %v6886_v14 = vrot.slane %v10208_v20, 9  ;;  %v8710_v18 = vld [vmem:[#allocation2 + $0x2c] sm:$0x1] }
 0x3c0   : > { %v6901_v32 = vcombine.low %v4496_v11, %v4499_v23  ;;  %v4506_v22 = vsel %vm10240_vm2, %v4504_v6, %v4505_v12  ;;  %v4516_v26 = vrot.slane %v8708_v34, 5  ;;  %v6887_v49 = vrot.slane %v10219_v21, 9  ;;  %v8711_v11 = vld [vmem:[#allocation2 + $0x38] sm:$0x1] }
 0x3c1   : > { %v4513_v36 = vsel %vm10240_vm2, %v4511_v58, %v4512_v9  ;;  %v4523_v40 = vrot.slane %v8709_v51, 5  ;;  %v4503_v10 = vsel %vm10240_vm2, %v6886_v14, %v4502_v54  ;;  %v4519_v24 = vrot.slane %v8710_v18, 5  ;;  %v8685_v54 = vld [vmem:[%s10942_s4 + $0x40] sm:$0xff]   ;;  %v8689_v18 = vld [vmem:[%s10942_s4 + $0x58] sm:$0xff]  }
 0x3c2   : > { %7820 = vmatmul.mubr.msk.bf16.gmra.mrb[8].mxu1 %vm581_vm0, %v10318_v17  ;;  %v10394_v50 = vcombine.low %v4503_v10, %v4506_v22  ;;  %v4510_v20 = vsel %vm10240_vm2, %v6887_v49, %v4509_v1  ;;  %v4518_v21 = vrot.slane %v4516_v26, 4  ;;  %v4526_v23 = vrot.slane %v8711_v11, 5  ;;  %v8714_v49 = vld [vmem:[#allocation2 + $0x3c] sm:$0xf]  ;;  %v11009_v11 = vld [vmem:[#allocation9_spill] sm:$0xff] }
 0x3c3   : > { %7823 = vmatprep.mubr.msk.bf16.mxu1 %vm581_vm0, %v10326_v5  ;;  %v10401_v4 = vcombine.low %v4510_v20, %v4513_v36  ;;  %v4525_v2 = vrot.slane %v4523_v40, 4  ;;  %v6888_v1 = vrot.slane %v8712_v15, 9  ;;  %v4530_v6 = vrot.slane %v9916_v53, 5  ;;  %v11011_v15 = vld [vmem:[#allocation11_spill] sm:$0xff] }
 0x3c4   : > { %v4537_v12 = vrot.slane %v9944_v25, 5  ;;  %v4533_v25 = vrot.slane %v9922_v61, 5  ;;  %v6890_v36 = vrot.slane %v8714_v49, 9  ;;  %v11019_v49 = vld [vmem:[#allocation19_spill] sm:$0xff] }
 0x3c5   : > { %v4527_v45 = vsel %vm10240_vm2, %v4525_v2, %v4526_v23  ;;  %v4517_v47 = vsel %vm10240_vm2, %v6888_v1, %v4516_v26  ;;  %v4532_v53 = vrot.slane %v4530_v6, 4  ;;  %v4540_v26 = vrot.slane %v9954_v30, 5  ;;  %v8688_v30 = vld [vmem:[%s10942_s4 + $0x50] sm:$0xff]   ;;  %v11007_v2 = vld [vmem:[#allocation7_spill] sm:$0xff]  ;;  %v11012_v1 = vld [vmem:[#allocation12_spill] sm:$0xff] }
 0x3c6   : > { %v4539_v34 = vrot.slane %v4537_v12, 4  ;;  %v4531_v20 = vsel %vm10240_vm2, %v6890_v36, %v4530_v6  ;;  %v8690_v23 = vld [vmem:[%s10942_s4 + $0x60] sm:$0xff]   ;;  %v11014_v6 = vld [vmem:[#allocation14_spill] sm:$0xff] }
 0x3c7   : > { %v4534_v51 = vsel %vm10240_vm2, %v4532_v53, %v4533_v25  ;;  %v5131_v53 = vshll.u32 %v10332_v28, 16 }
 0x3c8   : > { %v4541_v10 = vsel %vm10240_vm2, %v4539_v34, %v4540_v26  ;;  %v11018_v26 = vld [vmem:[#allocation18_spill] sm:$0xff] }
 0x3ca   : > { %7824 = vmatmul.mubr.msk.bf16.gmra.mrb[12].mxu1 %vm581_vm0, %v10157_v60 }
 0x3cb   : > { %7827 = vmatprep.mubr.msk.bf16.mxu1 %vm581_vm0, %v10161_v43 }
 0x3d2   : > { %7828 = vmatmul.mubr.msk.bf16.gmra.mrb[16].mxu1 %vm581_vm0, %v10165_v35 }
 0x3d3   : > { %7831 = vmatprep.mubr.msk.bf16.mxu1 %vm581_vm0, %v10169_v59 }
 0x3da   : > { %7832 = vmatmul.mubr.msk.bf16.gmra.mrb[20].mxu1 %vm581_vm0, %v10173_v37 }
 0x3db   : > { %7835 = vmatprep.mubr.msk.bf16.mxu1 %vm581_vm0, %v10179_v56 }
 0x3e2   : > { %7836 = vmatmul.mubr.msk.bf16.gmra.mrb[24].mxu1 %vm581_vm0, %v10183_v48 }
 0x3e3   : > { %7839 = vmatprep.mubr.msk.bf16.mxu1 %vm581_vm0, %v10187_v33 }
 0x3ea   : > { %7840 = vmatmul.mubr.msk.bf16.gmra.mrb[28].mxu1 %vm581_vm0, %v10191_v16 }
 0x3eb   : > { %7847 = vmatprep.mubr.msk.bf16.mxu1 %vm581_vm0, %v6901_v32  ;;  %v4520_v32 = vsel %vm10240_vm2, %v4518_v21, %v4519_v24  ;;  %v11008_v24 = vld [vmem:[#allocation8_spill] sm:$0xff] }
 0x3ec   : > { %v10419_v9 = vcombine.low %v4517_v47, %v4520_v32  ;;  %v11013_v32 = vld [vmem:[#allocation13_spill] sm:$0xff]  ;;  %v5137_v47 = vshll.u32 %v10334_v44, 16 }
 0x3ee   : > { %v5139_v34 = vrot.slane %v5137_v47, 5 }
 0x3f2   : > { %7848 = vmatmul.mubr.msk.bf16.vlgmr.msra.gmra.mrb[0].mxu1 %vm581_vm0, %v10394_v50 }
 0x3f3   : > { %7880 = vmatpush3.bf16.msra.mxu1 %v10249_v55  ;;  %7851 = vmatprep.mubr.msk.bf16.mxu1 %vm581_vm0, %v10401_v4  ;;  %v8713_v55 = vld [vmem:[#allocation2 + $0x30] sm:$0xf] }
 0x3f4   : > { %7881 = vmatprep.subr.bf16.mxu1 %v8684_v57  ;;  %v6889_v58 = vrot.slane %v8713_v55, 9  ;;  %v11015_v55 = vld [vmem:[#allocation15_spill] sm:$0xff] }
 0x3f6   : > { %v4524_v14 = vsel %vm10240_vm2, %v6889_v58, %v4523_v40  ;;  %v6891_v40 = vrot.slane %v9931_v13, 9  ;;  %v8686_v13 = vld [vmem:[%s10942_s4 + $0x48] sm:$0xff]  }
 0x3f7   : > { %7882 = vmatpush3.bf16.msra.mxu1 %v8684_v57  ;;  %v10423_v22 = vcombine.low %v4524_v14, %v4527_v45  ;;  %v10438_v57 = vcombine.low %v4531_v20, %v4534_v51  ;;  %v11016_v58 = vld [vmem:[#allocation16_spill] sm:$0xff]  ;;  %v11017_v45 = vld [vmem:[#allocation17_spill] sm:$0xff]  ;;  %v5128_v14 = vshrl.u32 %v10332_v28, 16  ;;  %v5133_v51 = vrot.slane %v5131_v53, 5 }
 0x3f8   : > { %7915 = vmatprep.subr.bf16.mxu1 %v8685_v54  ;;  %v4538_v61 = vsel %vm10240_vm2, %v6891_v40, %v4537_v12  ;;  %v5141_v12 = vshrl.u32 %v10334_v44, 16  ;;  %v5147_v20 = vshll.u32 %v10345_v63, 16  ;;  %v8691_v63 = vld [vmem:[%s10942_s4 + $0x68] sm:$0xff]  }
 0x3f9   : > { %v10442_v21 = vcombine.low %v4538_v61, %v4541_v10  ;;  %v5130_v36 = vrot.slane %v5128_v14, 4  ;;  %v8692_v14 = vld [vmem:[%s10942_s4 + $0x70] sm:$0xff]  }
 0x3fa   : > { %7852 = vmatmul.mubr.msk.bf16.gmra.mrb[4].mxu1 %vm581_vm0, %v10419_v9  ;;  %v5143_v25 = vrot.slane %v5141_v12, 4 }
 0x3fb   : > { %7855 = vmatprep.mubr.msk.bf16.mxu1 %vm581_vm0, %v10423_v22  ;;  %v5134_v10 = vor.u32 %v5133_v51, %v5130_v36 }
 0x3fc   : > { %v5144_v40 = vor.u32 %v5143_v25, %v5139_v34 }
 0x3fe   : > { %v5145_v61 = vrot.slane %v5144_v40, 4 }
 0x402   : > { %7856 = vmatmul.mubr.msk.bf16.gmra.mrb[8].mxu1 %vm581_vm0, %v10438_v57 }
 0x403   : > { %7859 = vmatprep.mubr.msk.bf16.mxu1 %vm581_vm0, %v10442_v21 }
 0x40a   : > { %7860 = vmatmul.mubr.msk.bf16.gmra.mrb[12].mxu1 %vm581_vm0, %v10264_v3 }
 0x40b   : > { %7863 = vmatprep.mubr.msk.bf16.mxu1 %vm581_vm0, %v10271_v8 }
 0x412   : > { %7864 = vmatmul.mubr.msk.bf16.gmra.mrb[16].mxu1 %vm581_vm0, %v10283_v46 }
 0x413   : > { %7867 = vmatprep.mubr.msk.bf16.mxu1 %vm581_vm0, %v10291_v7 }
 0x41a   : > { %7868 = vmatmul.mubr.msk.bf16.gmra.mrb[20].mxu1 %vm581_vm0, %v10305_v52 }
 0x41b   : > { %7871 = vmatprep.mubr.msk.bf16.mxu1 %vm581_vm0, %v10311_v38 }
 0x422   : > { %7872 = vmatmul.mubr.msk.bf16.gmra.mrb[24].mxu1 %vm581_vm0, %v10328_v29 }
 0x423   : > { %7875 = vmatprep.mubr.msk.bf16.mxu1 %vm581_vm0, %v10338_v19 }
 0x42a   : > { %7876 = vmatmul.mubr.msk.bf16.gmra.mrb[28].mxu1 %vm581_vm0, %v10351_v39 }
 0x42b   : > { %7883 = vmatprep.mubr.msk.bf16.mxu1 %vm581_vm0, %v10214_v42  ;;  %v10504_v42 = vcombine.low %v10332_v28, %v10334_v44  ;;  %v11020_v44 = vld [vmem:[#allocation20_spill] sm:$0xff]  ;;  %v5135_v28 = vrot.slane %v5134_v10, 4  ;;  %v7056_v10 = vld [vmem:[%s8887_s23 + $0x39] sm:$0xff] }
 0x42d   : > { %v5140_v12 = vsel %vm9584_vm11, %v5135_v28, %v5139_v34  ;;  %v7055_v34 = vld [vmem:[%s8887_s23 + $0x31] sm:$0xff] }
 0x432   : > { %7884 = vmatmul.mubr.msk.bf16.vlgmr.msra.gmra.mrb[0].mxu1 %vm581_vm0, %v10223_v0 }
 0x433   : > { %7916 = vmatpush3.bf16.msra.mxu1 %v8685_v54  ;;  %7887 = vmatprep.mubr.msk.bf16.mxu1 %vm581_vm0, %v10234_v27  ;;  %v11010_v54 = vld [vmem:[#allocation10_spill] sm:$0xff] }
 0x434   : > { %7917 = vmatprep.subr.bf16.mxu1 %v8686_v13 }
 0x437   : > { %7918 = vmatpush3.bf16.msra.mxu1 %v8686_v13  ;;  %v11021_v13 = vld [vmem:[#allocation21_spill] sm:$0xff] }
 0x438   : > { %7951 = vmatprep.subr.bf16.mxu1 %v8688_v30 }
 0x43a   : > { %7888 = vmatmul.mubr.msk.bf16.gmra.mrb[4].mxu1 %vm581_vm0, %v10238_v41 }
 0x43b   : > { %7891 = vmatprep.mubr.msk.bf16.mxu1 %vm581_vm0, %v10318_v17 }
 0x442   : > { %7892 = vmatmul.mubr.msk.bf16.gmra.mrb[8].mxu1 %vm581_vm0, %v10326_v5 }
 0x443   : > { %7895 = vmatprep.mubr.msk.bf16.mxu1 %vm581_vm0, %v10157_v60 }
 0x44a   : > { %7896 = vmatmul.mubr.msk.bf16.gmra.mrb[12].mxu1 %vm581_vm0, %v10161_v43 }
 0x44b   : > { %7899 = vmatprep.mubr.msk.bf16.mxu1 %vm581_vm0, %v10165_v35 }
 0x452   : > { %7900 = vmatmul.mubr.msk.bf16.gmra.mrb[16].mxu1 %vm581_vm0, %v10169_v59 }
 0x453   : > { %7903 = vmatprep.mubr.msk.bf16.mxu1 %vm581_vm0, %v10173_v37 }
 0x45a   : > { %7904 = vmatmul.mubr.msk.bf16.gmra.mrb[20].mxu1 %vm581_vm0, %v10179_v56 }
 0x45b   : > { %7907 = vmatprep.mubr.msk.bf16.mxu1 %vm581_vm0, %v10183_v48 }
 0x462   : > { %7908 = vmatmul.mubr.msk.bf16.gmra.mrb[24].mxu1 %vm581_vm0, %v10187_v33 }
 0x463   : > { %7911 = vmatprep.mubr.msk.bf16.mxu1 %vm581_vm0, %v10191_v16 }
 0x46a   : > { %7912 = vmatmul.mubr.msk.bf16.gmra.mrb[28].mxu1 %vm581_vm0, %v10504_v42 }
 0x46b   : > { %7919 = vmatprep.mubr.msk.bf16.mxu1 %vm581_vm0, %v11007_v2 }
 0x472   : > { %7920 = vmatmul.mubr.msk.bf16.vlgmr.msra.gmra.mrb[0].mxu1 %vm581_vm0, %v11008_v24 }
 0x473   : > { %7952 = vmatpush3.bf16.msra.mxu1 %v8688_v30  ;;  %7923 = vmatprep.mubr.msk.bf16.mxu1 %vm581_vm0, %v11009_v11  ;;  %v5149_v30 = vrot.slane %v5147_v20, 5 }
 0x474   : > { %7953 = vmatprep.subr.bf16.mxu1 %v8689_v18 }
 0x477   : > { %7954 = vmatpush3.bf16.msra.mxu1 %v8689_v18  ;;  %v5150_v18 = vsel %vm9584_vm11, %v5145_v61, %v5149_v30 }
 0x478   : > { %7987 = vmatprep.subr.bf16.mxu1 %v8690_v23  ;;  %v10553_v47 = vcombine.low %v5140_v12, %v5150_v18 }
 0x47a   : > { %7924 = vmatmul.mubr.msk.bf16.gmra.mrb[4].mxu1 %vm581_vm0, %v11010_v54 }
 0x47b   : > { %7927 = vmatprep.mubr.msk.bf16.mxu1 %vm581_vm0, %v11011_v15 }
 0x482   : > { %7928 = vmatmul.mubr.msk.bf16.gmra.mrb[8].mxu1 %vm581_vm0, %v11012_v1 }
 0x483   : > { %7931 = vmatprep.mubr.msk.bf16.mxu1 %vm581_vm0, %v11013_v32 }
 0x48a   : > { %7932 = vmatmul.mubr.msk.bf16.gmra.mrb[12].mxu1 %vm581_vm0, %v11014_v6 }
 0x48b   : > { %7935 = vmatprep.mubr.msk.bf16.mxu1 %vm581_vm0, %v11015_v55 }
 0x492   : > { %7936 = vmatmul.mubr.msk.bf16.gmra.mrb[16].mxu1 %vm581_vm0, %v11016_v58 }
 0x493   : > { %7939 = vmatprep.mubr.msk.bf16.mxu1 %vm581_vm0, %v11017_v45 }
 0x49a   : > { %7940 = vmatmul.mubr.msk.bf16.gmra.mrb[20].mxu1 %vm581_vm0, %v11018_v26 }
 0x49b   : > { %7943 = vmatprep.mubr.msk.bf16.mxu1 %vm581_vm0, %v11019_v49 }
 0x4a2   : > { %7944 = vmatmul.mubr.msk.bf16.gmra.mrb[24].mxu1 %vm581_vm0, %v11020_v44 }
 0x4a3   : > { %7947 = vmatprep.mubr.msk.bf16.mxu1 %vm581_vm0, %v11021_v13 }
 0x4aa   : > { %7948 = vmatmul.mubr.msk.bf16.gmra.mrb[28].mxu1 %vm581_vm0, %v10553_v47 }
 0x4ab   : > { %7955 = vmatprep.mubr.msk.bf16.mxu1 %vm581_vm0, %v10394_v50  ;;  %v8693_v50 = vld [vmem:[%s10942_s4 + $0x78] sm:$0xff]  }
 0x4b2   : > { %7956 = vmatmul.mubr.msk.bf16.vlgmr.msra.gmra.mrb[0].mxu1 %vm581_vm0, %v10401_v4 }
 0x4b3   : > { %7988 = vmatpush3.bf16.msra.mxu1 %v8690_v23  ;;  %7959 = vmatprep.mubr.msk.bf16.mxu1 %vm581_vm0, %v10419_v9  ;;  %v8695_v23 = vld [vmem:[%s10942_s4 + $0x80] sm:$0xff]  }
 0x4b4   : > { %7989 = vmatprep.subr.bf16.mxu1 %v8691_v63 }
 0x4b7   : > { %7990 = vmatpush3.bf16.msra.mxu1 %v8691_v63 }
 0x4b8   : > { %8023 = vmatprep.subr.bf16.mxu1 %v8692_v14 }
 0x4ba   : > { %7960 = vmatmul.mubr.msk.bf16.gmra.mrb[4].mxu1 %vm581_vm0, %v10423_v22 }
 0x4bb   : > { %7963 = vmatprep.mubr.msk.bf16.mxu1 %vm581_vm0, %v10438_v57 }
 0x4c2   : > { %7964 = vmatmul.mubr.msk.bf16.gmra.mrb[8].mxu1 %vm581_vm0, %v10442_v21 }
 0x4c3   : > { %7967 = vmatprep.mubr.msk.bf16.mxu1 %vm581_vm0, %v10264_v3 }
 0x4ca   : > { %7968 = vmatmul.mubr.msk.bf16.gmra.mrb[12].mxu1 %vm581_vm0, %v10271_v8 }
 0x4cb   : > { %7971 = vmatprep.mubr.msk.bf16.mxu1 %vm581_vm0, %v10283_v46 }
 0x4d2   : > { %7972 = vmatmul.mubr.msk.bf16.gmra.mrb[16].mxu1 %vm581_vm0, %v10291_v7 }
 0x4d3   : > { %7975 = vmatprep.mubr.msk.bf16.mxu1 %vm581_vm0, %v10305_v52 }
 0x4da   : > { %7976 = vmatmul.mubr.msk.bf16.gmra.mrb[20].mxu1 %vm581_vm0, %v10311_v38 }
 0x4db   : > { %7979 = vmatprep.mubr.msk.bf16.mxu1 %vm581_vm0, %v10328_v29 }
 0x4e2   : > { %7980 = vmatmul.mubr.msk.bf16.gmra.mrb[24].mxu1 %vm581_vm0, %v10338_v19 }
 0x4e3   : > { %7983 = vmatprep.mubr.msk.bf16.mxu1 %vm581_vm0, %v10351_v39 }
 0x4ea   : > { %7984 = vmatmul.mubr.msk.bf16.gmra.mrb[28].mxu1 %vm581_vm0, %v10358_v31 }
 0x4eb   : > { %7991 = vmatprep.mubr.msk.bf16.mxu1 %vm581_vm0, %v10223_v0 }
 0x4f2   : > { %7992 = vmatmul.mubr.msk.bf16.vlgmr.msra.gmra.mrb[0].mxu1 %vm581_vm0, %v10234_v27  ;;  %v10631_v27 = vld [vmem:[#allocation2 + $0xcc] sm:$0xf] }
 0x4f3   : > { %8024 = vmatpush3.bf16.msra.mxu1 %v8692_v14  ;;  %7995 = vmatprep.mubr.msk.bf16.mxu1 %vm581_vm0, %v10238_v41 }
 0x4f4   : > { %8025 = vmatprep.subr.bf16.mxu1 %v8693_v50 }
 0x4f7   : > { %8026 = vmatpush3.bf16.msra.mxu1 %v8693_v50 }
 0x4f8   : > { %8059 = vmatprep.subr.bf16.mxu1 %v8695_v23 }
 0x4fa   : > { %7996 = vmatmul.mubr.msk.bf16.gmra.mrb[4].mxu1 %vm581_vm0, %v10318_v17  ;;  %v3508_v17 = vld [vmem:[#allocation2 + $0xd4] sm:$0x1] }
 0x4fb   : > { %7999 = vmatprep.mubr.msk.bf16.mxu1 %vm581_vm0, %v10326_v5 }
 0x502   : > { %8000 = vmatmul.mubr.msk.bf16.gmra.mrb[8].mxu1 %vm581_vm0, %v10157_v60  ;;  %v3507_v60 = vld [vmem:[#allocation2 + $0xd0] sm:$0xf] }
 0x503   : > { %8003 = vmatprep.mubr.msk.bf16.mxu1 %vm581_vm0, %v10161_v43  ;;  %v6993_v43 = vcombine.low %v10631_v27, %v3507_v60 }
 0x50a   : > { %8004 = vmatmul.mubr.msk.bf16.gmra.mrb[12].mxu1 %vm581_vm0, %v10165_v35  ;;  %v8696_v35 = vld [vmem:[%s10942_s4 + $0x88] sm:$0xff]  }
 0x50b   : > { %8007 = vmatprep.mubr.msk.bf16.mxu1 %vm581_vm0, %v10169_v59  ;;  %v5807_v59 = vshrl.u32 %v10631_v27, 16 }
 0x512   : > { %8008 = vmatmul.mubr.msk.bf16.gmra.mrb[16].mxu1 %vm581_vm0, %v10173_v37  ;;  %v5810_v37 = vshll.u32 %v10631_v27, 16 }
 0x513   : > { %8011 = vmatprep.mubr.msk.bf16.mxu1 %vm581_vm0, %v10179_v56  ;;  %v5820_v56 = vshrl.u32 %v3507_v60, 16 }
 0x515   : > { %v5822_v41 = vrot.slane %v5820_v56, 4  ;;  %v7059_v56 = vld [vmem:[%s8887_s23 + $0x61] sm:$0xff] }
 0x51a   : > { %8012 = vmatmul.mubr.msk.bf16.gmra.mrb[20].mxu1 %vm581_vm0, %v10183_v48  ;;  %v5816_v48 = vshll.u32 %v3507_v60, 16 }
 0x51b   : > { %8015 = vmatprep.mubr.msk.bf16.mxu1 %vm581_vm0, %v10187_v33  ;;  %v5809_v33 = vrot.slane %v5807_v59, 4 }
 0x51c   : > { %v5818_v0 = vrot.slane %v5816_v48, 5 }
 0x522   : > { %8016 = vmatmul.mubr.msk.bf16.gmra.mrb[24].mxu1 %vm581_vm0, %v10191_v16  ;;  %v5812_v16 = vrot.slane %v5810_v37, 5 }
 0x523   : > { %8019 = vmatprep.mubr.msk.bf16.mxu1 %vm581_vm0, %v10504_v42  ;;  %v5823_v42 = vor.u32 %v5822_v41, %v5818_v0 }
 0x524   : > { %v5813_v5 = vor.u32 %v5812_v16, %v5809_v33  ;;  %v7057_v16 = vld [vmem:[%s8887_s23 + $0x49] sm:$0xff] }
 0x52a   : > { %8020 = vmatmul.mubr.msk.bf16.gmra.mrb[28].mxu1 %vm581_vm0, %v6993_v43 }
 0x52b   : > { %8027 = vmatprep.mubr.msk.bf16.mxu1 %vm581_vm0, %v11008_v24  ;;  %v5826_v24 = vshll.u32 %v3508_v17, 16 }
 0x532   : > { %8028 = vmatmul.mubr.msk.bf16.vlgmr.msra.gmra.mrb[0].mxu1 %vm581_vm0, %v11009_v11  ;;  %v5814_v11 = vrot.slane %v5813_v5, 4  ;;  %v7060_v5 = vld [vmem:[%s8887_s23 + $0x69] sm:$0xff] }
 0x533   : > { %8060 = vmatpush3.bf16.msra.mxu1 %v8695_v23  ;;  %8031 = vmatprep.mubr.msk.bf16.mxu1 %vm581_vm0, %v11010_v54  ;;  %v5824_v54 = vrot.slane %v5823_v42, 4 }
 0x534   : > { %8061 = vmatprep.subr.bf16.mxu1 %v8696_v35 }
 0x537   : > { %8062 = vmatpush3.bf16.msra.mxu1 %v8696_v35 }
 0x53a   : > { %8032 = vmatmul.mubr.msk.bf16.gmra.mrb[4].mxu1 %vm581_vm0, %v11011_v15  ;;  %v5828_v15 = vrot.slane %v5826_v24, 5 }
 0x53b   : > { %8035 = vmatprep.mubr.msk.bf16.mxu1 %vm581_vm0, %v11012_v1  ;;  %v5819_v1 = vsel %vm9584_vm11, %v5814_v11, %v5818_v0 }
 0x542   : > { %8036 = vmatmul.mubr.msk.bf16.gmra.mrb[8].mxu1 %vm581_vm0, %v11013_v32  ;;  %v5829_v32 = vsel %vm9584_vm11, %v5824_v54, %v5828_v15  ;;  %v7058_v54 = vld [vmem:[%s8887_s23 + $0x51] sm:$0xff] }
 0x543   : > { %8039 = vmatprep.mubr.msk.bf16.mxu1 %vm581_vm0, %v11014_v6  ;;  %v7012_v6 = vcombine.low %v5819_v1, %v5829_v32 }
 0x54a   : > { %8040 = vmatmul.mubr.msk.bf16.gmra.mrb[12].mxu1 %vm581_vm0, %v11015_v55 }
 0x54b   : > { %8043 = vmatprep.mubr.msk.bf16.mxu1 %vm581_vm0, %v11016_v58 }
 0x552   : > { %8044 = vmatmul.mubr.msk.bf16.gmra.mrb[16].mxu1 %vm581_vm0, %v11017_v45 }
 0x553   : > { %8047 = vmatprep.mubr.msk.bf16.mxu1 %vm581_vm0, %v11018_v26 }
 0x55a   : > { %8048 = vmatmul.mubr.msk.bf16.gmra.mrb[20].mxu1 %vm581_vm0, %v11019_v49  ;;  %v7053_v49 = vld [vmem:[%s8887_s23 + $0x19] sm:$0xff] }
 0x55b   : > { %8051 = vmatprep.mubr.msk.bf16.mxu1 %vm581_vm0, %v11020_v44 }
 0x562   : > { %8052 = vmatmul.mubr.msk.bf16.gmra.mrb[24].mxu1 %vm581_vm0, %v11021_v13  ;;  %v7054_v13 = vld [vmem:[%s8887_s23 + $0x21] sm:$0xff] }
 0x563   : > { %8055 = vmatprep.mubr.msk.bf16.mxu1 %vm581_vm0, %v10553_v47 }
 0x56a   : > { %8056 = vmatmul.mubr.msk.bf16.gmra.mrb[28].mxu1 %vm581_vm0, %v7012_v6 }
 0x56b   : > { %8063 = vmatprep.mubr.msk.bf16.mxu1 %vm581_vm0, %v10401_v4  ;;  %v6051_v4 = vrot.slane %v3508_v17, 5 }
 0x572   : > { %8064 = vmatmul.mubr.msk.bf16.vlgmr.msra.gmra.mrb[0].mxu1 %vm581_vm0, %v10419_v9 }
 0x573   : > { %8067 = vmatprep.mubr.msk.bf16.mxu1 %vm581_vm0, %v10423_v22 }
 0x57a   : > { %8068 = vmatmul.mubr.msk.bf16.gmra.mrb[4].mxu1 %vm581_vm0, %v10438_v57 }
 0x57b   : > { %8071 = vmatprep.mubr.msk.bf16.mxu1 %vm581_vm0, %v10442_v21 }
 0x582   : > { %8072 = vmatmul.mubr.msk.bf16.gmra.mrb[8].mxu1 %vm581_vm0, %v10264_v3  ;;  %v6048_v3 = vrot.slane %v3507_v60, 5 }
 0x583   : > { %8075 = vmatprep.mubr.msk.bf16.mxu1 %vm581_vm0, %v10271_v8  ;;  %v7031_v8 = vrot.slane %v10631_v27, 9 }
 0x58a   : > { %8076 = vmatmul.mubr.msk.bf16.gmra.mrb[12].mxu1 %vm581_vm0, %v10283_v46  ;;  %v6050_v46 = vrot.slane %v6048_v3, 4 }
 0x58b   : > { %8079 = vmatprep.mubr.msk.bf16.mxu1 %vm581_vm0, %v10291_v7  ;;  %v6049_v7 = vsel %vm10240_vm2, %v7031_v8, %v6048_v3 }
 0x592   : > { %8080 = vmatmul.mubr.msk.bf16.gmra.mrb[16].mxu1 %vm581_vm0, %v10305_v52  ;;  %v6052_v52 = vsel %vm10240_vm2, %v6050_v46, %v6051_v4 }
 0x593   : > { %8083 = vmatprep.mubr.msk.bf16.mxu1 %vm581_vm0, %v10311_v38  ;;  %v7032_v38 = vcombine.low %v6049_v7, %v6052_v52 }
 0x59a   : > { %8084 = vmatmul.mubr.msk.bf16.gmra.mrb[20].mxu1 %vm581_vm0, %v10328_v29  ;;  %v10714_v29 = vld [vmem:[%s10943_s5] ss:$0 sm:$0xff] }
 0x59b   : > { %8087 = vmatprep.mubr.msk.bf16.mxu1 %vm581_vm0, %v10338_v19 }
 0x5a2   : > { %8088 = vmatmul.mubr.msk.bf16.gmra.mrb[24].mxu1 %vm581_vm0, %v10351_v39  ;;  %v10719_v39 = vld [vmem:[%s10944_s6] ss:$0 sm:$0xff] }
 0x5a3   : > { %8091 = vmatprep.mubr.msk.bf16.mxu1 %vm581_vm0, %v10358_v31 }
 0x5aa   : > { %8092 = vmatmul.mubr.msk.bf16.gmra.mrb[28].mxu1 %vm581_vm0, %v7032_v38 }
 0x645   : > { %v8065_v19 = vpop.f32.mrb[0].mxu1 }
 0x646   : > { %v6277_v31 = vmul.f32 %v8065_v19, %v10714_v29  ;;  %v6109_v62 = vpop.f32.mrb[1].mxu1 }
 0x647   : > { %v6275_v9 = vmul.f32 %v10714_v29, %v6109_v62  ;;  %v8066_v22 = vpop.f32.mrb[2].mxu1 }
 0x648   : > { %v6316_v57 = vadd.f32 %v10719_v39, %v6277_v31  ;;  %v6278_v21 = vmul.f32 %v8066_v22, %v10714_v29  ;;  %v6112_v55 = vpop.f32.mrb[3].mxu1 }
 0x649   : > { %v6314_v58 = vadd.f32 %v10719_v39, %v6275_v9  ;;  %v6276_v45 = vmul.f32 %v10714_v29, %v6112_v55 }
 0x64a   : > { %vm6348_vm11 = vcmp.gt.f32.partialorder %v6316_v57, 0.0  ;;  %v6380_v53 = vmul.f32 0.1, %v6316_v57  ;;  %v6317_v25 = vadd.f32 %v10719_v39, %v6278_v21 }
 0x64b   : > { %vm6346_vm7 = vcmp.gt.f32.partialorder %v6314_v58, 0.0  ;;  %v6378_v26 = vmul.f32 0.1, %v6314_v58  ;;  %v6315_v36 = vadd.f32 %v10719_v39, %v6276_v45 }
 0x64c   : > { %v6412_v51 = vsel %vm6348_vm11, %v6316_v57, %v6380_v53  ;;  %vm6349_vm15 = vcmp.gt.f32.partialorder %v6317_v25, 0.0  ;;  %v6381_v40 = vmul.f32 0.1, %v6317_v25  ;;  %v7063_v57 = vld [vmem:[%s8887_s23 + $0x91] sm:$0xff] }
 0x64d   : > { %v6477_v20 = vadd.f32 %v7055_v34, %v6412_v51  ;;  %v6410_v61 = vsel %vm6346_vm7, %v6314_v58, %v6378_v26  ;;  %vm6347_vm1 = vcmp.gt.f32.partialorder %v6315_v36, 0.0  ;;  %v6379_v44 = vmul.f32 0.1, %v6315_v36  ;;  %v8069_v28 = vpop.f32.mrb[4].mxu1  ;;  %v7061_v58 = vld [vmem:[%s8887_s23 + $0x79] sm:$0xff]  ;;  %v7062_v51 = vld [vmem:[%s8887_s23 + $0x81] sm:$0xff] }
 0x64e   : > { %v6475_v30 = vadd.f32 %v7053_v49, %v6410_v61  ;;  %v6413_v2 = vsel %vm6349_vm15, %v6317_v25, %v6381_v40  ;;  %v6281_v18 = vmul.f32 %v8069_v28, %v10714_v29  ;;  %v6125_v12 = vpop.f32.mrb[5].mxu1  ;;  %v7064_v25 = vld [vmem:[%s8887_s23 + $0x99] sm:$0xff] }
 0x64f   : > { %6509 = vst.msk [vmem:[%s10737_s9 + $0x10] sm:$0xff] %vm581_vm0, %v6477_v20  ;;  %v6478_v47 = vadd.f32 %v7056_v10, %v6413_v2  ;;  %v6411_v63 = vsel %vm6347_vm1, %v6315_v36, %v6379_v44  ;;  %v6279_v14 = vmul.f32 %v10714_v29, %v6125_v12  ;;  %v8070_v50 = vpop.f32.mrb[6].mxu1 }
 0x650   : > { %6507 = vst.msk [vmem:[%s10737_s9] sm:$0xff] %vm581_vm0, %v6475_v30  ;;  %v6476_v23 = vadd.f32 %v7054_v13, %v6411_v63  ;;  %v6320_v27 = vadd.f32 %v10719_v39, %v6281_v18  ;;  %v6282_v60 = vmul.f32 %v8070_v50, %v10714_v29  ;;  %v6128_v43 = vpop.f32.mrb[7].mxu1 }
 0x651   : > { %6510 = vst.msk [vmem:[%s10737_s9 + $0x18] sm:$0xff] %vm581_vm0, %v6478_v47  ;;  %v6318_v35 = vadd.f32 %v10719_v39, %v6279_v14  ;;  %v6280_v59 = vmul.f32 %v10714_v29, %v6128_v43 }
 0x652   : > { %6508 = vst.msk [vmem:[%s10737_s9 + $0x8] sm:$0xff] %vm581_vm0, %v6476_v23  ;;  %vm6352_vm3 = vcmp.gt.f32.partialorder %v6320_v27, 0.0  ;;  %v6384_v37 = vmul.f32 0.1, %v6320_v27  ;;  %v6321_v48 = vadd.f32 %v10719_v39, %v6282_v60 }
 0x653   : > { %vm6350_vm4 = vcmp.gt.f32.partialorder %v6318_v35, 0.0  ;;  %v6382_v33 = vmul.f32 0.1, %v6318_v35  ;;  %v6319_v0 = vadd.f32 %v10719_v39, %v6280_v59 }
 0x654   : > { %v6416_v41 = vsel %vm6352_vm3, %v6320_v27, %v6384_v37  ;;  %vm6353_vm6 = vcmp.gt.f32.partialorder %v6321_v48, 0.0  ;;  %v6385_v17 = vmul.f32 0.1, %v6321_v48  ;;  %v7067_v27 = vld [vmem:[%s8887_s23 + $0xc1] sm:$0xff] }
 0x655   : > { %v6481_v42 = vadd.f32 %v7059_v56, %v6416_v41  ;;  %v6414_v24 = vsel %vm6350_vm4, %v6318_v35, %v6382_v33  ;;  %vm6351_vm9 = vcmp.gt.f32.partialorder %v6319_v0, 0.0  ;;  %v6383_v11 = vmul.f32 0.1, %v6319_v0  ;;  %v8073_v15 = vpop.f32.mrb[8].mxu1  ;;  %v7065_v35 = vld [vmem:[%s8887_s23 + $0xa9] sm:$0xff]  ;;  %v7066_v41 = vld [vmem:[%s8887_s23 + $0xb1] sm:$0xff] }
 0x656   : > { %v6479_v1 = vadd.f32 %v7057_v16, %v6414_v24  ;;  %v6417_v32 = vsel %vm6353_vm6, %v6321_v48, %v6385_v17  ;;  %v6285_v6 = vmul.f32 %v8073_v15, %v10714_v29  ;;  %v6141_v3 = vpop.f32.mrb[9].mxu1  ;;  %v7068_v48 = vld [vmem:[%s8887_s23 + $0xc9] sm:$0xff] }
 0x657   : > { %6513 = vst.msk [vmem:[%s10737_s9 + $0x30] sm:$0xff] %vm581_vm0, %v6481_v42  ;;  %v6482_v8 = vadd.f32 %v7060_v5, %v6417_v32  ;;  %v6415_v46 = vsel %vm6351_vm9, %v6319_v0, %v6383_v11  ;;  %v6283_v4 = vmul.f32 %v10714_v29, %v6141_v3  ;;  %v8074_v7 = vpop.f32.mrb[10].mxu1 }
 0x658   : > { %6511 = vst.msk [vmem:[%s10737_s9 + $0x20] sm:$0xff] %vm581_vm0, %v6479_v1  ;;  %v6480_v52 = vadd.f32 %v7058_v54, %v6415_v46  ;;  %v6324_v38 = vadd.f32 %v10719_v39, %v6285_v6  ;;  %v6286_v19 = vmul.f32 %v8074_v7, %v10714_v29  ;;  %v6144_v31 = vpop.f32.mrb[11].mxu1 }
 0x659   : > { %6514 = vst.msk [vmem:[%s10737_s9 + $0x38] sm:$0xff] %vm581_vm0, %v6482_v8  ;;  %v6322_v62 = vadd.f32 %v10719_v39, %v6283_v4  ;;  %v6284_v9 = vmul.f32 %v10714_v29, %v6144_v31 }
 0x65a   : > { %6512 = vst.msk [vmem:[%s10737_s9 + $0x28] sm:$0xff] %vm581_vm0, %v6480_v52  ;;  %vm6356_vm10 = vcmp.gt.f32.partialorder %v6324_v38, 0.0  ;;  %v6388_v22 = vmul.f32 0.1, %v6324_v38  ;;  %v6325_v21 = vadd.f32 %v10719_v39, %v6286_v19 }
 0x65b   : > { %vm6354_vm12 = vcmp.gt.f32.partialorder %v6322_v62, 0.0  ;;  %v6386_v55 = vmul.f32 0.1, %v6322_v62  ;;  %v6323_v45 = vadd.f32 %v10719_v39, %v6284_v9 }
 0x65c   : > { %v6420_v53 = vsel %vm6356_vm10, %v6324_v38, %v6388_v22  ;;  %vm6357_vm13 = vcmp.gt.f32.partialorder %v6325_v21, 0.0  ;;  %v6389_v34 = vmul.f32 0.1, %v6325_v21  ;;  %v7071_v38 = vld [vmem:[%s8887_s23 + $0xf1] sm:$0xff] }
 0x65d   : > { %v6485_v26 = vadd.f32 %v7063_v57, %v6420_v53  ;;  %v6418_v49 = vsel %vm6354_vm12, %v6322_v62, %v6386_v55  ;;  %vm6355_vm14 = vcmp.gt.f32.partialorder %v6323_v45, 0.0  ;;  %v6387_v36 = vmul.f32 0.1, %v6323_v45  ;;  %v8077_v40 = vpop.f32.mrb[12].mxu1  ;;  %v7069_v62 = vld [vmem:[%s8887_s23 + $0xd9] sm:$0xff]  ;;  %v7070_v53 = vld [vmem:[%s8887_s23 + $0xe1] sm:$0xff] }
 0x65e   : > { %v6483_v10 = vadd.f32 %v7061_v58, %v6418_v49  ;;  %v6421_v20 = vsel %vm6357_vm13, %v6325_v21, %v6389_v34  ;;  %v6289_v61 = vmul.f32 %v8077_v40, %v10714_v29  ;;  %v6157_v44 = vpop.f32.mrb[13].mxu1  ;;  %v7072_v21 = vld [vmem:[%s8887_s23 + $0xf9] sm:$0xff] }
 0x65f   : > { %6517 = vst.msk [vmem:[%s10737_s9 + $0x50] sm:$0xff] %vm581_vm0, %v6485_v26  ;;  %v6486_v13 = vadd.f32 %v7064_v25, %v6421_v20  ;;  %v6419_v28 = vsel %vm6355_vm14, %v6323_v45, %v6387_v36  ;;  %v6287_v30 = vmul.f32 %v10714_v29, %v6157_v44  ;;  %v8078_v2 = vpop.f32.mrb[14].mxu1 }
 0x660   : > { %6515 = vst.msk [vmem:[%s10737_s9 + $0x40] sm:$0xff] %vm581_vm0, %v6483_v10  ;;  %v6484_v18 = vadd.f32 %v7062_v51, %v6419_v28  ;;  %v6328_v12 = vadd.f32 %v10719_v39, %v6289_v61  ;;  %v6290_v47 = vmul.f32 %v8078_v2, %v10714_v29  ;;  %v6160_v63 = vpop.f32.mrb[15].mxu1 }
 0x661   : > { %6518 = vst.msk [vmem:[%s10737_s9 + $0x58] sm:$0xff] %vm581_vm0, %v6486_v13  ;;  %v6326_v14 = vadd.f32 %v10719_v39, %v6287_v30  ;;  %v6288_v50 = vmul.f32 %v10714_v29, %v6160_v63 }
 0x662   : > { %6516 = vst.msk [vmem:[%s10737_s9 + $0x48] sm:$0xff] %vm581_vm0, %v6484_v18  ;;  %vm6360_vm5 = vcmp.gt.f32.partialorder %v6328_v12, 0.0  ;;  %v6392_v23 = vmul.f32 0.1, %v6328_v12  ;;  %v6329_v60 = vadd.f32 %v10719_v39, %v6290_v47 }
 0x663   : > { %vm6358_vm8 = vcmp.gt.f32.partialorder %v6326_v14, 0.0  ;;  %v6390_v43 = vmul.f32 0.1, %v6326_v14  ;;  %v6327_v59 = vadd.f32 %v10719_v39, %v6288_v50 }
 0x664   : > { %v6424_v37 = vsel %vm6360_vm5, %v6328_v12, %v6392_v23  ;;  %vm6361_vm2 = vcmp.gt.f32.partialorder %v6329_v60, 0.0  ;;  %v6393_v56 = vmul.f32 0.1, %v6329_v60  ;;  %v7075_v12 = vld [vmem:[%s8887_s23 + $0x121] sm:$0xff] }
 0x665   : > { %v6489_v33 = vadd.f32 %v7067_v27, %v6424_v37  ;;  %v6422_v16 = vsel %vm6358_vm8, %v6326_v14, %v6390_v43  ;;  %vm6359_vm11 = vcmp.gt.f32.partialorder %v6327_v59, 0.0  ;;  %v6391_v0 = vmul.f32 0.1, %v6327_v59  ;;  %v8081_v17 = vpop.f32.mrb[16].mxu1  ;;  %v7073_v14 = vld [vmem:[%s8887_s23 + $0x109] sm:$0xff]  ;;  %v7074_v37 = vld [vmem:[%s8887_s23 + $0x111] sm:$0xff] }
 0x666   : > { %v6487_v5 = vadd.f32 %v7065_v35, %v6422_v16  ;;  %v6425_v42 = vsel %vm6361_vm2, %v6329_v60, %v6393_v56  ;;  %v6293_v24 = vmul.f32 %v8081_v17, %v10714_v29  ;;  %v6173_v11 = vpop.f32.mrb[17].mxu1  ;;  %v7076_v60 = vld [vmem:[%s8887_s23 + $0x129] sm:$0xff] }
 0x667   : > { %6521 = vst.msk [vmem:[%s10737_s9 + $0x70] sm:$0xff] %vm581_vm0, %v6489_v33  ;;  %v6490_v54 = vadd.f32 %v7068_v48, %v6425_v42  ;;  %v6423_v15 = vsel %vm6359_vm11, %v6327_v59, %v6391_v0  ;;  %v6291_v1 = vmul.f32 %v10714_v29, %v6173_v11  ;;  %v8082_v32 = vpop.f32.mrb[18].mxu1 }
 0x668   : > { %6519 = vst.msk [vmem:[%s10737_s9 + $0x60] sm:$0xff] %vm581_vm0, %v6487_v5  ;;  %v6488_v6 = vadd.f32 %v7066_v41, %v6423_v15  ;;  %v6332_v3 = vadd.f32 %v10719_v39, %v6293_v24  ;;  %v6294_v8 = vmul.f32 %v8082_v32, %v10714_v29  ;;  %v6176_v46 = vpop.f32.mrb[19].mxu1 }
 0x669   : > { %6522 = vst.msk [vmem:[%s10737_s9 + $0x78] sm:$0xff] %vm581_vm0, %v6490_v54  ;;  %v6330_v4 = vadd.f32 %v10719_v39, %v6291_v1  ;;  %v6292_v7 = vmul.f32 %v10714_v29, %v6176_v46 }
 0x66a   : > { %6520 = vst.msk [vmem:[%s10737_s9 + $0x68] sm:$0xff] %vm581_vm0, %v6488_v6  ;;  %vm6364_vm7 = vcmp.gt.f32.partialorder %v6332_v3, 0.0  ;;  %v6396_v52 = vmul.f32 0.1, %v6332_v3  ;;  %v6333_v19 = vadd.f32 %v10719_v39, %v6294_v8 }
 0x66b   : > { %vm6362_vm15 = vcmp.gt.f32.partialorder %v6330_v4, 0.0  ;;  %v6394_v31 = vmul.f32 0.1, %v6330_v4  ;;  %v6331_v9 = vadd.f32 %v10719_v39, %v6292_v7 }
 0x66c   : > { %v6428_v22 = vsel %vm6364_vm7, %v6332_v3, %v6396_v52  ;;  %vm6365_vm1 = vcmp.gt.f32.partialorder %v6333_v19, 0.0  ;;  %v6397_v57 = vmul.f32 0.1, %v6333_v19  ;;  %v7079_v3 = vld [vmem:[%s8887_s23 + $0x151] sm:$0xff] }
 0x66d   : > { %v6493_v55 = vadd.f32 %v7071_v38, %v6428_v22  ;;  %v6426_v58 = vsel %vm6362_vm15, %v6330_v4, %v6394_v31  ;;  %vm6363_vm3 = vcmp.gt.f32.partialorder %v6331_v9, 0.0  ;;  %v6395_v45 = vmul.f32 0.1, %v6331_v9  ;;  %v8085_v34 = vpop.f32.mrb[20].mxu1  ;;  %v7077_v4 = vld [vmem:[%s8887_s23 + $0x139] sm:$0xff]  ;;  %v7078_v22 = vld [vmem:[%s8887_s23 + $0x141] sm:$0xff] }
 0x66e   : > { %v6491_v25 = vadd.f32 %v7069_v62, %v6426_v58  ;;  %v6429_v26 = vsel %vm6365_vm1, %v6333_v19, %v6397_v57  ;;  %v6297_v49 = vmul.f32 %v8085_v34, %v10714_v29  ;;  %v6189_v36 = vpop.f32.mrb[21].mxu1  ;;  %v7080_v19 = vld [vmem:[%s8887_s23 + $0x159] sm:$0xff] }
 0x66f   : > { %6525 = vst.msk [vmem:[%s10737_s9 + $0x90] sm:$0xff] %vm581_vm0, %v6493_v55  ;;  %v6494_v51 = vadd.f32 %v7072_v21, %v6429_v26  ;;  %v6427_v40 = vsel %vm6363_vm3, %v6331_v9, %v6395_v45  ;;  %v6295_v10 = vmul.f32 %v10714_v29, %v6189_v36  ;;  %v8086_v20 = vpop.f32.mrb[22].mxu1 }
 0x670   : > { %6523 = vst.msk [vmem:[%s10737_s9 + $0x80] sm:$0xff] %vm581_vm0, %v6491_v25  ;;  %v6492_v61 = vadd.f32 %v7070_v53, %v6427_v40  ;;  %v6336_v44 = vadd.f32 %v10719_v39, %v6297_v49  ;;  %v6298_v13 = vmul.f32 %v8086_v20, %v10714_v29  ;;  %v6192_v28 = vpop.f32.mrb[23].mxu1 }
 0x671   : > { %6526 = vst.msk [vmem:[%s10737_s9 + $0x98] sm:$0xff] %vm581_vm0, %v6494_v51  ;;  %v6334_v30 = vadd.f32 %v10719_v39, %v6295_v10  ;;  %v6296_v2 = vmul.f32 %v10714_v29, %v6192_v28 }
 0x672   : > { %6524 = vst.msk [vmem:[%s10737_s9 + $0x88] sm:$0xff] %vm581_vm0, %v6492_v61  ;;  %vm6368_vm4 = vcmp.gt.f32.partialorder %v6336_v44, 0.0  ;;  %v6400_v18 = vmul.f32 0.1, %v6336_v44  ;;  %v6337_v47 = vadd.f32 %v10719_v39, %v6298_v13 }
 0x673   : > { %vm6366_vm6 = vcmp.gt.f32.partialorder %v6334_v30, 0.0  ;;  %v6398_v63 = vmul.f32 0.1, %v6334_v30  ;;  %v6335_v50 = vadd.f32 %v10719_v39, %v6296_v2 }
 0x674   : > { %v6432_v23 = vsel %vm6368_vm4, %v6336_v44, %v6400_v18  ;;  %vm6369_vm9 = vcmp.gt.f32.partialorder %v6337_v47, 0.0  ;;  %v6401_v27 = vmul.f32 0.1, %v6337_v47  ;;  %v7083_v44 = vld [vmem:[%s8887_s23 + $0x181] sm:$0xff] }
 0x675   : > { %v6497_v43 = vadd.f32 %v7075_v12, %v6432_v23  ;;  %v6430_v35 = vsel %vm6366_vm6, %v6334_v30, %v6398_v63  ;;  %vm6367_vm10 = vcmp.gt.f32.partialorder %v6335_v50, 0.0  ;;  %v6399_v59 = vmul.f32 0.1, %v6335_v50  ;;  %v8089_v56 = vpop.f32.mrb[24].mxu1  ;;  %v7081_v30 = vld [vmem:[%s8887_s23 + $0x169] sm:$0xff] }
 0x676   : > { %v6495_v48 = vadd.f32 %v7073_v14, %v6430_v35  ;;  %v6433_v33 = vsel %vm6369_vm9, %v6337_v47, %v6401_v27  ;;  %v6301_v16 = vmul.f32 %v8089_v56, %v10714_v29  ;;  %v6205_v0 = vpop.f32.mrb[25].mxu1  ;;  %v7084_v47 = vld [vmem:[%s8887_s23 + $0x189] sm:$0xff] }
 0x677   : > { %6529 = vst.msk [vmem:[%s10737_s9 + $0xb0] sm:$0xff] %vm581_vm0, %v6497_v43  ;;  %v6498_v41 = vadd.f32 %v7076_v60, %v6433_v33  ;;  %v6431_v17 = vsel %vm6367_vm10, %v6335_v50, %v6399_v59  ;;  %v6299_v5 = vmul.f32 %v10714_v29, %v6205_v0  ;;  %v8090_v42 = vpop.f32.mrb[26].mxu1  ;;  %v7082_v50 = vld [vmem:[%s8887_s23 + $0x171] sm:$0xff]  ;;  %s10897_s23 = scalar_lea.sflag [#allocation4], %s269_s29 }
 0x678   : > { %6527 = vst.msk [vmem:[%s10737_s9 + $0xa0] sm:$0xff] %vm581_vm0, %v6495_v48  ;;  %v6496_v24 = vadd.f32 %v7074_v37, %v6431_v17  ;;  %v6340_v11 = vadd.f32 %v10719_v39, %v6301_v16  ;;  %v6302_v54 = vmul.f32 %v8090_v42, %v10714_v29  ;;  %v6208_v15 = vpop.f32.mrb[27].mxu1 }
 0x679   : > { %6530 = vst.msk [vmem:[%s10737_s9 + $0xb8] sm:$0xff] %vm581_vm0, %v6498_v41  ;;  %v6338_v1 = vadd.f32 %v10719_v39, %v6299_v5  ;;  %v6300_v32 = vmul.f32 %v10714_v29, %v6208_v15 }
 0x67a   : > { %6528 = vst.msk [vmem:[%s10737_s9 + $0xa8] sm:$0xff] %vm581_vm0, %v6496_v24  ;;  %vm6372_vm12 = vcmp.gt.f32.partialorder %v6340_v11, 0.0  ;;  %v6404_v6 = vmul.f32 0.1, %v6340_v11  ;;  %v6341_v8 = vadd.f32 %v10719_v39, %v6302_v54 }
 0x67b   : > { %vm6370_vm13 = vcmp.gt.f32.partialorder %v6338_v1, 0.0  ;;  %v6402_v46 = vmul.f32 0.1, %v6338_v1  ;;  %v6339_v7 = vadd.f32 %v10719_v39, %v6300_v32 }
 0x67c   : > { %v6436_v52 = vsel %vm6372_vm12, %v6340_v11, %v6404_v6  ;;  %vm6373_vm14 = vcmp.gt.f32.partialorder %v6341_v8, 0.0  ;;  %v6405_v38 = vmul.f32 0.1, %v6341_v8 }
 0x67d   : > { %v6501_v31 = vadd.f32 %v7079_v3, %v6436_v52  ;;  %v6434_v62 = vsel %vm6370_vm13, %v6338_v1, %v6402_v46  ;;  %vm6371_vm5 = vcmp.gt.f32.partialorder %v6339_v7, 0.0  ;;  %v6403_v9 = vmul.f32 0.1, %v6339_v7  ;;  %v8093_v57 = vpop.f32.mrb[28].mxu1 }
 0x67e   : > { %v6499_v21 = vadd.f32 %v7077_v4, %v6434_v62  ;;  %v6437_v55 = vsel %vm6373_vm14, %v6341_v8, %v6405_v38  ;;  %v6305_v58 = vmul.f32 %v8093_v57, %v10714_v29  ;;  %v6221_v45 = vpop.f32.mrb[29].mxu1 }
 0x67f   : > { %6533 = vst.msk [vmem:[%s10737_s9 + $0xd0] sm:$0xff] %vm581_vm0, %v6501_v31  ;;  %v6502_v53 = vadd.f32 %v7080_v19, %v6437_v55  ;;  %v6435_v34 = vsel %vm6371_vm5, %v6339_v7, %v6403_v9  ;;  %v6303_v25 = vmul.f32 %v10714_v29, %v6221_v45  ;;  %v8094_v26 = vpop.f32.mrb[30].mxu1 }
 0x680   : > { %6531 = vst.msk [vmem:[%s10737_s9 + $0xc0] sm:$0xff] %vm581_vm0, %v6499_v21  ;;  %v6500_v49 = vadd.f32 %v7078_v22, %v6435_v34  ;;  %v6344_v36 = vadd.f32 %v10719_v39, %v6305_v58  ;;  %v6306_v51 = vmul.f32 %v8094_v26, %v10714_v29  ;;  %v6224_v40 = vpop.f32.mrb[31].mxu1 }
 0x681   : > { %6534 = vst.msk [vmem:[%s10737_s9 + $0xd8] sm:$0xff] %vm581_vm0, %v6502_v53  ;;  %v6342_v10 = vadd.f32 %v10719_v39, %v6303_v25  ;;  %v6304_v20 = vmul.f32 %v10714_v29, %v6224_v40 }
 0x682   : > { %6532 = vst.msk [vmem:[%s10737_s9 + $0xc8] sm:$0xff] %vm581_vm0, %v6500_v49  ;;  %vm6376_vm8 = vcmp.gt.f32.partialorder %v6344_v36, 0.0  ;;  %v6408_v61 = vmul.f32 0.1, %v6344_v36  ;;  %v6345_v13 = vadd.f32 %v10719_v39, %v6306_v51 }
 0x683   : > { %vm6374_vm2 = vcmp.gt.f32.partialorder %v6342_v10, 0.0  ;;  %v6406_v28 = vmul.f32 0.1, %v6342_v10  ;;  %v6343_v2 = vadd.f32 %v10719_v39, %v6304_v20 }
 0x684   : > { %v6440_v18 = vsel %vm6376_vm8, %v6344_v36, %v6408_v61  ;;  %vm6377_vm11 = vcmp.gt.f32.partialorder %v6345_v13, 0.0  ;;  %v6409_v12 = vmul.f32 0.1, %v6345_v13 }
 0x685   : > { %v6505_v29 = vadd.f32 %v7083_v44, %v6440_v18  ;;  %v6438_v63 = vsel %vm6374_vm2, %v6342_v10, %v6406_v28  ;;  %vm6375_vm7 = vcmp.gt.f32.partialorder %v6343_v2, 0.0  ;;  %v6407_v14 = vmul.f32 0.1, %v6343_v2 }
 0x686   : > { %v6503_v23 = vadd.f32 %v7081_v30, %v6438_v63  ;;  %v6441_v27 = vsel %vm6377_vm11, %v6345_v13, %v6409_v12 }
 0x687   : > { %6537 = vst.msk [vmem:[%s10737_s9 + $0xf0] sm:$0xff] %vm581_vm0, %v6505_v29  ;;  %v6506_v39 = vadd.f32 %v7084_v47, %v6441_v27  ;;  %v6439_v60 = vsel %vm6375_vm7, %v6343_v2, %v6407_v14 }
 0x688   : > { %6535 = vst.msk [vmem:[%s10737_s9 + $0xe0] sm:$0xff] %vm581_vm0, %v6503_v23  ;;  %v6504_v43 = vadd.f32 %v7082_v50, %v6439_v60 }
 0x689   : > { %6538 = vst.msk [vmem:[%s10737_s9 + $0xf8] sm:$0xff] %vm581_vm0, %v6506_v39 }
 0x68a   : > { %6536 = vst.msk [vmem:[%s10737_s9 + $0xe8] sm:$0xff] %vm581_vm0, %v6504_v43 }
 0x68b   : > { %8728 = shalt.err (!%p8725_p3)
}
 0x68c   : > { %s8729_s21 = scalar_lea.hbm %s10885_s28, 4096  ;;  %s8733_s8 = scalar_lea.hbm %s10945_s7, 8192 }
 0x68d   : > { %p8730_p4 = scmp.ne.s32.totalorder %s10885_s28, %s8729_s21  ;;  %p8734_p9 = scmp.lt.u32.totalorder %s10885_s28, %s10945_s7 }
 0x68e   : > { %p8735_p10 = scmp.lt.u32.totalorder %s8733_s8, %s8729_s21  ;;  %p8737_p12 = scmp.lt.u32.totalorder %s8729_s21, %s10885_s28 }
 0x68f   : > { %p8731_p7 = pnand %p8730_p4, %p8861_p5 }
 0x690   : > { %p8736_p11 = por %p8735_p10, %p8734_p9 }
 0x691   : > { %p8732_p8 = pneg %p8731_p7 }
 0x692   : > { %p8738_p13 = por %p8737_p12, %p8736_p11 }
 0x694   : > { %p8739_p0 = pnand %p8738_p13, %p8732_p8 }
 0x696   : > { %8742 = shalt.err (!%p8739_p0)
}
 0x697   : > { %s8781_s15 = smov 128   ;;  %s8782_s16 = smov 8  }
 0x698   : > { %8608 = dma.vmem_to_hbm [thread:$0]  (%p8861_p5), %s10887_s14, 4096, %s10885_s28, %s10897_s23, %s8781_s15, %s8781_s15, %s8782_s16  }
 0x699 PF: > { %p8614_p1 = scmp.ge.s32.totalorder %s8777_s27, 2  ;;  %s6568_s17 = sand.u32 1, %s8765_s24  }
 0x69a   : > { %s6569_s18 = scalar_lea.sflag [#allocation4], %s6568_s17 }
 0x69b   : > { %p8611_p2 = pnand %p8614_p1, %p8865_p6 }
 0x69d   : > { %8760 = dma.done.wait (!%p8611_p2), %s6569_s18, 4096  }
 0x69e   : > { %8762 = vsyncadd (!%p8611_p2), %s6569_s18, 4294963200  ;;  %p17_p3 = scmp.ge.s32.totalorder %s8848_s30, 4   ;;  %s11023_s24 = smov %s8769_s25 }
 0x69f   : > { %s11024_s25 = smov %s8773_s26  ;;  %s11025_s26 = smov %s8859_s10 }
 0x6a0   : > { %s11026_s27 = smov %s8848_s30  ;;  %19 = sbr.rel (!%p17_p3) target bundleno = 3 (0x3), region = 86 }
 0x6a7   :  { %6574 = vsyncpa [#allocation4], 1 }
 0x6a8   :  { %6576 = vsyncpa [#allocation4 + $0x1], 1 }

</bundles_post_ra>
